<compile_context>
chip_gen: v6e
topology: v6e:2x2x1
jax: 0.10.0
libtpu: 0.0.40
codegen_flags: <defaults>
</compile_context>

<pallas_src>
import numpy as np

import jax
import jax.numpy as jnp
from jax.experimental import pallas as pl
from jax.experimental.pallas import tpu as pltpu


def _round_up(x, m):
    return (x + m - 1) // m * m


# ------------------------------ Fused kernel ------------------------------- #

def _fused_mlp_kernel(*refs):
    """Entire forward pass in one kernel.

    refs = (x, S1, M1, S2, M2, S3, M3, sel, wfin, bias_all, out).
    Per conv layer (k=3, stride=2, pad=1):
        z   = S_stack @ x                      # ONE gather GEMM for all 3 kernel rows
        acc = bias + sum_kh z[kh slab] @ M_kh  # 3 width-banded GEMMs (independent)
        x   = relu(acc)                        # f32 bias + ReLU (Dropout = identity)
    The head folds PyTorch's NCHW flatten into (sel, wfin) slab GEMMs.
    Only full-ref loads, static aligned slices, 2-D dots, broadcasts and
    elementwise max are used — everything stays on-chip.
    """
    x_ref, out_ref = refs[0], refs[-1]
    sel_ref, wfin_ref, bias_ref = refs[-4], refs[-3], refs[-2]
    conv_refs = refs[1:-4]
    n_layers = len(conv_refs) // 2

    x = x_ref[...]                                          # bf16 (B*H, 128)
    for layer in range(n_layers):                           # unrolled (3 layers)
        s_ref, m_ref = conv_refs[2 * layer], conv_refs[2 * layer + 1]
        r_pad = s_ref.shape[0] // 3                         # padded output-row slab
        n_pad = m_ref.shape[2]
        # Fused stride-2 / zero-pad H-gather for all 3 kernel rows (exact 0/1 sel).
        z = jnp.dot(s_ref[...], x,
                    preferred_element_type=jnp.float32).astype(jnp.bfloat16)
        acc = bias_ref[layer:layer + 1, :n_pad]             # (1, n_pad) f32, bcast rows
        for kh in range(3):                                 # banded-W GEMMs, unrolled
            acc = acc + jnp.dot(z[kh * r_pad:(kh + 1) * r_pad, :], m_ref[kh],
                                preferred_element_type=jnp.float32)
        # bias + ReLU in f32 on the VPU (v5e has no bf16 VPU); bf16 for next MXU stage.
        x = jnp.maximum(acc, 0.0).astype(jnp.bfloat16)

    # Head: NCHW flatten + Linear(144, 48), folded into Hf slab GEMMs.
    slab = sel_ref.shape[0] // wfin_ref.shape[0]
    zh = jnp.dot(sel_ref[...], x,
                 preferred_element_type=jnp.float32).astype(jnp.bfloat16)
    out = bias_ref[n_layers:n_layers + 1, :out_ref.shape[1]]    # (1, 48) f32
    for hf in range(wfin_ref.shape[0]):                         # unrolled
        out = out + jnp.dot(zh[hf * slab:(hf + 1) * slab, :], wfin_ref[hf],
                            preferred_element_type=jnp.float32)
    out_ref[...] = out[:out_ref.shape[0], :]


# ------------------------------- Forward path ------------------------------ #

@jax.jit
def mlp_forward(x_nchw, packed):
    """Pallas-backed forward: one fused pallas_call, tiny layout glue outside."""
    conv_packs, (sel, wfin), bias_all = packed
    B, C, H, W = x_nchw.shape
    k_pad = conv_packs[0][1].shape[1]               # lane-padded input width (128)
    # NCHW -> matrix with rows (b, h), columns (w, c); pad lanes to 128; bf16 MXU input.
    x_mat = jnp.transpose(x_nchw, (0, 2, 3, 1)).reshape(B * H, W * C)
    x_mat = jnp.pad(x_mat, ((0, 0), (0, k_pad - W * C))).astype(jnp.bfloat16)

    args = [x_mat]
    for S, M in conv_packs:
        args += [S, M]
    args += [sel, wfin, bias_all]

    return pl.pallas_call(
        _fused_mlp_kernel,
        out_shape=jax.ShapeDtypeStruct((B, wfin.shape[2]), jnp.float32),
        in_specs=[pl.BlockSpec(memory_space=pltpu.MemorySpace.VMEM)] * len(args),
        out_specs=pl.BlockSpec(memory_space=pltpu.MemorySpace.VMEM),
    )(*args)


# ---------------------------- Parameter packing ----------------------------- #

def pack_params(convs, lin, batch, height, width):
    """Pre-pack PyTorch-shaped params into the bf16 GEMM-only form used by the
    fused kernel.  Runs once on the host (numpy), NOT per forward call."""
    B, H, W = batch, height, width
    Cin = int(convs[0][0].shape[1])

    conv_packs, biases = [], []
    r_in = B * H                      # rows of current activation matrix
    img_stride = H                    # rows per image inside it
    k_pad = _round_up(W * Cin, 128)   # lane-padded column count

    for (w_oihw, b) in convs:
        w_np = np.asarray(w_oihw, np.float32)        # (Cout, Cin_l, 3, 3)
        b_np = np.asarray(b, np.float32)
        Cout, Cin_l = int(w_np.shape[0]), int(w_np.shape[1])
        Ho = (H + 2 - 3) // 2 + 1
        Wo = (W + 2 - 3) // 2 + 1
        n_real, n_pad = Wo * Cout, _round_up(Wo * Cout, 128)
        r_out, r_pad = B * Ho, _round_up(B * Ho, 16)  # 16 = bf16 sublane packing

        # S_stack: (3*r_pad, r_in) kh-major 0/1 row-selection slabs
        # (stride-2 + zero padding along H baked in; padded rows stay zero).
        S = np.zeros((3 * r_pad, r_in), np.float32)
        for kh in range(3):
            for bb in range(B):
                for oh in range(Ho):
                    h = 2 * oh + kh - 1
                    if 0 <= h < H:
                        S[kh * r_pad + bb * Ho + oh, bb * img_stride + h] = 1.0

        # M: (3, k_pad, n_pad) width-banded weights (3 column taps, stride-2 + pad
        # along W baked in); padded rows/cols stay zero.
        M = np.zeros((3, k_pad, n_pad), np.float32)
        for kh in range(3):
            for ow in range(Wo):
                for kw in range(3):
                    w_in = 2 * ow + kw - 1
                    if 0 <= w_in < W:
                        M[kh, w_in * Cin_l:(w_in + 1) * Cin_l,
                          ow * Cout:(ow + 1) * Cout] = w_np[:, :, kh, kw].T

        bias = np.zeros((n_pad,), np.float32)
        bias[:n_real] = np.tile(b_np, Wo)            # bias[ow*Cout + c] = b[c]
        biases.append(bias)

        conv_packs.append((jnp.asarray(S, jnp.bfloat16),
                           jnp.asarray(M, jnp.bfloat16)))
        H, W, r_in, img_stride, k_pad = Ho, Wo, r_pad, Ho, n_pad

    # Head: fold PyTorch's NCHW flatten order (c, h, w) into the Linear weight.
    w_map, b_map = lin
    w_np = np.asarray(w_map, np.float32)             # (48, C3*H*W)
    C3 = int(convs[-1][0].shape[0])
    n_out = int(w_np.shape[0])
    assert w_np.shape[1] == C3 * H * W, (w_np.shape, C3, H, W)

    slab = 16
    sel = np.zeros((H * slab, r_in), np.float32)     # per-hf slabs padded to 16 rows
    for hf in range(H):
        for bb in range(B):
            sel[hf * slab + bb, bb * img_stride + hf] = 1.0

    # wfin[hf, wf*C3 + c, n] = w_map[n, c*H*W + hf*W + wf]; K lane-padded to k_pad.
    wfin = np.zeros((H, k_pad, n_out), np.float32)
    wfin[:, :W * C3, :] = (w_np.reshape(n_out, C3, H, W)
                           .transpose(2, 3, 1, 0)
                           .reshape(H, W * C3, n_out))

    # Consolidated bias buffer: rows 0..L-1 = conv biases, row L = Linear bias.
    bias_width = max(max(bb.shape[0] for bb in biases), _round_up(n_out, 128))
    bias_all = np.zeros((len(biases) + 1, bias_width), np.float32)
    for i, bb in enumerate(biases):
        bias_all[i, :bb.shape[0]] = bb
    bias_all[len(biases), :n_out] = np.asarray(b_map, np.float32)

    packed = (tuple(conv_packs),
              (jnp.asarray(sel, jnp.bfloat16), jnp.asarray(wfin, jnp.bfloat16)),
              jnp.asarray(bias_all, jnp.float32))

    # VMEM footprint guard: banded M scales ~O(W^2*Cin*Cout) with resolution.
    total_bytes = sum(int(a.size) * a.dtype.itemsize
                      for a in jax.tree_util.tree_leaves(packed))
    assert total_bytes < 16 * 1024 * 1024, (
        f"packed weights ({total_bytes} B) approach the VMEM budget; "
        "switch to a Wo-tiled grid")
    return packed


# ------------------------------ Model setup -------------------------------- #

def init_params(key, n_hidden, n_layers):
    """Deterministic synthetic parameters matching the PyTorch module shapes."""
    convs = []
    cin, cout = 3, n_hidden
    for _ in range(n_layers + 1):
        key, k1, k2 = jax.random.split(key, 3)
        w = jax.random.normal(k1, (cout, cin, 3, 3), jnp.float32) * 0.1
        b = jax.random.normal(k2, (cout,), jnp.float32) * 0.05
        convs.append((w, b))
        cin, cout = cout, cout // 2
    key, k1, k2 = jax.random.split(key, 3)
    w_map = jax.random.normal(k1, (48, 144), jnp.float32) * 0.1   # nn.Linear(144, 48)
    b_map = jax.random.normal(k2, (48,), jnp.float32) * 0.05
    return convs, (w_map, b_map)


def reference_forward(x_nchw, convs, lin):
    """Pure-JAX reference (lax.conv, highest precision) for correctness check."""
    x = jnp.transpose(x_nchw, (0, 2, 3, 1))
    for w, b in convs:
        w_hwio = jnp.transpose(w, (2, 3, 1, 0))
        x = jax.lax.conv_general_dilated(
            x, w_hwio, window_strides=(2, 2), padding=((1, 1), (1, 1)),
            dimension_numbers=("NHWC", "HWIO", "NHWC"),
            precision=jax.lax.Precision.HIGHEST)
        x = jnp.maximum(x + b, 0.0)
    x = jnp.transpose(x, (0, 3, 1, 2)).reshape(x.shape[0], -1)
    w_map, b_map = lin
    return jnp.dot(x, w_map.T, precision=jax.lax.Precision.HIGHEST) + b_map


# --------------------------------- Main ------------------------------------ #

if __name__ == "__main__":
    # n_hidden=64, n_layers=2  ->  channels 3 -> 64 -> 32 -> 16
    # input 24x24 -> 12 -> 6 -> 3 spatial, so flattened dim = 16*3*3 = 144.
    n_hidden, n_layers = 64, 2
    key = jax.random.PRNGKey(0)
    key, kx = jax.random.split(key)
    x = jax.random.normal(kx, (2, 3, 24, 24), jnp.float32)   # NCHW, like PyTorch

    convs, lin = init_params(key, n_hidden, n_layers)
    packed = pack_params(convs, lin, batch=2, height=24, width=24)

    out = jax.block_until_ready(mlp_forward(x, packed))
    assert out.shape == (2, 48), out.shape

    ref = jax.block_until_ready(reference_forward(x, convs, lin))
    # bf16 MXU operands with f32 accumulation vs a Precision.HIGHEST f32 reference:
    # expected drift is O(1e-3..1e-2); 2e-2 tolerance keeps comfortable headroom.
    if not jnp.allclose(out, ref, atol=2e-2, rtol=2e-2):
        err = float(jnp.max(jnp.abs(out - ref)))
        raise AssertionError(f"Pallas output mismatch vs reference (max abs err {err})")

    print("KERNEL_OK")
</pallas_src>

<mosaic_0001>
module attributes {stable_mosaic.version = 11 : i64} {
  func.func @_fused_mlp_kernel(%arg0: memref<48x128xbf16, #tpu.memory_space<vmem>>, %arg1: memref<96x48xbf16, #tpu.memory_space<vmem>>, %arg2: memref<3x128x768xbf16, #tpu.memory_space<vmem>>, %arg3: memref<48x32xbf16, #tpu.memory_space<vmem>>, %arg4: memref<3x768x256xbf16, #tpu.memory_space<vmem>>, %arg5: memref<48x16xbf16, #tpu.memory_space<vmem>>, %arg6: memref<3x256x128xbf16, #tpu.memory_space<vmem>>, %arg7: memref<48x16xbf16, #tpu.memory_space<vmem>>, %arg8: memref<3x128x48xbf16, #tpu.memory_space<vmem>>, %arg9: memref<4x768xf32, #tpu.memory_space<vmem>>, %arg10: memref<2x48xf32, #tpu.memory_space<vmem>>) attributes {dimension_semantics = [], scalar_prefetch = 0 : i64, scratch_operands = 0 : i64, tpu.core_type = #tpu.core_type<tc>} {
    %c0 = arith.constant 0 : index
    %c0_0 = arith.constant 0 : index
    %0 = vector.load %arg0[%c0, %c0_0] : memref<48x128xbf16, #tpu.memory_space<vmem>>, vector<48x128xbf16>
    %c0_1 = arith.constant 0 : index
    %c0_2 = arith.constant 0 : index
    %1 = vector.load %arg1[%c0_1, %c0_2] : memref<96x48xbf16, #tpu.memory_space<vmem>>, vector<96x48xbf16>
    %cst = arith.constant dense<0.000000e+00> : vector<96x128xf32>
    %2 = tpu.matmul %1, %0, %cst {dimension_numbers = #tpu.dot_dimension_numbers<[1], [0], [0], [1], [0, 0, 1, 1], [], []>} : vector<96x48xbf16>, vector<48x128xbf16>, vector<96x128xf32> -> vector<96x128xf32>
    %3 = arith.truncf %2 : vector<96x128xf32> to vector<96x128xbf16>
    %c0_3 = arith.constant 0 : index
    %c0_4 = arith.constant 0 : index
    %4 = vector.load %arg9[%c0_3, %c0_4] : memref<4x768xf32, #tpu.memory_space<vmem>>, vector<1x768xf32>
    %5 = vector.extract_strided_slice %3 {offsets = [0, 0], sizes = [32, 128], strides = [1, 1]} : vector<96x128xbf16> to vector<32x128xbf16>
    %c0_5 = arith.constant 0 : index
    %c0_6 = arith.constant 0 : index
    %c0_7 = arith.constant 0 : index
    %6 = vector.load %arg2[%c0_5, %c0_6, %c0_7] : memref<3x128x768xbf16, #tpu.memory_space<vmem>>, vector<1x128x768xbf16>
    %7 = vector.shape_cast %6 : vector<1x128x768xbf16> to vector<128x768xbf16>
    %cst_8 = arith.constant dense<0.000000e+00> : vector<32x768xf32>
    %8 = tpu.matmul %5, %7, %cst_8 {dimension_numbers = #tpu.dot_dimension_numbers<[1], [0], [0], [1], [0, 0, 1, 1], [], []>} : vector<32x128xbf16>, vector<128x768xbf16>, vector<32x768xf32> -> vector<32x768xf32>
    %9 = vector.broadcast %4 : vector<1x768xf32> to vector<32x768xf32>
    %10 = arith.addf %9, %8 : vector<32x768xf32>
    %11 = vector.extract_strided_slice %3 {offsets = [32, 0], sizes = [32, 128], strides = [1, 1]} : vector<96x128xbf16> to vector<32x128xbf16>
    %c1 = arith.constant 1 : index
    %c0_9 = arith.constant 0 : index
    %c0_10 = arith.constant 0 : index
    %12 = vector.load %arg2[%c1, %c0_9, %c0_10] : memref<3x128x768xbf16, #tpu.memory_space<vmem>>, vector<1x128x768xbf16>
    %13 = vector.shape_cast %12 : vector<1x128x768xbf16> to vector<128x768xbf16>
    %cst_11 = arith.constant dense<0.000000e+00> : vector<32x768xf32>
    %14 = tpu.matmul %11, %13, %cst_11 {dimension_numbers = #tpu.dot_dimension_numbers<[1], [0], [0], [1], [0, 0, 1, 1], [], []>} : vector<32x128xbf16>, vector<128x768xbf16>, vector<32x768xf32> -> vector<32x768xf32>
    %15 = arith.addf %10, %14 : vector<32x768xf32>
    %16 = vector.extract_strided_slice %3 {offsets = [64, 0], sizes = [32, 128], strides = [1, 1]} : vector<96x128xbf16> to vector<32x128xbf16>
    %c2 = arith.constant 2 : index
    %c0_12 = arith.constant 0 : index
    %c0_13 = arith.constant 0 : index
    %17 = vector.load %arg2[%c2, %c0_12, %c0_13] : memref<3x128x768xbf16, #tpu.memory_space<vmem>>, vector<1x128x768xbf16>
    %18 = vector.shape_cast %17 : vector<1x128x768xbf16> to vector<128x768xbf16>
    %cst_14 = arith.constant dense<0.000000e+00> : vector<32x768xf32>
    %19 = tpu.matmul %16, %18, %cst_14 {dimension_numbers = #tpu.dot_dimension_numbers<[1], [0], [0], [1], [0, 0, 1, 1], [], []>} : vector<32x128xbf16>, vector<128x768xbf16>, vector<32x768xf32> -> vector<32x768xf32>
    %20 = arith.addf %15, %19 : vector<32x768xf32>
    %cst_15 = arith.constant 0.000000e+00 : f32
    %21 = vector.broadcast %cst_15 : f32 to vector<32x768xf32>
    %22 = arith.maximumf %20, %21 : vector<32x768xf32>
    %23 = arith.truncf %22 : vector<32x768xf32> to vector<32x768xbf16>
    %c0_16 = arith.constant 0 : index
    %c0_17 = arith.constant 0 : index
    %24 = vector.load %arg3[%c0_16, %c0_17] : memref<48x32xbf16, #tpu.memory_space<vmem>>, vector<48x32xbf16>
    %cst_18 = arith.constant dense<0.000000e+00> : vector<48x768xf32>
    %25 = tpu.matmul %24, %23, %cst_18 {dimension_numbers = #tpu.dot_dimension_numbers<[1], [0], [0], [1], [0, 0, 1, 1], [], []>} : vector<48x32xbf16>, vector<32x768xbf16>, vector<48x768xf32> -> vector<48x768xf32>
    %26 = arith.truncf %25 : vector<48x768xf32> to vector<48x768xbf16>
    %c1_19 = arith.constant 1 : index
    %c0_20 = arith.constant 0 : index
    %27 = vector.load %arg9[%c1_19, %c0_20] : memref<4x768xf32, #tpu.memory_space<vmem>>, vector<1x256xf32>
    %28 = vector.extract_strided_slice %26 {offsets = [0, 0], sizes = [16, 768], strides = [1, 1]} : vector<48x768xbf16> to vector<16x768xbf16>
    %c0_21 = arith.constant 0 : index
    %c0_22 = arith.constant 0 : index
    %c0_23 = arith.constant 0 : index
    %29 = vector.load %arg4[%c0_21, %c0_22, %c0_23] : memref<3x768x256xbf16, #tpu.memory_space<vmem>>, vector<1x768x256xbf16>
    %30 = vector.shape_cast %29 : vector<1x768x256xbf16> to vector<768x256xbf16>
    %cst_24 = arith.constant dense<0.000000e+00> : vector<16x256xf32>
    %31 = tpu.matmul %28, %30, %cst_24 {dimension_numbers = #tpu.dot_dimension_numbers<[1], [0], [0], [1], [0, 0, 1, 1], [], []>} : vector<16x768xbf16>, vector<768x256xbf16>, vector<16x256xf32> -> vector<16x256xf32>
    %32 = vector.broadcast %27 : vector<1x256xf32> to vector<16x256xf32>
    %33 = arith.addf %32, %31 : vector<16x256xf32>
    %34 = vector.extract_strided_slice %26 {offsets = [16, 0], sizes = [16, 768], strides = [1, 1]} : vector<48x768xbf16> to vector<16x768xbf16>
    %c1_25 = arith.constant 1 : index
    %c0_26 = arith.constant 0 : index
    %c0_27 = arith.constant 0 : index
    %35 = vector.load %arg4[%c1_25, %c0_26, %c0_27] : memref<3x768x256xbf16, #tpu.memory_space<vmem>>, vector<1x768x256xbf16>
    %36 = vector.shape_cast %35 : vector<1x768x256xbf16> to vector<768x256xbf16>
    %cst_28 = arith.constant dense<0.000000e+00> : vector<16x256xf32>
    %37 = tpu.matmul %34, %36, %cst_28 {dimension_numbers = #tpu.dot_dimension_numbers<[1], [0], [0], [1], [0, 0, 1, 1], [], []>} : vector<16x768xbf16>, vector<768x256xbf16>, vector<16x256xf32> -> vector<16x256xf32>
    %38 = arith.addf %33, %37 : vector<16x256xf32>
    %39 = vector.extract_strided_slice %26 {offsets = [32, 0], sizes = [16, 768], strides = [1, 1]} : vector<48x768xbf16> to vector<16x768xbf16>
    %c2_29 = arith.constant 2 : index
    %c0_30 = arith.constant 0 : index
    %c0_31 = arith.constant 0 : index
    %40 = vector.load %arg4[%c2_29, %c0_30, %c0_31] : memref<3x768x256xbf16, #tpu.memory_space<vmem>>, vector<1x768x256xbf16>
    %41 = vector.shape_cast %40 : vector<1x768x256xbf16> to vector<768x256xbf16>
    %cst_32 = arith.constant dense<0.000000e+00> : vector<16x256xf32>
    %42 = tpu.matmul %39, %41, %cst_32 {dimension_numbers = #tpu.dot_dimension_numbers<[1], [0], [0], [1], [0, 0, 1, 1], [], []>} : vector<16x768xbf16>, vector<768x256xbf16>, vector<16x256xf32> -> vector<16x256xf32>
    %43 = arith.addf %38, %42 : vector<16x256xf32>
    %cst_33 = arith.constant 0.000000e+00 : f32
    %44 = vector.broadcast %cst_33 : f32 to vector<16x256xf32>
    %45 = arith.maximumf %43, %44 : vector<16x256xf32>
    %46 = arith.truncf %45 : vector<16x256xf32> to vector<16x256xbf16>
    %c0_34 = arith.constant 0 : index
    %c0_35 = arith.constant 0 : index
    %47 = vector.load %arg5[%c0_34, %c0_35] : memref<48x16xbf16, #tpu.memory_space<vmem>>, vector<48x16xbf16>
    %cst_36 = arith.constant dense<0.000000e+00> : vector<48x256xf32>
    %48 = tpu.matmul %47, %46, %cst_36 {dimension_numbers = #tpu.dot_dimension_numbers<[1], [0], [0], [1], [0, 0, 1, 1], [], []>} : vector<48x16xbf16>, vector<16x256xbf16>, vector<48x256xf32> -> vector<48x256xf32>
    %49 = arith.truncf %48 : vector<48x256xf32> to vector<48x256xbf16>
    %c2_37 = arith.constant 2 : index
    %c0_38 = arith.constant 0 : index
    %50 = vector.load %arg9[%c2_37, %c0_38] : memref<4x768xf32, #tpu.memory_space<vmem>>, vector<1x128xf32>
    %51 = vector.extract_strided_slice %49 {offsets = [0, 0], sizes = [16, 256], strides = [1, 1]} : vector<48x256xbf16> to vector<16x256xbf16>
    %c0_39 = arith.constant 0 : index
    %c0_40 = arith.constant 0 : index
    %c0_41 = arith.constant 0 : index
    %52 = vector.load %arg6[%c0_39, %c0_40, %c0_41] : memref<3x256x128xbf16, #tpu.memory_space<vmem>>, vector<1x256x128xbf16>
    %53 = vector.shape_cast %52 : vector<1x256x128xbf16> to vector<256x128xbf16>
    %cst_42 = arith.constant dense<0.000000e+00> : vector<16x128xf32>
    %54 = tpu.matmul %51, %53, %cst_42 {dimension_numbers = #tpu.dot_dimension_numbers<[1], [0], [0], [1], [0, 0, 1, 1], [], []>} : vector<16x256xbf16>, vector<256x128xbf16>, vector<16x128xf32> -> vector<16x128xf32>
    %55 = vector.broadcast %50 : vector<1x128xf32> to vector<16x128xf32>
    %56 = arith.addf %55, %54 : vector<16x128xf32>
    %57 = vector.extract_strided_slice %49 {offsets = [16, 0], sizes = [16, 256], strides = [1, 1]} : vector<48x256xbf16> to vector<16x256xbf16>
    %c1_43 = arith.constant 1 : index
    %c0_44 = arith.constant 0 : index
    %c0_45 = arith.constant 0 : index
    %58 = vector.load %arg6[%c1_43, %c0_44, %c0_45] : memref<3x256x128xbf16, #tpu.memory_space<vmem>>, vector<1x256x128xbf16>
    %59 = vector.shape_cast %58 : vector<1x256x128xbf16> to vector<256x128xbf16>
    %cst_46 = arith.constant dense<0.000000e+00> : vector<16x128xf32>
    %60 = tpu.matmul %57, %59, %cst_46 {dimension_numbers = #tpu.dot_dimension_numbers<[1], [0], [0], [1], [0, 0, 1, 1], [], []>} : vector<16x256xbf16>, vector<256x128xbf16>, vector<16x128xf32> -> vector<16x128xf32>
    %61 = arith.addf %56, %60 : vector<16x128xf32>
    %62 = vector.extract_strided_slice %49 {offsets = [32, 0], sizes = [16, 256], strides = [1, 1]} : vector<48x256xbf16> to vector<16x256xbf16>
    %c2_47 = arith.constant 2 : index
    %c0_48 = arith.constant 0 : index
    %c0_49 = arith.constant 0 : index
    %63 = vector.load %arg6[%c2_47, %c0_48, %c0_49] : memref<3x256x128xbf16, #tpu.memory_space<vmem>>, vector<1x256x128xbf16>
    %64 = vector.shape_cast %63 : vector<1x256x128xbf16> to vector<256x128xbf16>
    %cst_50 = arith.constant dense<0.000000e+00> : vector<16x128xf32>
    %65 = tpu.matmul %62, %64, %cst_50 {dimension_numbers = #tpu.dot_dimension_numbers<[1], [0], [0], [1], [0, 0, 1, 1], [], []>} : vector<16x256xbf16>, vector<256x128xbf16>, vector<16x128xf32> -> vector<16x128xf32>
    %66 = arith.addf %61, %65 : vector<16x128xf32>
    %cst_51 = arith.constant 0.000000e+00 : f32
    %67 = vector.broadcast %cst_51 : f32 to vector<16x128xf32>
    %68 = arith.maximumf %66, %67 : vector<16x128xf32>
    %69 = arith.truncf %68 : vector<16x128xf32> to vector<16x128xbf16>
    %c0_52 = arith.constant 0 : index
    %c0_53 = arith.constant 0 : index
    %70 = vector.load %arg7[%c0_52, %c0_53] : memref<48x16xbf16, #tpu.memory_space<vmem>>, vector<48x16xbf16>
    %cst_54 = arith.constant dense<0.000000e+00> : vector<48x128xf32>
    %71 = tpu.matmul %70, %69, %cst_54 {dimension_numbers = #tpu.dot_dimension_numbers<[1], [0], [0], [1], [0, 0, 1, 1], [], []>} : vector<48x16xbf16>, vector<16x128xbf16>, vector<48x128xf32> -> vector<48x128xf32>
    %72 = arith.truncf %71 : vector<48x128xf32> to vector<48x128xbf16>
    %c3 = arith.constant 3 : index
    %c0_55 = arith.constant 0 : index
    %73 = vector.load %arg9[%c3, %c0_55] : memref<4x768xf32, #tpu.memory_space<vmem>>, vector<1x48xf32>
    %74 = vector.extract_strided_slice %72 {offsets = [0, 0], sizes = [16, 128], strides = [1, 1]} : vector<48x128xbf16> to vector<16x128xbf16>
    %c0_56 = arith.constant 0 : index
    %c0_57 = arith.constant 0 : index
    %c0_58 = arith.constant 0 : index
    %75 = vector.load %arg8[%c0_56, %c0_57, %c0_58] : memref<3x128x48xbf16, #tpu.memory_space<vmem>>, vector<1x128x48xbf16>
    %76 = vector.shape_cast %75 : vector<1x128x48xbf16> to vector<128x48xbf16>
    %cst_59 = arith.constant dense<0.000000e+00> : vector<16x48xf32>
    %77 = tpu.matmul %74, %76, %cst_59 {dimension_numbers = #tpu.dot_dimension_numbers<[1], [0], [0], [1], [0, 0, 1, 1], [], []>} : vector<16x128xbf16>, vector<128x48xbf16>, vector<16x48xf32> -> vector<16x48xf32>
    %78 = vector.broadcast %73 : vector<1x48xf32> to vector<16x48xf32>
    %79 = arith.addf %78, %77 : vector<16x48xf32>
    %80 = vector.extract_strided_slice %72 {offsets = [16, 0], sizes = [16, 128], strides = [1, 1]} : vector<48x128xbf16> to vector<16x128xbf16>
    %c1_60 = arith.constant 1 : index
    %c0_61 = arith.constant 0 : index
    %c0_62 = arith.constant 0 : index
    %81 = vector.load %arg8[%c1_60, %c0_61, %c0_62] : memref<3x128x48xbf16, #tpu.memory_space<vmem>>, vector<1x128x48xbf16>
    %82 = vector.shape_cast %81 : vector<1x128x48xbf16> to vector<128x48xbf16>
    %cst_63 = arith.constant dense<0.000000e+00> : vector<16x48xf32>
    %83 = tpu.matmul %80, %82, %cst_63 {dimension_numbers = #tpu.dot_dimension_numbers<[1], [0], [0], [1], [0, 0, 1, 1], [], []>} : vector<16x128xbf16>, vector<128x48xbf16>, vector<16x48xf32> -> vector<16x48xf32>
    %84 = arith.addf %79, %83 : vector<16x48xf32>
    %85 = vector.extract_strided_slice %72 {offsets = [32, 0], sizes = [16, 128], strides = [1, 1]} : vector<48x128xbf16> to vector<16x128xbf16>
    %c2_64 = arith.constant 2 : index
    %c0_65 = arith.constant 0 : index
    %c0_66 = arith.constant 0 : index
    %86 = vector.load %arg8[%c2_64, %c0_65, %c0_66] : memref<3x128x48xbf16, #tpu.memory_space<vmem>>, vector<1x128x48xbf16>
    %87 = vector.shape_cast %86 : vector<1x128x48xbf16> to vector<128x48xbf16>
    %cst_67 = arith.constant dense<0.000000e+00> : vector<16x48xf32>
    %88 = tpu.matmul %85, %87, %cst_67 {dimension_numbers = #tpu.dot_dimension_numbers<[1], [0], [0], [1], [0, 0, 1, 1], [], []>} : vector<16x128xbf16>, vector<128x48xbf16>, vector<16x48xf32> -> vector<16x48xf32>
    %89 = arith.addf %84, %88 : vector<16x48xf32>
    %90 = vector.extract_strided_slice %89 {offsets = [0, 0], sizes = [2, 48], strides = [1, 1]} : vector<16x48xf32> to vector<2x48xf32>
    %c0_68 = arith.constant 0 : index
    %c0_69 = arith.constant 0 : index
    %91 = vector.load %arg10[%c0_68, %c0_69] : memref<2x48xf32, #tpu.memory_space<vmem>>, vector<2x48xf32>
    tpu.vector_store %arg10[%c0_68, %c0_69], %90 {strides = array<i32>} : memref<2x48xf32, #tpu.memory_space<vmem>>, vector<2x48xf32>,
    return
  }
}

</mosaic_0001>

<bundles_post_ra>
// kernel: mlp_forward.1
= control target key start
LH: loop header
LB: loop body
LE: loop exit
PB: predicated region body
PF: predicated region fallthrough
CT: control target
= control target key end

     0   :  { %15 = vsyncpa [#allocation3], 0  ;;  %s7375_s0 = inlined_call_operand.vmem [shape: bf16[48,128], index: 0, kind: input, shape index: {}]   ;;  %s7376_s1 = inlined_call_operand.vmem [shape: bf16[96,48], index: 1, kind: input, shape index: {}]   ;;  %s7377_s2 = inlined_call_operand.hbm [shape: bf16[3,128,768], index: 2, kind: input, shape index: {}]   ;;  %s7378_s3 = inlined_call_operand.vmem [shape: bf16[48,32], index: 3, kind: input, shape index: {}]   ;;  %s7379_s4 = inlined_call_operand.hbm [shape: bf16[3,768,256], index: 4, kind: input, shape index: {}]   ;;  %s7380_s5 = inlined_call_operand.vmem [shape: bf16[48,16], index: 5, kind: input, shape index: {}]   ;;  %s7381_s6 = inlined_call_operand.hbm [shape: bf16[3,256,128], index: 6, kind: input, shape index: {}]   ;;  %s7382_s7 = inlined_call_operand.vmem [shape: bf16[48,16], index: 7, kind: input, shape index: {}]   ;;  %s7383_s8 = inlined_call_operand.vmem [shape: bf16[3,128,48], index: 8, kind: input, shape index: {}]   ;;  %s7384_s9 = inlined_call_operand.hbm [shape: f32[4,768], index: 9, kind: input, shape index: {}]   ;;  %s7385_s10 = inlined_call_operand.hbm [shape: f32[2,48], index: 10, kind: output, shape index: {}]  }
   0x1   :  { %16 = vsyncpa [#allocation6], 0 }
   0x2   :  { %17 = vsyncpa [#allocation9], 0 }
   0x3   :  { %18 = vsyncpa [#allocation4], 0  ;;  %s6820_s13 = smov [#allocation5]  }
   0x4   :  { %s42_s14 = sshll.u32 %s6820_s13, 4  ;;  %s43_s14 = int_to_ptr.vmem [resolvable:$true] %s42_s14 }
   0x5   :  { %s6720_s15 = scalar_lea.vmem %s43_s14, 36864  ;;  %p6725_p1 = scmp.lt.s32.totalorder %s43_s14, %s43_s14 }
   0x6   :  { %p6721_p0 = scmp.ne.s32.totalorder %s43_s14, %s6720_s15  ;;  %p6726_p2 = scmp.lt.s32.totalorder %s6720_s15, %s6720_s15 }
   0x8   :  { %p6727_p3 = por %p6726_p2, %p6725_p1 }
   0xa   :  { %p6728_p4 = pnand %p6727_p3, %p6721_p0 }
   0xc   :  { %6731 = shalt.err (!%p6728_p4)
}
   0xd   :  { %s6821_s16 = smov 128   ;;  %s6822_s17 = smov 8  }
   0xe   :  { %48 = dma.hbm_to_vmem [thread:$0]  %s7379_s4, 36864, %s43_s14, [#allocation6], %s6821_s16, %s6821_s16, %s6822_s17  }
   0xf   :  { %s6823_s20 = smov [#allocation2]  }
  0x10   :  { %s28_s21 = sshll.u32 %s6823_s20, 4  ;;  %s29_s21 = int_to_ptr.vmem [resolvable:$true] %s28_s21 }
  0x11   :  { %s6740_s22 = scalar_lea.vmem %s29_s21, 18432  ;;  %p6745_p6 = scmp.lt.s32.totalorder %s29_s21, %s29_s21 }
  0x12   :  { %p6741_p5 = scmp.ne.s32.totalorder %s29_s21, %s6740_s22  ;;  %p6746_p7 = scmp.lt.s32.totalorder %s6740_s22, %s6740_s22 }
  0x14   :  { %p6747_p8 = por %p6746_p7, %p6745_p6 }
  0x16   :  { %p6748_p9 = pnand %p6747_p8, %p6741_p5 }
  0x18   :  { %6751 = shalt.err (!%p6748_p9)
}
  0x19   :  { %s6824_s23 = smov 384   ;;  %s6825_s24 = smov 24  }
  0x1a   :  { %34 = dma.hbm_to_vmem [thread:$0]  %s7377_s2, 18432, %s29_s21, [#allocation3], %s6824_s23, %s6824_s23, %s6825_s24  }
  0x1b   :  { %s6826_s27 = smov [#allocation7]  }
  0x1c   :  { %s56_s28 = sshll.u32 %s6826_s27, 4  ;;  %s57_s28 = int_to_ptr.vmem [resolvable:$true] %s56_s28 }
  0x1d   :  { %s6760_s4 = scalar_lea.vmem %s57_s28, 6144  ;;  %p6765_p11 = scmp.lt.s32.totalorder %s57_s28, %s57_s28 }
  0x1e   :  { %p6761_p10 = scmp.ne.s32.totalorder %s57_s28, %s6760_s4  ;;  %p6766_p12 = scmp.lt.s32.totalorder %s6760_s4, %s6760_s4 }
  0x20   :  { %p6767_p13 = por %p6766_p12, %p6765_p11 }
  0x22   :  { %p6768_p0 = pnand %p6767_p13, %p6761_p10 }
  0x24   :  { %6771 = shalt.err (!%p6768_p0)
}
  0x25   :  { %s6827_s29 = smov 64   ;;  %s6828_s30 = smov 4  }
  0x26   :  { %62 = dma.hbm_to_vmem [thread:$0]  %s7381_s6, 6144, %s57_s28, [#allocation6], %s6827_s29, %s6827_s29, %s6828_s30  }
  0x27   :  { %s6829_s13 = smov [#allocation8]  }
  0x28   :  { %s73_s14 = sshll.u32 %s6829_s13, 4  ;;  %s74_s14 = int_to_ptr.vmem [resolvable:$true] %s73_s14 }
  0x29   :  { %s6780_s2 = scalar_lea.vmem %s74_s14, 384  ;;  %p6785_p2 = scmp.lt.s32.totalorder %s74_s14, %s74_s14 }
  0x2a   :  { %p6781_p1 = scmp.ne.s32.totalorder %s74_s14, %s6780_s2  ;;  %p6786_p3 = scmp.lt.s32.totalorder %s6780_s2, %s6780_s2 }
  0x2c   :  { %p6787_p4 = por %p6786_p3, %p6785_p2 }
  0x2e   :  { %p6788_p5 = pnand %p6787_p4, %p6781_p1 }
  0x30   :  { %6791 = shalt.err (!%p6788_p5)
}
  0x31   :  { %76 = dma.hbm_to_vmem [thread:$0]  %s7384_s9, 384, %s74_s14, [#allocation9]  }
  0x32   :  { %6812 = dma.done.wait [#allocation3], 18432  }
  0x33   :  { %6813 = vsyncadd [#allocation3], 4294948864 }
  0x34   :  { %6814 = dma.done.wait [#allocation6], 43008  }
  0x35   :  { %6815 = vsyncadd [#allocation6], 4294924288 }
  0x36   :  { %6816 = dma.done.wait [#allocation9], 384  }
  0x37   :  { %6817 = vsyncadd [#allocation9], 4294966912  ;;  %v5974_v0 = vld [vmem:[%s7375_s0 + $0x10] sm:$0xff]   ;;  %v5975_v1 = vld [vmem:[%s7375_s0 + $0x8] sm:$0xff]   ;;  %vm156_vm0 = vcmask 392192   ;;  %v7386_v43 = vmov 0  }
  0x38   :  { %5868 = vmatprep.subr.bf16.mxu1 %v5974_v0  ;;  %v5977_v2 = vld [vmem:[%s7376_s1] sm:$0xff]   ;;  %v5978_v4 = vld [vmem:[%s7376_s1 + $0x8] sm:$0xff]   ;;  %v5979_v5 = vld [vmem:[%s7376_s1 + $0x10] sm:$0xff]   ;;  %636 = vmatprep.mubr.bf16.mxu0 %v7386_v43  ;;  %vm1766_vm1 = vcmask 261120   ;;  %vm4152_vm2 = vcmask 130048   ;;  %vm6832_vm3 = vmmov 0  }
  0x39   :  { %5869 = vmatpush3.bf16.msra.mxu1 %v5974_v0  ;;  %v5976_v3 = vld [vmem:[%s7375_s0] sm:$0xff]   ;;  %5874 = vmatprep.mubr.msk.bf16.mxu1 %vm156_vm0, %v5977_v2  ;;  %v5983_v6 = vld [vmem:[#allocation2 + $0x150] ss:$24 sps:$4 sm:$0xff]   ;;  %v5985_v7 = vld [vmem:[#allocation2 + $0x154] ss:$24 sps:$4 sm:$0xff]   ;;  %s6833_s6 = smov [#allocation10]  }
  0x3a   :  { %5870 = vmatprep.subr.bf16.mxu1 %v5975_v1  ;;  %v5986_v8 = vld [vmem:[#allocation2 + $0x15c] ss:$24 sps:$4 sm:$0xff]   ;;  %v5988_v9 = vld [vmem:[#allocation2 + $0x158] ss:$24 sps:$4 sm:$0xff]   ;;  %v5992_v11 = vld [vmem:[#allocation2 + $0x12c] ss:$24 sps:$4 sm:$0xff]  }
  0x3b   :  { %v5991_v10 = vld [vmem:[#allocation2 + $0x124] ss:$24 sps:$4 sm:$0xff]   ;;  %604 = vmatprep.subr.bf16.mxu0 %v5986_v8  ;;  %v5994_v12 = vld [vmem:[#allocation2 + $0x128] ss:$24 sps:$4 sm:$0xff]   ;;  %v5997_v14 = vld [vmem:[#allocation2 + $0xf4] ss:$24 sps:$4 sm:$0xff]  }
  0x3c   :  { %605 = vmatpush1.bf16.msra.mxu0 %v5988_v9  ;;  %v5989_v13 = vld [vmem:[#allocation2 + $0x120] ss:$24 sps:$4 sm:$0xff]   ;;  %v5998_v15 = vld [vmem:[#allocation2 + $0xfc] ss:$24 sps:$4 sm:$0xff]   ;;  %v5995_v19 = vld [vmem:[#allocation2 + $0xf0] ss:$24 sps:$4 sm:$0xff]  }
  0x3d   :  { %5871 = vmatpush3.bf16.msra.mxu1 %v5975_v1  ;;  %606 = vmatprep.subr.bf16.mxu0 %v5992_v11  ;;  %v5980_v16 = vld [vmem:[%s7376_s1 + $0x18] sm:$0xff]   ;;  %v5981_v18 = vld [vmem:[%s7376_s1 + $0x20] sm:$0xff]   ;;  %v5982_v25 = vld [vmem:[%s7376_s1 + $0x28] sm:$0xff]   ;;  %vm5166_vm4 = vcmask 386048  }
  0x3e   :  { %5872 = vmatprep.subr.bf16.mxu1 %v5976_v3  ;;  %v6000_v17 = vld [vmem:[#allocation2 + $0xf8] ss:$24 sps:$4 sm:$0xff]   ;;  %v6003_v20 = vld [vmem:[#allocation2 + $0xc4] ss:$24 sps:$4 sm:$0xff]   ;;  %v6006_v22 = vld [vmem:[#allocation2 + $0xc8] ss:$24 sps:$4 sm:$0xff]  }
  0x3f   :  { %v6004_v21 = vld [vmem:[#allocation2 + $0xcc] ss:$24 sps:$4 sm:$0xff]   ;;  %v6001_v23 = vld [vmem:[#allocation2 + $0xc0] ss:$24 sps:$4 sm:$0xff]   ;;  %v6010_v24 = vld [vmem:[#allocation2 + $0x9c] ss:$24 sps:$4 sm:$0xff]  }
  0x40   :  { %607 = vmatpush1.bf16.msra.mxu0 %v5994_v12  ;;  %v6009_v26 = vld [vmem:[#allocation2 + $0x94] ss:$24 sps:$4 sm:$0xff]   ;;  %v6012_v27 = vld [vmem:[#allocation2 + $0x98] ss:$24 sps:$4 sm:$0xff]   ;;  %v6015_v30 = vld [vmem:[#allocation2 + $0x64] ss:$24 sps:$4 sm:$0xff]  }
  0x41   :  { %5873 = vmatpush3.bf16.msra.mxu1 %v5976_v3  ;;  %608 = vmatprep.subr.bf16.mxu0 %v5998_v15  ;;  %v6007_v28 = vld [vmem:[#allocation2 + $0x90] ss:$24 sps:$4 sm:$0xff]   ;;  %v6016_v29 = vld [vmem:[#allocation2 + $0x6c] ss:$24 sps:$4 sm:$0xff]   ;;  %v6013_v32 = vld [vmem:[#allocation2 + $0x60] ss:$24 sps:$4 sm:$0xff]  }
  0x42   :  { %551 = vmatprep.subr.bf16.mxu1 %v5985_v7  ;;  %v6018_v31 = vld [vmem:[#allocation2 + $0x68] ss:$24 sps:$4 sm:$0xff]   ;;  %v6021_v33 = vld [vmem:[#allocation2 + $0x34] ss:$24 sps:$4 sm:$0xff]   ;;  %v6024_v36 = vld [vmem:[#allocation2 + $0x38] ss:$24 sps:$4 sm:$0xff]  }
  0x43   :  { %v6022_v34 = vld [vmem:[#allocation2 + $0x3c] ss:$24 sps:$4 sm:$0xff]   ;;  %v6019_v35 = vld [vmem:[#allocation2 + $0x30] ss:$24 sps:$4 sm:$0xff]   ;;  %v6028_v38 = vld [vmem:[#allocation2 + $0xc] ss:$24 sps:$4 sm:$0xff]  }
  0x44   :  { %5875 = vmatmul.mubr.msk.bf16.vlgmr.msra.gmra.mxu1 %vm156_vm0, %v5978_v4  ;;  %609 = vmatpush1.bf16.msra.mxu0 %v6000_v17  ;;  %v6027_v37 = vld [vmem:[#allocation2 + $0x4] ss:$24 sps:$4 sm:$0xff]   ;;  %v6025_v39 = vld [vmem:[#allocation2] ss:$24 sps:$4 sm:$0xff]   ;;  %v6036_v42 = vld [vmem:[#allocation2 + $0x2d4] ss:$24 sps:$4 sm:$0xff]  }
  0x45   :  { %5878 = vmatprep.mubr.msk.bf16.mxu1 %vm156_vm0, %v5979_v5  ;;  %552 = vmatpush1.bf16.msra.mxu1 %v5983_v6  ;;  %v6030_v40 = vld [vmem:[#allocation2 + $0x8] ss:$24 sps:$4 sm:$0xff]   ;;  %v6033_v41 = vld [vmem:[#allocation2 + $0x164] ss:$24 sps:$4 sm:$0xff]   ;;  %v6039_v49 = vld [vmem:[#allocation2 + $0x134] ss:$24 sps:$4 sm:$0xff]  }
  0x46   :  { %553 = vmatprep.subr.bf16.mxu1 %v5991_v10  ;;  %610 = vmatprep.subr.bf16.mxu0 %v6004_v21  ;;  %v6031_v47 = vld [vmem:[#allocation2 + $0x160] ss:$24 sps:$4 sm:$0xff]   ;;  %v6034_v48 = vld [vmem:[#allocation2 + $0x2d0] ss:$24 sps:$4 sm:$0xff]   ;;  %v6042_v50 = vld [vmem:[#allocation2 + $0x2a4] ss:$24 sps:$4 sm:$0xff]  }
  0x47   :  { %v6037_v53 = vld [vmem:[#allocation2 + $0x130] ss:$24 sps:$4 sm:$0xff]   ;;  %v6040_v54 = vld [vmem:[#allocation2 + $0x2a0] ss:$24 sps:$4 sm:$0xff]   ;;  %v6045_v55 = vld [vmem:[#allocation2 + $0x104] ss:$24 sps:$4 sm:$0xff]  }
  0x48   :  { %611 = vmatpush1.bf16.msra.mxu0 %v6006_v22  ;;  %v6048_v56 = vld [vmem:[#allocation2 + $0x274] ss:$24 sps:$4 sm:$0xff]   ;;  %v6043_v57 = vld [vmem:[#allocation2 + $0x100] ss:$24 sps:$4 sm:$0xff]   ;;  %v6046_v58 = vld [vmem:[#allocation2 + $0x270] ss:$24 sps:$4 sm:$0xff]  }
  0x49   :  { %554 = vmatpush1.bf16.msra.mxu1 %v5989_v13  ;;  %612 = vmatprep.subr.bf16.mxu0 %v6010_v24  ;;  %v6051_v59 = vld [vmem:[#allocation2 + $0xd4] ss:$24 sps:$4 sm:$0xff]   ;;  %v6054_v60 = vld [vmem:[#allocation2 + $0x244] ss:$24 sps:$4 sm:$0xff]   ;;  %v6049_v62 = vld [vmem:[#allocation2 + $0xd0] ss:$24 sps:$4 sm:$0xff]  }
  0x4a   :  { %555 = vmatprep.subr.bf16.mxu1 %v5997_v14  ;;  %v6052_v63 = vld [vmem:[#allocation2 + $0x240] ss:$24 sps:$4 sm:$0xff]   ;;  %v6057_v0 = vld [vmem:[#allocation2 + $0xa4] ss:$24 sps:$4 sm:$0xff]   ;;  %v6060_v1 = vld [vmem:[#allocation2 + $0x214] ss:$24 sps:$4 sm:$0xff]  }
  0x4b   :  { %v6055_v2 = vld [vmem:[#allocation2 + $0xa0] ss:$24 sps:$4 sm:$0xff]   ;;  %v6058_v3 = vld [vmem:[#allocation2 + $0x210] ss:$24 sps:$4 sm:$0xff]   ;;  %v6063_v4 = vld [vmem:[#allocation2 + $0x74] ss:$24 sps:$4 sm:$0xff]  }
  0x4c   :  { %5879 = vmatmul.mubr.msk.bf16.gmra.mxu1 %vm156_vm0, %v5980_v16  ;;  %613 = vmatpush1.bf16.msra.mxu0 %v6012_v27  ;;  %v6066_v5 = vld [vmem:[#allocation2 + $0x1e4] ss:$24 sps:$4 sm:$0xff]   ;;  %v6061_v7 = vld [vmem:[#allocation2 + $0x70] ss:$24 sps:$4 sm:$0xff]   ;;  %v6064_v8 = vld [vmem:[#allocation2 + $0x1e0] ss:$24 sps:$4 sm:$0xff]  }
  0x4d   :  { %5882 = vmatprep.mubr.msk.bf16.mxu1 %vm156_vm0, %v5981_v18  ;;  %556 = vmatpush1.bf16.msra.mxu1 %v5995_v19  ;;  %v6069_v9 = vld [vmem:[#allocation2 + $0x44] ss:$24 sps:$4 sm:$0xff]   ;;  %v6072_v10 = vld [vmem:[#allocation2 + $0x1b4] ss:$24 sps:$4 sm:$0xff]   ;;  %v6067_v12 = vld [vmem:[#allocation2 + $0x40] ss:$24 sps:$4 sm:$0xff]  }
  0x4e   :  { %557 = vmatprep.subr.bf16.mxu1 %v6003_v20  ;;  %614 = vmatprep.subr.bf16.mxu0 %v6016_v29  ;;  %v6070_v13 = vld [vmem:[#allocation2 + $0x1b0] ss:$24 sps:$4 sm:$0xff]   ;;  %v6075_v14 = vld [vmem:[#allocation2 + $0x14] ss:$24 sps:$4 sm:$0xff]   ;;  %v6078_v15 = vld [vmem:[#allocation2 + $0x184] ss:$24 sps:$4 sm:$0xff]  }
  0x4f   :  { %v6073_v17 = vld [vmem:[#allocation2 + $0x10] ss:$24 sps:$4 sm:$0xff]   ;;  %v6076_v18 = vld [vmem:[#allocation2 + $0x180] ss:$24 sps:$4 sm:$0xff]   ;;  %v6081_v19 = vld [vmem:[#allocation2 + $0x2dc] ss:$24 sps:$4 sm:$0xff]  }
  0x50   :  { %615 = vmatpush1.bf16.msra.mxu0 %v6018_v31  ;;  %v6084_v20 = vld [vmem:[#allocation2 + $0x2e4] ss:$24 sps:$4 sm:$0xff]   ;;  %v6079_v22 = vld [vmem:[#allocation2 + $0x2d8] ss:$24 sps:$4 sm:$0xff]   ;;  %v6085_v27 = vld [vmem:[#allocation2 + $0x2a8] ss:$24 sps:$4 sm:$0xff]  }
  0x51   :  { %558 = vmatpush1.bf16.msra.mxu1 %v6001_v23  ;;  %616 = vmatprep.subr.bf16.mxu0 %v6022_v34  ;;  %v6082_v23 = vld [vmem:[#allocation2 + $0x2e0] ss:$24 sps:$4 sm:$0xff]   ;;  %v6093_v29 = vld [vmem:[#allocation2 + $0x27c] ss:$24 sps:$4 sm:$0xff]   ;;  %v6099_v34 = vld [vmem:[#allocation2 + $0x24c] ss:$24 sps:$4 sm:$0xff]  }
  0x52   :  { %559 = vmatprep.subr.bf16.mxu1 %v6009_v26  ;;  %v6090_v26 = vld [vmem:[#allocation2 + $0x2b4] ss:$24 sps:$4 sm:$0xff]   ;;  %v6091_v31 = vld [vmem:[#allocation2 + $0x278] ss:$24 sps:$4 sm:$0xff]  }
  0x54   :  { %5883 = vmatmul.mubr.msk.bf16.gmra.mxu1 %vm156_vm0, %v5982_v25  ;;  %617 = vmatpush1.bf16.msra.mxu0 %v6024_v36  ;;  %v6087_v25 = vld [vmem:[#allocation2 + $0x2ac] ss:$24 sps:$4 sm:$0xff]   ;;  %v6097_v36 = vld [vmem:[#allocation2 + $0x248] ss:$24 sps:$4 sm:$0xff]  }
  0x55   :  { %560 = vmatpush1.bf16.msra.mxu1 %v6007_v28  ;;  %618 = vmatprep.subr.bf16.mxu0 %v6028_v38  ;;  %v6088_v28 = vld [vmem:[#allocation2 + $0x2b0] ss:$24 sps:$4 sm:$0xff]   ;;  %v6105_v38 = vld [vmem:[#allocation2 + $0x21c] ss:$24 sps:$4 sm:$0xff]  }
  0x56   :  { %561 = vmatprep.subr.bf16.mxu1 %v6015_v30  ;;  %583 = vmatprep.mubr.bf16.mxu1 %v7386_v43  ;;  %v6096_v30 = vld [vmem:[#allocation2 + $0x284] ss:$24 sps:$4 sm:$0xff]  }
  0x58   :  { %619 = vmatpush1.bf16.msra.mxu0 %v6030_v40  ;;  %v6103_v40 = vld [vmem:[#allocation2 + $0x218] ss:$24 sps:$4 sm:$0xff]  }
  0x59   :  { %562 = vmatpush1.bf16.msra.mxu1 %v6013_v32  ;;  %1054 = vmatprep.subr.bf16.mxu0 %v6036_v42  ;;  %v6094_v32 = vld [vmem:[#allocation2 + $0x280] ss:$24 sps:$4 sm:$0xff]   ;;  %v6111_v42 = vld [vmem:[#allocation2 + $0x1ec] ss:$24 sps:$4 sm:$0xff]  }
  0x5a   :  { %563 = vmatprep.subr.bf16.mxu1 %v6021_v33 }
  0x5d   :  { %564 = vmatpush1.bf16.msra.mxu1 %v6019_v35  ;;  %v6102_v35 = vld [vmem:[#allocation2 + $0x254] ss:$24 sps:$4 sm:$0xff]  }
  0x5e   :  { %565 = vmatprep.subr.bf16.mxu1 %v6027_v37  ;;  %v6100_v37 = vld [vmem:[#allocation2 + $0x250] ss:$24 sps:$4 sm:$0xff]  }
  0x61   :  { %566 = vmatpush1.bf16.msra.mxu1 %v6025_v39  ;;  %v6108_v39 = vld [vmem:[#allocation2 + $0x224] ss:$24 sps:$4 sm:$0xff]  }
  0x62   :  { %657 = vmatprep.subr.bf16.mxu1 %v6033_v41  ;;  %v6106_v41 = vld [vmem:[#allocation2 + $0x220] ss:$24 sps:$4 sm:$0xff]  }
 0x104   :  { %v5876_v44 = vpop.f32.mrf.mxu1 }
 0x106   :  { %v209_v45 = vpop.f32.mrf.mxu1 }
 0x108   :  { %v5877_v46 = vpop.f32.mrf.mxu1 }
 0x109   :  { %v6942_v61 = vpack.c.bf16 %v5877_v46, %v5876_v44  ;;  %v6114_v44 = vld [vmem:[#allocation2 + $0x1f4] ss:$24 sps:$4 sm:$0xff]   ;;  %v6112_v46 = vld [vmem:[#allocation2 + $0x1f0] ss:$24 sps:$4 sm:$0xff]  }
 0x10a   :  { %v212_v51 = vpop.f32.mrf.mxu1 }
 0x10b   :  { %v6936_v52 = vpack.c.bf16 %v212_v51, %v209_v45  ;;  %v6109_v45 = vld [vmem:[#allocation2 + $0x1e8] ss:$24 sps:$4 sm:$0xff]   ;;  %v6123_v51 = vld [vmem:[#allocation2 + $0x18c] ss:$24 sps:$4 sm:$0xff]  }
 0x10c   :  { %v5880_v6 = vpop.f32.mrf.mxu1 }
 0x10d   :  { %584 = vmatmul.mubr.bf16.vlgmr.msra.gmra.mxu1 %v6936_v52  ;;  %637 = vmatmul.mubr.bf16.vlgmr.msra.gmra.mxu0 %v6936_v52 }
 0x10e   :  { %658 = vmatpush1.bf16.msra.mxu1 %v6031_v47  ;;  %1055 = vmatpush1.bf16.msra.mxu0 %v6034_v48  ;;  %v225_v11 = vpop.f32.mrf.mxu1  ;;  %v6117_v47 = vld [vmem:[#allocation2 + $0x1bc] ss:$24 sps:$4 sm:$0xff]  }
 0x10f   :  { %659 = vmatprep.subr.bf16.mxu1 %v6039_v49  ;;  %1056 = vmatprep.subr.bf16.mxu0 %v6042_v50  ;;  %v6120_v48 = vld [vmem:[#allocation2 + $0x1c4] ss:$24 sps:$4 sm:$0xff]   ;;  %v6115_v49 = vld [vmem:[#allocation2 + $0x1b8] ss:$24 sps:$4 sm:$0xff]  }
 0x110   :  { %593 = vmatprep.mubr.bf16.mxu1 %v7386_v43  ;;  %646 = vmatprep.mubr.bf16.mxu0 %v7386_v43  ;;  %v5881_v16 = vpop.f32.mrf.mxu1  ;;  %v6118_v50 = vld [vmem:[#allocation2 + $0x1c0] ss:$24 sps:$4 sm:$0xff]  }
 0x111   :  { %v6954_v33 = vpack.c.bf16 %v5881_v16, %v5880_v6  ;;  %v6148_v6 = vld [vmem:[#allocation2 + $0x3c8] ss:$24 sps:$4 sm:$0xff]   ;;  %v6165_v16 = vld [vmem:[#allocation2 + $0x334] ss:$24 sps:$4 sm:$0xff]  }
 0x112   :  { %660 = vmatpush1.bf16.msra.mxu1 %v6037_v53  ;;  %1057 = vmatpush1.bf16.msra.mxu0 %v6040_v54  ;;  %v228_v21 = vpop.f32.mrf.mxu1  ;;  %v6121_v53 = vld [vmem:[#allocation2 + $0x188] ss:$24 sps:$4 sm:$0xff]  }
 0x113   :  { %661 = vmatprep.subr.bf16.mxu1 %v6045_v55  ;;  %1058 = vmatprep.subr.bf16.mxu0 %v6048_v56  ;;  %v6948_v24 = vpack.c.bf16 %v228_v21, %v225_v11  ;;  %v6124_v54 = vld [vmem:[#allocation2 + $0x190] ss:$24 sps:$4 sm:$0xff]   ;;  %v6129_v55 = vld [vmem:[#allocation2 + $0x454] ss:$24 sps:$4 sm:$0xff]   ;;  %v6159_v11 = vld [vmem:[#allocation2 + $0x364] ss:$24 sps:$4 sm:$0xff]  }
 0x114   :  { %v6132_v56 = vld [vmem:[#allocation2 + $0x45c] ss:$24 sps:$4 sm:$0xff]  }
 0x115   :  { %594 = vmatmul.mubr.bf16.gmra.mxu1 %v6942_v61  ;;  %647 = vmatmul.mubr.bf16.gmra.mxu0 %v6942_v61  ;;  %v6171_v21 = vld [vmem:[#allocation2 + $0x304] ss:$24 sps:$4 sm:$0xff]  }
 0x116   :  { %662 = vmatpush1.bf16.msra.mxu1 %v6043_v57  ;;  %1059 = vmatpush1.bf16.msra.mxu0 %v6046_v58  ;;  %v6127_v57 = vld [vmem:[#allocation2 + $0x450] ss:$24 sps:$4 sm:$0xff]  }
 0x117   :  { %663 = vmatprep.subr.bf16.mxu1 %v6051_v59  ;;  %1060 = vmatprep.subr.bf16.mxu0 %v6054_v60  ;;  %v6130_v58 = vld [vmem:[#allocation2 + $0x458] ss:$24 sps:$4 sm:$0xff]   ;;  %v6135_v59 = vld [vmem:[#allocation2 + $0x424] ss:$24 sps:$4 sm:$0xff]  }
 0x118   :  { %689 = vmatprep.mubr.bf16.mxu1 %v7386_v43  ;;  %1086 = vmatprep.mubr.bf16.mxu0 %v7386_v43  ;;  %v6138_v60 = vld [vmem:[#allocation2 + $0x42c] ss:$24 sps:$4 sm:$0xff]  }
 0x11a   :  { %664 = vmatpush1.bf16.msra.mxu1 %v6049_v62  ;;  %1061 = vmatpush1.bf16.msra.mxu0 %v6052_v63  ;;  %v6136_v62 = vld [vmem:[#allocation2 + $0x428] ss:$24 sps:$4 sm:$0xff]   ;;  %v6141_v63 = vld [vmem:[#allocation2 + $0x3f4] ss:$24 sps:$4 sm:$0xff]  }
 0x11b   :  { %665 = vmatprep.subr.bf16.mxu1 %v6057_v0  ;;  %1062 = vmatprep.subr.bf16.mxu0 %v6060_v1  ;;  %v6144_v0 = vld [vmem:[#allocation2 + $0x3fc] ss:$24 sps:$4 sm:$0xff]   ;;  %v6139_v1 = vld [vmem:[#allocation2 + $0x3f0] ss:$24 sps:$4 sm:$0xff]  }
 0x11e   :  { %666 = vmatpush1.bf16.msra.mxu1 %v6055_v2  ;;  %1063 = vmatpush1.bf16.msra.mxu0 %v6058_v3  ;;  %v6142_v2 = vld [vmem:[#allocation2 + $0x3f8] ss:$24 sps:$4 sm:$0xff]   ;;  %v6147_v3 = vld [vmem:[#allocation2 + $0x3c4] ss:$24 sps:$4 sm:$0xff]  }
 0x11f   :  { %667 = vmatprep.subr.bf16.mxu1 %v6063_v4  ;;  %1064 = vmatprep.subr.bf16.mxu0 %v6066_v5  ;;  %v6150_v4 = vld [vmem:[#allocation2 + $0x3cc] ss:$24 sps:$4 sm:$0xff]   ;;  %v6145_v5 = vld [vmem:[#allocation2 + $0x3c0] ss:$24 sps:$4 sm:$0xff]  }
 0x122   :  { %668 = vmatpush1.bf16.msra.mxu1 %v6061_v7  ;;  %1065 = vmatpush1.bf16.msra.mxu0 %v6064_v8  ;;  %v6153_v7 = vld [vmem:[#allocation2 + $0x394] ss:$24 sps:$4 sm:$0xff]  }
 0x123   :  { %669 = vmatprep.subr.bf16.mxu1 %v6069_v9  ;;  %1066 = vmatprep.subr.bf16.mxu0 %v6072_v10  ;;  %v6156_v8 = vld [vmem:[#allocation2 + $0x39c] ss:$24 sps:$4 sm:$0xff]   ;;  %v6151_v9 = vld [vmem:[#allocation2 + $0x390] ss:$24 sps:$4 sm:$0xff]  }
 0x124   :  { %v6154_v10 = vld [vmem:[#allocation2 + $0x398] ss:$24 sps:$4 sm:$0xff]  }
 0x126   :  { %670 = vmatpush1.bf16.msra.mxu1 %v6067_v12  ;;  %1067 = vmatpush1.bf16.msra.mxu0 %v6070_v13  ;;  %v6162_v12 = vld [vmem:[#allocation2 + $0x36c] ss:$24 sps:$4 sm:$0xff]   ;;  %v5884_v13 = vpop.f32.mrf.mxu1 }
 0x127   :  { %671 = vmatprep.subr.bf16.mxu1 %v6075_v14  ;;  %1068 = vmatprep.subr.bf16.mxu0 %v6078_v15  ;;  %v6157_v14 = vld [vmem:[#allocation2 + $0x360] ss:$24 sps:$4 sm:$0xff]  }
 0x128   :  { %v6160_v15 = vld [vmem:[#allocation2 + $0x368] ss:$24 sps:$4 sm:$0xff]  }
 0x12a   :  { %672 = vmatpush1.bf16.msra.mxu1 %v6073_v17  ;;  %1069 = vmatpush1.bf16.msra.mxu0 %v6076_v18  ;;  %v6168_v17 = vld [vmem:[#allocation2 + $0x33c] ss:$24 sps:$4 sm:$0xff]   ;;  %v241_v18 = vpop.f32.mrf.mxu1 }
 0x12b   :  { %1107 = vmatprep.subr.bf16.mxu1 %v6081_v19  ;;  %1160 = vmatprep.subr.bf16.mxu0 %v6084_v20  ;;  %v6163_v19 = vld [vmem:[#allocation2 + $0x330] ss:$24 sps:$4 sm:$0xff]  }
 0x12c   :  { %v6166_v20 = vld [vmem:[#allocation2 + $0x338] ss:$24 sps:$4 sm:$0xff]  }
 0x12d   :  { %690 = vmatmul.mubr.bf16.vlgmr.msra.gmra.mxu1 %v6936_v52  ;;  %1087 = vmatmul.mubr.bf16.vlgmr.msra.gmra.mxu0 %v6948_v24  ;;  %v6126_v52 = vld [vmem:[#allocation2 + $0x194] ss:$24 sps:$4 sm:$0xff]  }
 0x12e   :  { %1108 = vmatpush1.bf16.msra.mxu1 %v6079_v22  ;;  %1161 = vmatpush1.bf16.msra.mxu0 %v6082_v23  ;;  %v6174_v22 = vld [vmem:[#allocation2 + $0x30c] ss:$24 sps:$4 sm:$0xff]   ;;  %v5885_v23 = vpop.f32.mrf.mxu1 }
 0x12f   :  { %1109 = vmatprep.subr.bf16.mxu1 %v6087_v25  ;;  %1162 = vmatprep.subr.bf16.mxu0 %v6090_v26  ;;  %v6172_v25 = vld [vmem:[#allocation2 + $0x308] ss:$24 sps:$4 sm:$0xff]   ;;  %v6177_v26 = vld [vmem:[#allocation2 + $0x464] ss:$24 sps:$4 sm:$0xff]  }
 0x130   :  { %699 = vmatprep.mubr.bf16.mxu1 %v7386_v43  ;;  %1096 = vmatprep.mubr.bf16.mxu0 %v7386_v43 }
 0x132   :  { %1110 = vmatpush1.bf16.msra.mxu1 %v6085_v27  ;;  %1163 = vmatpush1.bf16.msra.mxu0 %v6088_v28  ;;  %v244_v27 = vpop.f32.mrf.mxu1  ;;  %v6175_v28 = vld [vmem:[#allocation2 + $0x460] ss:$24 sps:$4 sm:$0xff]  }
 0x133   :  { %1111 = vmatprep.subr.bf16.mxu1 %v6093_v29  ;;  %1164 = vmatprep.subr.bf16.mxu0 %v6096_v30  ;;  %v260_v29 = vpack.c.bf16 %v244_v27, %v241_v18  ;;  %v6180_v30 = vld [vmem:[#allocation2 + $0x434] ss:$24 sps:$4 sm:$0xff]  }
 0x135   :  { %700 = vmatmul.mubr.bf16.gmra.mxu1 %v6942_v61  ;;  %1097 = vmatmul.mubr.bf16.gmra.mxu0 %v6954_v33  ;;  %v6133_v61 = vld [vmem:[#allocation2 + $0x420] ss:$24 sps:$4 sm:$0xff]  }
 0x136   :  { %1112 = vmatpush1.bf16.msra.mxu1 %v6091_v31  ;;  %1165 = vmatpush1.bf16.msra.mxu0 %v6094_v32  ;;  %v6178_v31 = vld [vmem:[#allocation2 + $0x430] ss:$24 sps:$4 sm:$0xff]   ;;  %v6183_v32 = vld [vmem:[#allocation2 + $0x404] ss:$24 sps:$4 sm:$0xff]  }
 0x137   :  { %1113 = vmatprep.subr.bf16.mxu1 %v6099_v34  ;;  %1166 = vmatprep.subr.bf16.mxu0 %v6102_v35  ;;  %v261_v34 = vpack.c.bf16 %v5885_v23, %v5884_v13  ;;  %v6186_v35 = vld [vmem:[#allocation2 + $0x3d4] ss:$24 sps:$4 sm:$0xff]  }
 0x138   :  { %1139 = vmatprep.mubr.bf16.mxu1 %v7386_v43  ;;  %1192 = vmatprep.mubr.bf16.mxu0 %v7386_v43  ;;  %v7031_v13 = vld [vmem:[#allocation8] ss:$4 sm:$0x3f] }
 0x13a   :  { %1114 = vmatpush1.bf16.msra.mxu1 %v6097_v36  ;;  %1167 = vmatpush1.bf16.msra.mxu0 %v6100_v37  ;;  %v6184_v36 = vld [vmem:[#allocation2 + $0x3d0] ss:$24 sps:$4 sm:$0xff]   ;;  %v6189_v37 = vld [vmem:[#allocation2 + $0x3a4] ss:$24 sps:$4 sm:$0xff]  }
 0x13b   :  { %1115 = vmatprep.subr.bf16.mxu1 %v6105_v38  ;;  %1168 = vmatprep.subr.bf16.mxu0 %v6108_v39  ;;  %v6187_v38 = vld [vmem:[#allocation2 + $0x3a0] ss:$24 sps:$4 sm:$0xff]   ;;  %v6192_v39 = vld [vmem:[#allocation2 + $0x374] ss:$24 sps:$4 sm:$0xff]  }
 0x13e   :  { %1116 = vmatpush1.bf16.msra.mxu1 %v6103_v40  ;;  %1169 = vmatpush1.bf16.msra.mxu0 %v6106_v41  ;;  %v6190_v40 = vld [vmem:[#allocation2 + $0x370] ss:$24 sps:$4 sm:$0xff]   ;;  %v6195_v41 = vld [vmem:[#allocation2 + $0x344] ss:$24 sps:$4 sm:$0xff]  }
 0x13f   :  { %1117 = vmatprep.subr.bf16.mxu1 %v6111_v42  ;;  %1170 = vmatprep.subr.bf16.mxu0 %v6114_v44  ;;  %v6193_v42 = vld [vmem:[#allocation2 + $0x340] ss:$24 sps:$4 sm:$0xff]   ;;  %v6198_v44 = vld [vmem:[#allocation2 + $0x314] ss:$24 sps:$4 sm:$0xff]  }
 0x142   :  { %1118 = vmatpush1.bf16.msra.mxu1 %v6109_v45  ;;  %1171 = vmatpush1.bf16.msra.mxu0 %v6112_v46  ;;  %v6196_v45 = vld [vmem:[#allocation2 + $0x310] ss:$24 sps:$4 sm:$0xff]  }
 0x143   :  { %1119 = vmatprep.subr.bf16.mxu1 %v6117_v47  ;;  %1172 = vmatprep.subr.bf16.mxu0 %v6120_v48 }
 0x146   :  { %1120 = vmatpush1.bf16.msra.mxu1 %v6115_v49  ;;  %1173 = vmatpush1.bf16.msra.mxu0 %v6118_v50 }
 0x147   :  { %1121 = vmatprep.subr.bf16.mxu1 %v6123_v51  ;;  %1174 = vmatprep.subr.bf16.mxu0 %v6126_v52 }
 0x14a   :  { %1122 = vmatpush1.bf16.msra.mxu1 %v6121_v53  ;;  %1175 = vmatpush1.bf16.msra.mxu0 %v6124_v54 }
 0x14b   :  { %1526 = vmatprep.subr.bf16.mxu1 %v6129_v55  ;;  %1579 = vmatprep.subr.bf16.mxu0 %v6132_v56 }
 0x14d   :  { %1140 = vmatmul.mubr.bf16.vlgmr.msra.gmra.mxu1 %v6948_v24  ;;  %1193 = vmatmul.mubr.bf16.vlgmr.msra.gmra.mxu0 %v6948_v24  ;;  %v6169_v24 = vld [vmem:[#allocation2 + $0x300] ss:$24 sps:$4 sm:$0xff]  }
 0x14e   :  { %1527 = vmatpush1.bf16.msra.mxu1 %v6127_v57  ;;  %1580 = vmatpush1.bf16.msra.mxu0 %v6130_v58 }
 0x14f   :  { %1528 = vmatprep.subr.bf16.mxu1 %v6135_v59  ;;  %1581 = vmatprep.subr.bf16.mxu0 %v6138_v60 }
 0x150   :  { %1149 = vmatprep.mubr.bf16.mxu1 %v7386_v43  ;;  %1202 = vmatprep.mubr.bf16.mxu0 %v7386_v43 }
 0x152   :  { %1529 = vmatpush1.bf16.msra.mxu1 %v6133_v61  ;;  %1582 = vmatpush1.bf16.msra.mxu0 %v6136_v62 }
 0x153   :  { %1530 = vmatprep.subr.bf16.mxu1 %v6141_v63  ;;  %1583 = vmatprep.subr.bf16.mxu0 %v6144_v0 }
 0x155   :  { %1150 = vmatmul.mubr.bf16.gmra.mxu1 %v6954_v33  ;;  %1203 = vmatmul.mubr.bf16.gmra.mxu0 %v6954_v33  ;;  %v6181_v33 = vld [vmem:[#allocation2 + $0x400] ss:$24 sps:$4 sm:$0xff]  }
 0x156   :  { %1531 = vmatpush1.bf16.msra.mxu1 %v6139_v1  ;;  %1584 = vmatpush1.bf16.msra.mxu0 %v6142_v2 }
 0x157   :  { %1532 = vmatprep.subr.bf16.mxu1 %v6147_v3  ;;  %1585 = vmatprep.subr.bf16.mxu0 %v6150_v4 }
 0x158   :  { %1558 = vmatprep.mubr.bf16.mxu1 %v7386_v43  ;;  %1611 = vmatprep.mubr.bf16.mxu0 %v7386_v43 }
 0x15a   :  { %1533 = vmatpush1.bf16.msra.mxu1 %v6145_v5  ;;  %1586 = vmatpush1.bf16.msra.mxu0 %v6148_v6  ;;  %v711_v6 = vlaneseq }
 0x15b   :  { %1534 = vmatprep.subr.bf16.mxu1 %v6153_v7  ;;  %1587 = vmatprep.subr.bf16.mxu0 %v6156_v8 }
 0x15e   :  { %1535 = vmatpush1.bf16.msra.mxu1 %v6151_v9  ;;  %1588 = vmatpush1.bf16.msra.mxu0 %v6154_v10  ;;  %v7024_v9 = vshrl.u32 %v711_v6, 7 }
 0x15f   :  { %1536 = vmatprep.subr.bf16.mxu1 %v6159_v11  ;;  %1589 = vmatprep.subr.bf16.mxu0 %v6162_v12 }
 0x160   :  { %v729_v11 = vsub.s32 4, %v7024_v9 }
 0x162   :  { %1537 = vmatpush1.bf16.msra.mxu1 %v6157_v14  ;;  %1590 = vmatpush1.bf16.msra.mxu0 %v6160_v15  ;;  %v7036_v15 = vrot.slane %v7031_v13, %v729_v11 }
 0x163   :  { %1538 = vmatprep.subr.bf16.mxu1 %v6165_v16  ;;  %1591 = vmatprep.subr.bf16.mxu0 %v6168_v17 }
 0x166   :  { %1539 = vmatpush1.bf16.msra.mxu1 %v6163_v19  ;;  %1592 = vmatpush1.bf16.msra.mxu0 %v6166_v20 }
 0x167   :  { %1540 = vmatprep.subr.bf16.mxu1 %v6171_v21  ;;  %1593 = vmatprep.subr.bf16.mxu0 %v6174_v22 }
 0x16a   :  { %1541 = vmatpush1.bf16.msra.mxu1 %v6169_v24  ;;  %1594 = vmatpush1.bf16.msra.mxu0 %v6172_v25 }
 0x16b   :  { %1632 = vmatprep.subr.bf16.mxu1 %v6177_v26 }
 0x16d   :  { %1559 = vmatmul.mubr.bf16.vlgmr.msra.gmra.mxu1 %v260_v29  ;;  %1612 = vmatmul.mubr.bf16.vlgmr.msra.gmra.mxu0 %v260_v29 }
 0x16e   :  { %1633 = vmatpush1.bf16.msra.mxu1 %v6175_v28  ;;  %1568 = vmatprep.mubr.bf16.mxu1 %v7386_v43 }
 0x16f   :  { %1634 = vmatprep.subr.bf16.mxu1 %v6180_v30  ;;  %1621 = vmatprep.mubr.bf16.mxu0 %v7386_v43 }
 0x172   :  { %1635 = vmatpush1.bf16.msra.mxu1 %v6178_v31 }
 0x173   :  { %1636 = vmatprep.subr.bf16.mxu1 %v6183_v32 }
 0x175   :  { %1569 = vmatmul.mubr.bf16.gmra.mxu1 %v261_v34  ;;  %1622 = vmatmul.mubr.bf16.gmra.mxu0 %v261_v34 }
 0x176   :  { %1637 = vmatpush1.bf16.msra.mxu1 %v6181_v33  ;;  %1664 = vmatprep.mubr.bf16.mxu1 %v7386_v43 }
 0x177   :  { %1638 = vmatprep.subr.bf16.mxu1 %v6186_v35  ;;  %1808 = vmatprep.mubr.bf16.mxu0 %v7386_v43  ;;  %v7388_v35 = vsub.s32 0, %v7024_v9 }
 0x17a   :  { %1639 = vmatpush1.bf16.msra.mxu1 %v6184_v36  ;;  %v721_v36 = vsub.s32 2, %v7024_v9 }
 0x17b   :  { %1640 = vmatprep.subr.bf16.mxu1 %v6189_v37  ;;  %v7389_v37 = vsub.s32 1, %v7024_v9 }
 0x17e   :  { %1641 = vmatpush1.bf16.msra.mxu1 %v6187_v38  ;;  %v725_v38 = vsub.s32 3, %v7024_v9 }
 0x17f   :  { %1642 = vmatprep.subr.bf16.mxu1 %v6192_v39 }
 0x180   :  { %v726_v6 = vrot.slane %v7031_v13, %v725_v38 }
 0x182   :  { %1643 = vmatpush1.bf16.msra.mxu1 %v6190_v40 }
 0x183   :  { %1644 = vmatprep.subr.bf16.mxu1 %v6195_v41  ;;  %v714_v41 = vrot.slane %v7031_v13, %v7388_v35 }
 0x186   :  { %1645 = vmatpush1.bf16.msra.mxu1 %v6193_v42  ;;  %v722_v42 = vrot.slane %v7031_v13, %v721_v36 }
 0x187   :  { %1646 = vmatprep.subr.bf16.mxu1 %v6198_v44 }
 0x18a   :  { %1647 = vmatpush1.bf16.msra.mxu1 %v6196_v45 }
 0x18d   :  { %1665 = vmatmul.mubr.bf16.vlgmr.msra.gmra.mxu1 %v260_v29 }
 0x18e   :  { %1674 = vmatprep.mubr.bf16.mxu1 %v7386_v43 }
 0x195   :  { %1675 = vmatmul.mubr.bf16.gmra.mxu1 %v261_v34 }
 0x196   :  { %1871 = vmatprep.mubr.bf16.mxu1 %v7386_v43 }
 0x1cd   :  { %v6974_v46 = vpop.f32.mrf.mxu0  ;;  %v6976_v47 = vpop.f32.mrf.mxu1 }
 0x1ce   :  { %v743_v43 = vadd.f32 %v722_v42, %v6974_v46 }
 0x1cf   :  { %v6978_v48 = vpop.f32.mrf.mxu0  ;;  %v6980_v49 = vpop.f32.mrf.mxu1 }
 0x1d1   :  { %v6982_v50 = vpop.f32.mrf.mxu0  ;;  %v6984_v51 = vpop.f32.mrf.mxu1 }
 0x1d3   :  { %v6986_v52 = vpop.f32.mrf.mxu0  ;;  %v6988_v53 = vpop.f32.mrf.mxu1 }
 0x1d4   :  { %v750_v38 = vadd.f32 %v726_v6, %v6986_v52 }
 0x1d5   :  { %v6990_v54 = vpop.f32.mrf.mxu0  ;;  %v6992_v55 = vpop.f32.mrf.mxu1 }
 0x1d7   :  { %v6994_v56 = vpop.f32.mrf.mxu0  ;;  %v6996_v57 = vpop.f32.mrf.mxu1 }
 0x1d9   :  { %v6998_v58 = vpop.f32.mrf.mxu0  ;;  %v7000_v59 = vpop.f32.mrf.mxu1 }
 0x1db   :  { %v7002_v60 = vpop.f32.mrf.mxu0  ;;  %v7004_v61 = vpop.f32.mrf.mxu1 }
 0x1ed   :  { %v7006_v62 = vpop.f32.mrf.mxu0  ;;  %v691_v63 = vpop.f32.mrf.mxu1 }
 0x1ee   :  { %v745_v18 = vadd.f32 %v7036_v15, %v691_v63  ;;  %v718_v63 = vrot.slane %v7031_v13, %v7389_v37 }
 0x1ef   :  { %v7008_v0 = vpop.f32.mrf.mxu0  ;;  %v7010_v1 = vpop.f32.mrf.mxu1 }
 0x1f0   :  { %v742_v36 = vadd.f32 %v718_v63, %v6980_v49  ;;  %v748_v37 = vadd.f32 %v718_v63, %v6988_v53  ;;  %v756_v49 = vadd.f32 %v726_v6, %v6994_v56  ;;  %v762_v53 = vadd.f32 %v726_v6, %v7002_v60 }
 0x1f1   :  { %v7012_v2 = vpop.f32.mrf.mxu0  ;;  %v7014_v3 = vpop.f32.mrf.mxu1 }
 0x1f3   :  { %v7016_v4 = vpop.f32.mrf.mxu0  ;;  %v7018_v5 = vpop.f32.mrf.mxu1 }
 0x1f5   :  { %v7020_v7 = vpop.f32.mrf.mxu0  ;;  %v7022_v8 = vpop.f32.mrf.mxu1 }
 0x1f6   :  { %7390 = vst [vmem:[#allocation15_spill] sm:$0xff] %v7022_v8 }
 0x1f7   :  { %v7026_v10 = vpop.f32.mrf.mxu0  ;;  %v7029_v12 = vpop.f32.mrf.mxu1 }
 0x1f8   :  { %7391 = vst [vmem:[#allocation16_spill] sm:$0xff] %v7029_v12 }
 0x1f9   :  { %v7033_v14 = vpop.f32.mrf.mxu0  ;;  %v7038_v16 = vpop.f32.mrf.mxu1 }
 0x1fa   :  { %7392 = vst [vmem:[#allocation17_spill] sm:$0xff] %v7038_v16  ;;  %v754_v16 = vadd.f32 %v718_v63, %v6996_v57  ;;  %v1220_v57 = vadd.f32 %v7016_v4, %v748_v37 }
 0x1fb   :  { %v1104_v17 = vpop.f32.mrf.mxu0  ;;  %v7041_v19 = vpop.f32.mrf.mxu1 }
 0x1fc   :  { %7393 = vst [vmem:[#allocation18_spill] sm:$0xff] %v7041_v19  ;;  %v753_v19 = vadd.f32 %v714_v41, %v6992_v55  ;;  %v1214_v55 = vadd.f32 %v7008_v0, %v742_v36 }
 0x1fe   :  { %v1225_v56 = vadd.f32 %v7020_v7, %v753_v19 }
 0x20d   :  { %v1194_v20 = vpop.f32.mrf.mxu0  ;;  %v1141_v22 = vpop.f32.mrf.mxu1 }
 0x20e   :  { %v7043_v21 = vadd.f32 %v1194_v20, %v745_v18  ;;  %v741_v20 = vadd.f32 %v714_v41, %v6976_v47  ;;  %v755_v47 = vadd.f32 %v722_v42, %v6990_v54 }
 0x20f   :  { %v1143_v23 = vpop.f32.mrf.mxu1  ;;  %v7045_v24 = vpop.f32.mrf.mxu0 }
 0x210   :  { %7394 = vst [vmem:[#allocation19_spill] sm:$0xff] %v7043_v21  ;;  %v1213_v52 = vadd.f32 %v7006_v62, %v741_v20 }
 0x211   :  { %v1145_v25 = vpop.f32.mrf.mxu1  ;;  %v7047_v26 = vpop.f32.mrf.mxu0 }
 0x213   :  { %v1147_v27 = vpop.f32.mrf.mxu1  ;;  %v7049_v28 = vpop.f32.mrf.mxu0 }
 0x214   :  { %7395 = vst [vmem:[#allocation20_spill] sm:$0xff] %v7049_v28 }
 0x215   :  { %v1151_v29 = vpop.f32.mrf.mxu1  ;;  %v7051_v30 = vpop.f32.mrf.mxu0 }
 0x216   :  { %7396 = vst [vmem:[#allocation21_spill] sm:$0xff] %v7051_v30  ;;  %v744_v30 = vadd.f32 %v726_v6, %v6978_v48  ;;  %v759_v48 = vadd.f32 %v714_v41, %v7000_v59  ;;  %v1226_v59 = vadd.f32 %v7026_v10, %v754_v16  ;;  %v1227_v36 = vadd.f32 %v1151_v29, %v755_v47 }
 0x217   :  { %v1153_v31 = vpop.f32.mrf.mxu1  ;;  %v7053_v32 = vpop.f32.mrf.mxu0 }
 0x218   :  { %7397 = vst [vmem:[#allocation22_spill] sm:$0xff] %v7053_v32  ;;  %v749_v32 = vadd.f32 %v722_v42, %v6982_v50  ;;  %v760_v50 = vadd.f32 %v718_v63, %v7004_v61  ;;  %v1215_v61 = vadd.f32 %v1141_v22, %v743_v43  ;;  %v1216_v62 = vadd.f32 %v1143_v23, %v744_v30 }
 0x219   :  { %v1155_v33 = vpop.f32.mrf.mxu1  ;;  %v7055_v34 = vpop.f32.mrf.mxu0  ;;  %v1228_v0 = vadd.f32 %v1153_v31, %v756_v49 }
 0x21a   :  { %7398 = vst [vmem:[#allocation23_spill] sm:$0xff] %v7055_v34  ;;  %v747_v34 = vadd.f32 %v714_v41, %v6984_v51  ;;  %v761_v51 = vadd.f32 %v722_v42, %v6998_v58  ;;  %v1231_v58 = vadd.f32 %v7033_v14, %v759_v48  ;;  %v1232_v41 = vadd.f32 %v1104_v17, %v760_v50 }
 0x21b   :  { %v1157_v39 = vpop.f32.mrf.mxu1  ;;  %v7061_v40 = vpop.f32.mrf.mxu0  ;;  %v1222_v42 = vadd.f32 %v1147_v27, %v750_v38  ;;  %v1221_v6 = vadd.f32 %v1145_v25, %v749_v32 }
 0x21c   :  { %7399 = vst [vmem:[#allocation24_spill] sm:$0xff] %v7061_v40  ;;  %v1219_v28 = vadd.f32 %v7012_v2, %v747_v34  ;;  %v1233_v20 = vadd.f32 %v1155_v33, %v761_v51  ;;  %v1234_v21 = vadd.f32 %v1157_v39, %v762_v53 }
 0x22d   :  { %v7067_v44 = vpop.f32.mrf.mxu1  ;;  %v7069_v45 = vpop.f32.mrf.mxu0 }
 0x22e   :  { %v1685_v48 = vadd.f32 %v7067_v44, %v1213_v52  ;;  %v6204_v44 = vld [vmem:[#allocation5 + $0x74] ss:$8 sps:$4 sm:$0xff]  }
 0x22f   :  { %v1562_v11 = vpop.f32.mrf.mxu1  ;;  %v1615_v18 = vpop.f32.mrf.mxu0 }
 0x230   :  { %v1686_v14 = vadd.f32 %v1562_v11, %v1214_v55  ;;  %v1688_v17 = vadd.f32 %v1615_v18, %v1216_v62  ;;  %v1687_v11 = vadd.f32 %v7069_v45, %v1215_v61  ;;  %v6202_v61 = vld [vmem:[#allocation5 + $0x70] ss:$8 sps:$4 sm:$0xff]   ;;  %v6208_v62 = vld [vmem:[#allocation5 + $0x60] ss:$8 sps:$4 sm:$0xff]  }
 0x231   :  { %v1564_v40 = vpop.f32.mrf.mxu1  ;;  %v1617_v35 = vpop.f32.mrf.mxu0 }
 0x232   :  { %v1691_v23 = vadd.f32 %v1564_v40, %v1219_v28  ;;  %v1693_v25 = vadd.f32 %v1617_v35, %v1221_v6  ;;  %v1710_v51 = vmax.f32 %v1686_v14, 0.0  ;;  %v1712_v50 = vmax.f32 %v1688_v17, 0.0 }
 0x233   :  { %v1566_v8 = vpop.f32.mrf.mxu1  ;;  %v1619_v46 = vpop.f32.mrf.mxu0 }
 0x234   :  { %v1692_v2 = vadd.f32 %v1566_v8, %v1220_v57  ;;  %v1694_v34 = vadd.f32 %v1619_v46, %v1222_v42  ;;  %v1715_v40 = vmax.f32 %v1691_v23, 0.0  ;;  %v6210_v42 = vld [vmem:[#allocation5 + $0x64] ss:$8 sps:$4 sm:$0xff]  }
 0x235   :  { %v1570_v12 = vpop.f32.mrf.mxu1  ;;  %v1623_v54 = vpop.f32.mrf.mxu0 }
 0x236   :  { %v1697_v43 = vadd.f32 %v1570_v12, %v1225_v56  ;;  %v1699_v22 = vadd.f32 %v1623_v54, %v1227_v36  ;;  %v1716_v29 = vmax.f32 %v1692_v2, 0.0  ;;  %v1718_v32 = vmax.f32 %v1694_v34, 0.0  ;;  %v7119_v36 = vld [vmem:[%s7378_s3 + $0x8] sm:$0xff]  }
 0x237   :  { %v1572_v60 = vpop.f32.mrf.mxu1  ;;  %v1625_v63 = vpop.f32.mrf.mxu0  ;;  %v1709_v56 = vmax.f32 %v1685_v48, 0.0  ;;  %v7406_v48 = vld [vmem:[#allocation18_spill] sm:$0xff] }
 0x238   :  { %v1698_v7 = vadd.f32 %v1572_v60, %v1226_v59  ;;  %v1700_v19 = vadd.f32 %v1625_v63, %v1228_v0  ;;  %v1721_v12 = vmax.f32 %v1697_v43, 0.0  ;;  %v1723_v18 = vmax.f32 %v1699_v22, 0.0  ;;  %v6216_v0 = vld [vmem:[#allocation5 + $0x54] ss:$8 sps:$4 sm:$0xff]  }
 0x239   :  { %v1574_v4 = vpop.f32.mrf.mxu1  ;;  %v1627_v37 = vpop.f32.mrf.mxu0  ;;  %v1734_v54 = vpack.c.bf16 %v1716_v29, %v1710_v51  ;;  %v1736_v57 = vpack.c.bf16 %v1718_v32, %v1712_v50  ;;  %v1711_v59 = vmax.f32 %v1687_v11, 0.0  ;;  %v1733_v45 = vpack.c.bf16 %v1715_v40, %v1709_v56  ;;  %v7408_v51 = vld [vmem:[#allocation23_spill] sm:$0xff]  ;;  %v7409_v40 = vld [vmem:[#allocation21_spill] sm:$0xff] }
 0x23a   :  { %v1703_v10 = vadd.f32 %v1574_v4, %v1231_v58  ;;  %v1705_v16 = vadd.f32 %v1627_v37, %v1233_v20  ;;  %v1722_v39 = vmax.f32 %v1698_v7, 0.0  ;;  %v1724_v47 = vmax.f32 %v1700_v19, 0.0  ;;  %v7401_v7 = vld [vmem:[#allocation19_spill] sm:$0xff] }
 0x23b   :  { %v1576_v27 = vpop.f32.mrf.mxu1  ;;  %v1629_v38 = vpop.f32.mrf.mxu0  ;;  %v733_v58 = vsub.s32 5, %v7024_v9  ;;  %v7400_v63 = vmov 0  }
 0x23c   :  { %v1704_v30 = vadd.f32 %v1576_v27, %v1232_v41  ;;  %v1706_v31 = vadd.f32 %v1629_v38, %v1234_v21  ;;  %v1727_v8 = vmax.f32 %v1703_v10, 0.0  ;;  %v1729_v33 = vmax.f32 %v1705_v16, 0.0  ;;  %v7104_v41 = vld [vmem:[%s7378_s3] sm:$0xff]   ;;  %v6214_v10 = vld [vmem:[#allocation5 + $0x50] ss:$8 sps:$4 sm:$0xff]  }
 0x23d   :  { %v1717_v21 = vmax.f32 %v1693_v25, 0.0  ;;  %v734_v60 = vrot.slane %v7031_v13, %v733_v58  ;;  %v751_v13 = vadd.f32 %v7036_v15, %v7014_v3  ;;  %v6222_v16 = vld [vmem:[#allocation5 + $0x44] ss:$8 sps:$4 sm:$0xff]   ;;  %v6220_v27 = vld [vmem:[#allocation5 + $0x40] ss:$8 sps:$4 sm:$0xff]  }
 0x23e   :  { %v1728_v46 = vmax.f32 %v1704_v30, 0.0  ;;  %v1730_v49 = vmax.f32 %v1706_v31, 0.0  ;;  %v1739_v53 = vpack.c.bf16 %v1727_v8, %v1721_v12  ;;  %v1741_v55 = vpack.c.bf16 %v1729_v33, %v1723_v18  ;;  %v7402_v3 = vld [vmem:[#allocation20_spill] sm:$0xff]  ;;  %v6228_v30 = vld [vmem:[#allocation5 + $0x34] ss:$8 sps:$4 sm:$0xff]   ;;  %v7404_v31 = vld [vmem:[#allocation17_spill] sm:$0xff] }
 0x23f   :  { %v1735_v52 = vpack.c.bf16 %v1717_v21, %v1711_v59  ;;  %v746_v20 = vadd.f32 %v734_v60, %v7010_v1  ;;  %v752_v34 = vadd.f32 %v734_v60, %v7018_v5  ;;  %v1223_v37 = vadd.f32 %v7047_v26, %v751_v13  ;;  %v7403_v38 = vld [vmem:[#allocation16_spill] sm:$0xff]  ;;  %v7407_v12 = vld [vmem:[#allocation22_spill] sm:$0xff] }
 0x240   :  { %v1740_v28 = vpack.c.bf16 %v1728_v46, %v1722_v39  ;;  %v1742_v35 = vpack.c.bf16 %v1730_v49, %v1724_v47  ;;  %v758_v23 = vadd.f32 %v734_v60, %v7403_v38  ;;  %v763_v29 = vadd.f32 %v7036_v15, %v7404_v31  ;;  %v7138_v39 = vld [vmem:[%s7378_s3 + $0x10] sm:$0xff]   ;;  %v7405_v47 = vld [vmem:[#allocation15_spill] sm:$0xff]  ;;  %v6246_v13 = vld [vmem:[#allocation5 + $0x4] ss:$8 sps:$4 sm:$0xff]  }
 0x241   :  { %v1218_v4 = vadd.f32 %v7045_v24, %v746_v20  ;;  %v1224_v14 = vadd.f32 %v7402_v3, %v752_v34  ;;  %v757_v46 = vadd.f32 %v7036_v15, %v7405_v47  ;;  %v764_v11 = vadd.f32 %v734_v60, %v7406_v48  ;;  %v6244_v34 = vld [vmem:[#allocation5] ss:$8 sps:$4 sm:$0xff]   ;;  %v6229_v38 = vld [vmem:[#allocation5 + $0x130] ss:$8 sps:$4 sm:$0xff]   ;;  %v6243_v31 = vld [vmem:[#allocation5 + $0x114] ss:$8 sps:$4 sm:$0xff]  }
 0x242   :  { %1788 = vmatprep.subr.bf16.mxu0 %v1740_v28  ;;  %1851 = vmatprep.subr.bf16.mxu1 %v1742_v35  ;;  %v1230_v18 = vadd.f32 %v7407_v12, %v758_v23  ;;  %v1235_v50 = vadd.f32 %v7408_v51, %v763_v29  ;;  %v6226_v35 = vld [vmem:[#allocation5 + $0x30] ss:$8 sps:$4 sm:$0xff]   ;;  %v6256_v3 = vld [vmem:[#allocation5 + $0xe0] ss:$8 sps:$4 sm:$0xff]   ;;  %v6237_v23 = vld [vmem:[#allocation5 + $0x124] ss:$8 sps:$4 sm:$0xff]  }
 0x243   :  { %1789 = vmatpush1.bf16.msra.mxu0 %v1739_v53  ;;  %1852 = vmatpush1.bf16.msra.mxu1 %v1741_v55  ;;  %v1229_v21 = vadd.f32 %v7409_v40, %v757_v46  ;;  %v6234_v55 = vld [vmem:[#allocation5 + $0x24] ss:$8 sps:$4 sm:$0xff]   ;;  %v6280_v29 = vld [vmem:[#allocation5 + $0xa0] ss:$8 sps:$4 sm:$0xff]   ;;  %v6255_v47 = vld [vmem:[#allocation5 + $0x1f4] ss:$8 sps:$4 sm:$0xff]  }
 0x244   :  { %1790 = vmatprep.subr.bf16.mxu0 %v1734_v54  ;;  %1853 = vmatprep.subr.bf16.mxu1 %v1736_v57  ;;  %v7410_v54 = vld [vmem:[#allocation24_spill] sm:$0xff]  ;;  %v6253_v46 = vld [vmem:[#allocation5 + $0x1f0] ss:$8 sps:$4 sm:$0xff]   ;;  %v6288_v48 = vld [vmem:[#allocation5 + $0x94] ss:$8 sps:$4 sm:$0xff]  }
 0x245   :  { %v1236_v57 = vadd.f32 %v7410_v54, %v764_v11  ;;  %v6259_v11 = vld [vmem:[#allocation5 + $0x1e0] ss:$8 sps:$4 sm:$0xff]   ;;  %v6267_v12 = vld [vmem:[#allocation5 + $0x1d4] ss:$8 sps:$4 sm:$0xff]   ;;  %v6265_v51 = vld [vmem:[#allocation5 + $0x1d0] ss:$8 sps:$4 sm:$0xff]  }
 0x246   :  { %v6271_v40 = vld [vmem:[#allocation5 + $0x1c0] ss:$8 sps:$4 sm:$0xff]  }
 0x247   :  { %1791 = vmatpush1.bf16.msra.mxu0 %v1733_v45  ;;  %1854 = vmatpush1.bf16.msra.mxu1 %v1735_v52  ;;  %v6232_v52 = vld [vmem:[#allocation5 + $0x20] ss:$8 sps:$4 sm:$0xff]  }
 0x248   :  { %2561 = vmatprep.subr.bf16.mxu1 %v6204_v44  ;;  %v6283_v54 = vld [vmem:[#allocation5 + $0x1a0] ss:$8 sps:$4 sm:$0xff]  }
 0x24a   :  { %5347 = vmatmul.mubr.msk.bf16.vlgmr.msra.gmra.mxu0 %vm1766_vm1, %v7104_v41  ;;  %5350 = vmatmul.mubr.msk.bf16.vlgmr.msra.gmra.mxu1 %vm1766_vm1, %v7104_v41 }
 0x24b   :  { %1818 = vmatprep.mubr.bf16.mxu0 %v7400_v63  ;;  %1881 = vmatprep.mubr.bf16.mxu1 %v7400_v63 }
 0x24c   :  { %2562 = vmatpush1.bf16.msra.mxu1 %v6202_v61  ;;  %v6240_v61 = vld [vmem:[#allocation5 + $0x14] ss:$8 sps:$4 sm:$0xff]  }
 0x24d   :  { %v1666_v6 = vpop.f32.mrf.mxu1  ;;  %2563 = vmatprep.subr.bf16.mxu1 %v6210_v42 }
 0x24e   :  { %v1689_v19 = vadd.f32 %v1666_v6, %v7401_v7  ;;  %v6213_v7 = vld [vmem:[#allocation5 + $0x164] ss:$8 sps:$4 sm:$0xff]  }
 0x24f   :  { %v1668_v2 = vpop.f32.mrf.mxu1 }
 0x250   :  { %2564 = vmatpush1.bf16.msra.mxu1 %v6208_v62  ;;  %v1690_v17 = vadd.f32 %v1668_v2, %v1218_v4  ;;  %v1713_v24 = vmax.f32 %v1689_v19, 0.0  ;;  %v6207_v2 = vld [vmem:[#allocation5 + $0x174] ss:$8 sps:$4 sm:$0xff]   ;;  %v6250_v19 = vld [vmem:[#allocation5 + $0xf0] ss:$8 sps:$4 sm:$0xff]  }
 0x251   :  { %v1670_v1 = vpop.f32.mrf.mxu1  ;;  %2565 = vmatprep.subr.bf16.mxu1 %v6216_v0  ;;  %v6238_v0 = vld [vmem:[#allocation5 + $0x10] ss:$8 sps:$4 sm:$0xff]   ;;  %v6252_v4 = vld [vmem:[#allocation5 + $0xf4] ss:$8 sps:$4 sm:$0xff]  }
 0x252   :  { %v1695_v43 = vadd.f32 %v1670_v1, %v1223_v37  ;;  %5348 = vmatmul.mubr.msk.bf16.gmra.mxu0 %vm1766_vm1, %v7119_v36  ;;  %5351 = vmatmul.mubr.msk.bf16.gmra.mxu1 %vm1766_vm1, %v7119_v36  ;;  %v1714_v32 = vmax.f32 %v1690_v17, 0.0  ;;  %v6205_v37 = vld [vmem:[#allocation5 + $0x170] ss:$8 sps:$4 sm:$0xff]   ;;  %v6211_v1 = vld [vmem:[#allocation5 + $0x160] ss:$8 sps:$4 sm:$0xff]  }
 0x253   :  { %v1672_v5 = vpop.f32.mrf.mxu1  ;;  %1828 = vmatprep.mubr.bf16.mxu0 %v7400_v63  ;;  %1891 = vmatprep.mubr.bf16.mxu1 %v7400_v63  ;;  %v6217_v17 = vld [vmem:[#allocation5 + $0x150] ss:$8 sps:$4 sm:$0xff]  }
 0x254   :  { %v1719_v26 = vmax.f32 %v1695_v43, 0.0  ;;  %v1696_v22 = vadd.f32 %v1672_v5, %v1224_v14  ;;  %2566 = vmatpush1.bf16.msra.mxu1 %v6214_v10  ;;  %v6258_v10 = vld [vmem:[#allocation5 + $0xe4] ss:$8 sps:$4 sm:$0xff]   ;;  %v6264_v14 = vld [vmem:[#allocation5 + $0xd4] ss:$8 sps:$4 sm:$0xff]  }
 0x255   :  { %v1676_v25 = vpop.f32.mrf.mxu1  ;;  %2567 = vmatprep.subr.bf16.mxu1 %v6222_v16  ;;  %v6219_v16 = vld [vmem:[#allocation5 + $0x154] ss:$8 sps:$4 sm:$0xff]   ;;  %v6225_v43 = vld [vmem:[#allocation5 + $0x144] ss:$8 sps:$4 sm:$0xff]   ;;  %v6262_v5 = vld [vmem:[#allocation5 + $0xd0] ss:$8 sps:$4 sm:$0xff]  }
 0x256   :  { %v1737_v8 = vpack.c.bf16 %v1719_v26, %v1713_v24  ;;  %v1720_v33 = vmax.f32 %v1696_v22, 0.0  ;;  %v1701_v15 = vadd.f32 %v1676_v25, %v1229_v21  ;;  %v6270_v24 = vld [vmem:[#allocation5 + $0xc4] ss:$8 sps:$4 sm:$0xff]   ;;  %v6231_v26 = vld [vmem:[#allocation5 + $0x134] ss:$8 sps:$4 sm:$0xff]  }
 0x257   :  { %v1678_v49 = vpop.f32.mrf.mxu1  ;;  %v6268_v22 = vld [vmem:[#allocation5 + $0xc0] ss:$8 sps:$4 sm:$0xff]   ;;  %v6274_v25 = vld [vmem:[#allocation5 + $0xb0] ss:$8 sps:$4 sm:$0xff]   ;;  %v6279_v21 = vld [vmem:[#allocation5 + $0x1b4] ss:$8 sps:$4 sm:$0xff]  }
 0x258   :  { %v1738_v28 = vpack.c.bf16 %v1720_v33, %v1714_v32  ;;  %2568 = vmatpush1.bf16.msra.mxu1 %v6220_v27  ;;  %v1702_v56 = vadd.f32 %v1678_v49, %v1230_v18  ;;  %v1725_v62 = vmax.f32 %v1701_v15, 0.0  ;;  %v6276_v27 = vld [vmem:[#allocation5 + $0xb4] ss:$8 sps:$4 sm:$0xff]   ;;  %v6241_v32 = vld [vmem:[#allocation5 + $0x110] ss:$8 sps:$4 sm:$0xff]  }
 0x259   :  { %v1680_v53 = vpop.f32.mrf.mxu1  ;;  %2569 = vmatprep.subr.bf16.mxu1 %v6228_v30  ;;  %v6282_v30 = vld [vmem:[#allocation5 + $0xa4] ss:$8 sps:$4 sm:$0xff]   ;;  %v6247_v33 = vld [vmem:[#allocation5 + $0x100] ss:$8 sps:$4 sm:$0xff]   ;;  %v6286_v49 = vld [vmem:[#allocation5 + $0x90] ss:$8 sps:$4 sm:$0xff]  }
 0x25a   :  { %v1707_v59 = vadd.f32 %v1680_v53, %v1235_v50  ;;  %5349 = vmatmul.mubr.msk.bf16.gmra.mxu0 %vm1766_vm1, %v7138_v39  ;;  %5352 = vmatmul.mubr.msk.bf16.gmra.mxu1 %vm1766_vm1, %v7138_v39  ;;  %v1726_v42 = vmax.f32 %v1702_v56, 0.0  ;;  %v6294_v18 = vld [vmem:[#allocation5 + $0x84] ss:$8 sps:$4 sm:$0xff]   ;;  %v6292_v50 = vld [vmem:[#allocation5 + $0x80] ss:$8 sps:$4 sm:$0xff]  }
 0x25b   :  { %v1682_v44 = vpop.f32.mrf.mxu1  ;;  %1934 = vmatprep.mubr.bf16.mxu0 %v7400_v63  ;;  %v6277_v53 = vld [vmem:[#allocation5 + $0x1b0] ss:$8 sps:$4 sm:$0xff]   ;;  %v6295_v15 = vld [vmem:[#allocation5 + $0x180] ss:$8 sps:$4 sm:$0xff]  }
 0x25c   :  { %v1708_v45 = vadd.f32 %v1682_v44, %v1236_v57  ;;  %2570 = vmatpush1.bf16.msra.mxu1 %v6226_v35  ;;  %v1731_v58 = vmax.f32 %v1707_v59, 0.0  ;;  %v6300_v35 = vld [vmem:[#allocation5 + $0x274] ss:$8 sps:$4 sm:$0xff]   ;;  %v6289_v56 = vld [vmem:[#allocation5 + $0x190] ss:$8 sps:$4 sm:$0xff]  }
 0x25d   :  { %2571 = vmatprep.subr.bf16.mxu1 %v6234_v55  ;;  %v6285_v55 = vld [vmem:[#allocation5 + $0x1a4] ss:$8 sps:$4 sm:$0xff]   ;;  %v6291_v57 = vld [vmem:[#allocation5 + $0x194] ss:$8 sps:$4 sm:$0xff]  }
 0x25e   :  { %v1732_v60 = vmax.f32 %v1708_v45, 0.0  ;;  %v1743_v20 = vpack.c.bf16 %v1731_v58, %v1725_v62  ;;  %v6297_v59 = vld [vmem:[#allocation5 + $0x184] ss:$8 sps:$4 sm:$0xff]   ;;  %v6303_v44 = vld [vmem:[#allocation5 + $0x374] ss:$8 sps:$4 sm:$0xff]  }
 0x260   :  { %v1744_v6 = vpack.c.bf16 %v1732_v60, %v1726_v42  ;;  %2572 = vmatpush1.bf16.msra.mxu1 %v6232_v52 }
 0x261   :  { %2573 = vmatprep.subr.bf16.mxu1 %v6240_v61 }
 0x262   :  { %1914 = vmatprep.subr.bf16.mxu0 %v1744_v6 }
 0x263   :  { %1915 = vmatpush1.bf16.msra.mxu0 %v1743_v20 }
 0x264   :  { %1916 = vmatprep.subr.bf16.mxu0 %v1738_v28  ;;  %2574 = vmatpush1.bf16.msra.mxu1 %v6238_v0  ;;  %v6273_v28 = vld [vmem:[#allocation5 + $0x1c4] ss:$8 sps:$4 sm:$0xff]  }
 0x265   :  { %2575 = vmatprep.subr.bf16.mxu1 %v6246_v13 }
 0x267   :  { %1917 = vmatpush1.bf16.msra.mxu0 %v1737_v8  ;;  %v6249_v8 = vld [vmem:[#allocation5 + $0x104] ss:$8 sps:$4 sm:$0xff]  }
 0x268   :  { %2604 = vmatprep.subr.bf16.mxu0 %v6207_v2  ;;  %2576 = vmatpush1.bf16.msra.mxu1 %v6244_v34  ;;  %v6298_v2 = vld [vmem:[#allocation5 + $0x270] ss:$8 sps:$4 sm:$0xff]  }
 0x269   :  { %2577 = vmatprep.subr.bf16.mxu1 %v6252_v4  ;;  %v6301_v34 = vld [vmem:[#allocation5 + $0x370] ss:$8 sps:$4 sm:$0xff]  }
 0x26a   :  { %5353 = vmatmul.mubr.msk.bf16.vlgmr.msra.gmra.mxu0 %vm1766_vm1, %v7104_v41  ;;  %v6223_v41 = vld [vmem:[#allocation5 + $0x140] ss:$8 sps:$4 sm:$0xff]  }
 0x26b   :  { %1944 = vmatprep.mubr.bf16.mxu0 %v7400_v63  ;;  %2605 = vmatpush1.bf16.msra.mxu0 %v6205_v37  ;;  %v6306_v37 = vld [vmem:[#allocation5 + $0x264] ss:$8 sps:$4 sm:$0xff]  }
 0x26c   :  { %2606 = vmatprep.subr.bf16.mxu0 %v6213_v7  ;;  %2578 = vmatpush2.bf16.msra.mxu1 %v6250_v19  ;;  %v6309_v7 = vld [vmem:[#allocation5 + $0x364] ss:$8 sps:$4 sm:$0xff]  }
 0x26d   :  { %2579 = vmatprep.subr.bf16.mxu1 %v6258_v10 }
 0x26f   :  { %2607 = vmatpush1.bf16.msra.mxu0 %v6211_v1  ;;  %v6304_v1 = vld [vmem:[#allocation5 + $0x260] ss:$8 sps:$4 sm:$0xff]  }
 0x270   :  { %2608 = vmatprep.subr.bf16.mxu0 %v6219_v16  ;;  %2580 = vmatpush2.bf16.msra.mxu1 %v6256_v3  ;;  %v6307_v16 = vld [vmem:[#allocation5 + $0x360] ss:$8 sps:$4 sm:$0xff]   ;;  %v6312_v3 = vld [vmem:[#allocation5 + $0x254] ss:$8 sps:$4 sm:$0xff]  }
 0x271   :  { %2581 = vmatprep.subr.bf16.mxu1 %v6264_v14  ;;  %v6315_v14 = vld [vmem:[#allocation5 + $0x354] ss:$8 sps:$4 sm:$0xff]  }
 0x272   :  { %5354 = vmatmul.mubr.msk.bf16.gmra.mxu0 %vm1766_vm1, %v7119_v36  ;;  %v6235_v36 = vld [vmem:[#allocation5 + $0x120] ss:$8 sps:$4 sm:$0xff]  }
 0x273   :  { %2609 = vmatpush1.bf16.msra.mxu0 %v6217_v17  ;;  %1954 = vmatprep.mubr.bf16.mxu0 %v7400_v63 }
 0x274   :  { %2610 = vmatprep.subr.bf16.mxu0 %v6225_v43  ;;  %2582 = vmatpush2.bf16.msra.mxu1 %v6262_v5  ;;  %v6310_v5 = vld [vmem:[#allocation5 + $0x250] ss:$8 sps:$4 sm:$0xff]  }
 0x275   :  { %2583 = vmatprep.subr.bf16.mxu1 %v6270_v24  ;;  %v6313_v24 = vld [vmem:[#allocation5 + $0x350] ss:$8 sps:$4 sm:$0xff]  }
 0x277   :  { %2611 = vmatpush1.bf16.msra.mxu0 %v6223_v41 }
 0x278   :  { %2612 = vmatprep.subr.bf16.mxu0 %v6231_v26  ;;  %2584 = vmatpush2.bf16.msra.mxu1 %v6268_v22  ;;  %v6318_v26 = vld [vmem:[#allocation5 + $0x244] ss:$8 sps:$4 sm:$0xff]  }
 0x279   :  { %2585 = vmatprep.subr.bf16.mxu1 %v6276_v27  ;;  %v6321_v22 = vld [vmem:[#allocation5 + $0x344] ss:$8 sps:$4 sm:$0xff]  }
 0x27a   :  { %5355 = vmatmul.mubr.msk.bf16.gmra.mxu0 %vm1766_vm1, %v7138_v39  ;;  %v6261_v39 = vld [vmem:[#allocation5 + $0x1e4] ss:$8 sps:$4 sm:$0xff]  }
 0x27b   :  { %2613 = vmatpush1.bf16.msra.mxu0 %v6229_v38 }
 0x27c   :  { %2614 = vmatprep.subr.bf16.mxu0 %v6237_v23  ;;  %2586 = vmatpush2.bf16.msra.mxu1 %v6274_v25  ;;  %v6316_v23 = vld [vmem:[#allocation5 + $0x240] ss:$8 sps:$4 sm:$0xff]  }
 0x27d   :  { %2587 = vmatprep.subr.bf16.mxu1 %v6282_v30  ;;  %v6319_v25 = vld [vmem:[#allocation5 + $0x340] ss:$8 sps:$4 sm:$0xff]   ;;  %v6324_v30 = vld [vmem:[#allocation5 + $0x234] ss:$8 sps:$4 sm:$0xff]  }
 0x27f   :  { %2615 = vmatpush1.bf16.msra.mxu0 %v6235_v36  ;;  %v6327_v36 = vld [vmem:[#allocation5 + $0x334] ss:$8 sps:$4 sm:$0xff]  }
 0x280   :  { %2616 = vmatprep.subr.bf16.mxu0 %v6243_v31  ;;  %2588 = vmatpush2.bf16.msra.mxu1 %v6280_v29 }
 0x281   :  { %2589 = vmatprep.subr.bf16.mxu1 %v6288_v48  ;;  %v6331_v48 = vld [vmem:[#allocation5 + $0x320] ss:$8 sps:$4 sm:$0xff]  }
 0x283   :  { %2617 = vmatpush1.bf16.msra.mxu0 %v6241_v32 }
 0x284   :  { %2618 = vmatprep.subr.bf16.mxu0 %v6249_v8  ;;  %2590 = vmatpush2.bf16.msra.mxu1 %v6286_v49  ;;  %v6322_v8 = vld [vmem:[#allocation5 + $0x230] ss:$8 sps:$4 sm:$0xff]   ;;  %v6328_v49 = vld [vmem:[#allocation5 + $0x220] ss:$8 sps:$4 sm:$0xff]  }
 0x285   :  { %2591 = vmatprep.subr.bf16.mxu1 %v6294_v18  ;;  %v6334_v18 = vld [vmem:[#allocation5 + $0x210] ss:$8 sps:$4 sm:$0xff]  }
 0x287   :  { %2619 = vmatpush1.bf16.msra.mxu0 %v6247_v33  ;;  %v6325_v33 = vld [vmem:[#allocation5 + $0x330] ss:$8 sps:$4 sm:$0xff]  }
 0x288   :  { %2620 = vmatprep.subr.bf16.mxu0 %v6255_v47  ;;  %2592 = vmatpush2.bf16.msra.mxu1 %v6292_v50  ;;  %v6342_v50 = vld [vmem:[#allocation5 + $0x204] ss:$8 sps:$4 sm:$0xff]  }
 0x289   :  { %2647 = vmatprep.subr.bf16.mxu1 %v6300_v35 }
 0x28b   :  { %2621 = vmatpush2.bf16.msra.mxu0 %v6253_v46  ;;  %v6330_v46 = vld [vmem:[#allocation5 + $0x224] ss:$8 sps:$4 sm:$0xff]  }
 0x28c   :  { %2622 = vmatprep.subr.bf16.mxu0 %v6261_v39  ;;  %v6333_v39 = vld [vmem:[#allocation5 + $0x324] ss:$8 sps:$4 sm:$0xff]  }
 0x28f   :  { %2623 = vmatpush2.bf16.msra.mxu0 %v6259_v11  ;;  %v6336_v11 = vld [vmem:[#allocation5 + $0x214] ss:$8 sps:$4 sm:$0xff]  }
 0x290   :  { %2624 = vmatprep.subr.bf16.mxu0 %v6267_v12  ;;  %v6339_v12 = vld [vmem:[#allocation5 + $0x314] ss:$8 sps:$4 sm:$0xff]  }
 0x293   :  { %2625 = vmatpush2.bf16.msra.mxu0 %v6265_v51  ;;  %v6337_v51 = vld [vmem:[#allocation5 + $0x310] ss:$8 sps:$4 sm:$0xff]  }
 0x294   :  { %2626 = vmatprep.subr.bf16.mxu0 %v6273_v28  ;;  %v6345_v28 = vld [vmem:[#allocation5 + $0x304] ss:$8 sps:$4 sm:$0xff]  }
 0x297   :  { %2627 = vmatpush2.bf16.msra.mxu0 %v6271_v40 }
 0x298   :  { %2628 = vmatprep.subr.bf16.mxu0 %v6279_v21  ;;  %v6340_v21 = vld [vmem:[#allocation5 + $0x200] ss:$8 sps:$4 sm:$0xff]  }
 0x29b   :  { %2629 = vmatpush2.bf16.msra.mxu0 %v6277_v53  ;;  %v6343_v53 = vld [vmem:[#allocation5 + $0x300] ss:$8 sps:$4 sm:$0xff]  }
 0x29c   :  { %2630 = vmatprep.subr.bf16.mxu0 %v6285_v55  ;;  %v6348_v55 = vld [vmem:[#allocation5 + $0x2f4] ss:$8 sps:$4 sm:$0xff]  }
 0x29f   :  { %2631 = vmatpush2.bf16.msra.mxu0 %v6283_v54  ;;  %v6351_v54 = vld [vmem:[#allocation5 + $0x3f4] ss:$8 sps:$4 sm:$0xff]  }
 0x2a0   :  { %2632 = vmatprep.subr.bf16.mxu0 %v6291_v57 }
 0x2a3   :  { %2633 = vmatpush2.bf16.msra.mxu0 %v6289_v56 }
 0x2a4   :  { %2634 = vmatprep.subr.bf16.mxu0 %v6297_v59  ;;  %v6346_v59 = vld [vmem:[#allocation5 + $0x2f0] ss:$8 sps:$4 sm:$0xff]  }
 0x2a7   :  { %2635 = vmatpush2.bf16.msra.mxu0 %v6295_v15  ;;  %v6349_v15 = vld [vmem:[#allocation5 + $0x3f0] ss:$8 sps:$4 sm:$0xff]  }
 0x2a8   :  { %3282 = vmatprep.subr.bf16.mxu0 %v6303_v44 }
 0x30a   :  { %v1810_v45 = vpop.f32.mrf.mxu0  ;;  %v1873_v52 = vpop.f32.mrf.mxu1 }
 0x30c   :  { %v1812_v58 = vpop.f32.mrf.mxu0  ;;  %v1875_v61 = vpop.f32.mrf.mxu1 }
 0x30e   :  { %v1814_v42 = vpop.f32.mrf.mxu0  ;;  %v1877_v60 = vpop.f32.mrf.mxu1 }
 0x30f   :  { %v1967_v62 = vpack.c.bf16 %v1877_v60, %v1873_v52  ;;  %v1965_v4 = vpack.c.bf16 %v1814_v42, %v1810_v45  ;;  %v6354_v45 = vld [vmem:[#allocation5 + $0x2e4] ss:$8 sps:$4 sm:$0xff]   ;;  %v6360_v42 = vld [vmem:[#allocation5 + $0x2d4] ss:$8 sps:$4 sm:$0xff]  }
 0x310   :  { %v1816_v6 = vpop.f32.mrf.mxu0  ;;  %v1879_v0 = vpop.f32.mrf.mxu1  ;;  %v6357_v52 = vld [vmem:[#allocation5 + $0x3e4] ss:$8 sps:$4 sm:$0xff]   ;;  %v6363_v60 = vld [vmem:[#allocation5 + $0x3d4] ss:$8 sps:$4 sm:$0xff]  }
 0x311   :  { %v1966_v20 = vpack.c.bf16 %v1816_v6, %v1812_v58  ;;  %v1968_v13 = vpack.c.bf16 %v1879_v0, %v1875_v61  ;;  %v6352_v58 = vld [vmem:[#allocation5 + $0x2e0] ss:$8 sps:$4 sm:$0xff]   ;;  %v6361_v6 = vld [vmem:[#allocation5 + $0x3d0] ss:$8 sps:$4 sm:$0xff]   ;;  %v6366_v0 = vld [vmem:[#allocation5 + $0x2c4] ss:$8 sps:$4 sm:$0xff]  }
 0x312   :  { %v7160_v19 = vpop.f32.mrf.mxu0  ;;  %v6355_v61 = vld [vmem:[#allocation5 + $0x3e0] ss:$8 sps:$4 sm:$0xff]  }
 0x313   :  { %2593 = vmatprep.mubr.bf16.mxu1 %v1966_v20  ;;  %2636 = vmatprep.mubr.bf16.mxu0 %v1968_v13  ;;  %v6369_v20 = vld [vmem:[#allocation5 + $0x3c4] ss:$8 sps:$4 sm:$0xff]   ;;  %v7180_v13 = vpop.f32.mrf.mxu1 }
 0x314   :  { %2594 = vmatmul.mubr.bf16.vlgmr.msra.gmra.mxu1 %v1965_v4  ;;  %2637 = vmatmul.mubr.bf16.vlgmr.msra.gmra.mxu0 %v1967_v62  ;;  %v1822_v10 = vpop.f32.mrf.mxu0  ;;  %v6358_v62 = vld [vmem:[#allocation5 + $0x2d0] ss:$8 sps:$4 sm:$0xff]  }
 0x315   :  { %2648 = vmatpush1.bf16.msra.mxu1 %v6298_v2  ;;  %3283 = vmatpush1.bf16.msra.mxu0 %v6301_v34  ;;  %v6364_v2 = vld [vmem:[#allocation5 + $0x2c0] ss:$8 sps:$4 sm:$0xff]  }
 0x316   :  { %2649 = vmatprep.subr.bf16.mxu1 %v6306_v37  ;;  %3284 = vmatprep.subr.bf16.mxu0 %v6309_v7  ;;  %v7162_v17 = vpop.f32.mrf.mxu0  ;;  %v6367_v34 = vld [vmem:[#allocation5 + $0x3c0] ss:$8 sps:$4 sm:$0xff]   ;;  %v6372_v37 = vld [vmem:[#allocation5 + $0x2b4] ss:$8 sps:$4 sm:$0xff]  }
 0x317   :  { %v6375_v7 = vld [vmem:[#allocation5 + $0x3b4] ss:$8 sps:$4 sm:$0xff]  }
 0x318   :  { %v1826_v43 = vpop.f32.mrf.mxu0 }
 0x319   :  { %2650 = vmatpush1.bf16.msra.mxu1 %v6304_v1  ;;  %3285 = vmatpush1.bf16.msra.mxu0 %v6307_v16  ;;  %v1972_v41 = vpack.c.bf16 %v1826_v43, %v1822_v10  ;;  %v7184_v10 = vpop.f32.mrf.mxu1  ;;  %v6370_v1 = vld [vmem:[#allocation5 + $0x2b0] ss:$8 sps:$4 sm:$0xff]   ;;  %v6381_v43 = vld [vmem:[#allocation5 + $0x3a4] ss:$8 sps:$4 sm:$0xff]  }
 0x31a   :  { %2651 = vmatprep.subr.bf16.mxu1 %v6312_v3  ;;  %3286 = vmatprep.subr.bf16.mxu0 %v6315_v14  ;;  %v7164_v27 = vpop.f32.mrf.mxu0  ;;  %v6373_v16 = vld [vmem:[#allocation5 + $0x3b0] ss:$8 sps:$4 sm:$0xff]   ;;  %v6378_v14 = vld [vmem:[#allocation5 + $0x2a4] ss:$8 sps:$4 sm:$0xff]  }
 0x31b   :  { %3314 = vmatprep.mubr.bf16.mxu0 %v1972_v41  ;;  %v6379_v41 = vld [vmem:[#allocation5 + $0x3a0] ss:$8 sps:$4 sm:$0xff]  }
 0x31c   :  { %v7166_v38 = vpop.f32.mrf.mxu0 }
 0x31d   :  { %2652 = vmatpush1.bf16.msra.mxu1 %v6310_v5  ;;  %3287 = vmatpush1.bf16.msra.mxu0 %v6313_v24  ;;  %v7188_v5 = vpop.f32.mrf.mxu1  ;;  %v6376_v24 = vld [vmem:[#allocation5 + $0x2a0] ss:$8 sps:$4 sm:$0xff]  }
 0x31e   :  { %2653 = vmatprep.subr.bf16.mxu1 %v6318_v26  ;;  %3288 = vmatprep.subr.bf16.mxu0 %v6321_v22  ;;  %v7168_v31 = vpop.f32.mrf.mxu0  ;;  %v6384_v22 = vld [vmem:[#allocation5 + $0x294] ss:$8 sps:$4 sm:$0xff]  }
 0x31f   :  { %v1977_v29 = vpack.c.bf16 %v7168_v31, %v7164_v27  ;;  %v6600_v27 = vld [vmem:[#allocation5 + $0x834] ss:$8 sps:$4 sm:$0xff]   ;;  %v6598_v31 = vld [vmem:[#allocation5 + $0x830] ss:$8 sps:$4 sm:$0xff]  }
 0x320   :  { %v7172_v32 = vpop.f32.mrf.mxu0 }
 0x321   :  { %2654 = vmatpush1.bf16.msra.mxu1 %v6316_v23  ;;  %3289 = vmatpush1.bf16.msra.mxu0 %v6319_v25  ;;  %v1978_v47 = vpack.c.bf16 %v7172_v32, %v7166_v38  ;;  %v6387_v23 = vld [vmem:[#allocation5 + $0x394] ss:$8 sps:$4 sm:$0xff]   ;;  %v1889_v25 = vpop.f32.mrf.mxu1  ;;  %v6511_v38 = vld [vmem:[#allocation5 + $0x740] ss:$8 sps:$4 sm:$0xff]  }
 0x322   :  { %2655 = vmatprep.subr.bf16.mxu1 %v6324_v30  ;;  %3290 = vmatprep.subr.bf16.mxu0 %v6327_v36  ;;  %v6382_v36 = vld [vmem:[#allocation5 + $0x290] ss:$8 sps:$4 sm:$0xff]   ;;  %v6516_v32 = vld [vmem:[#allocation5 + $0x634] ss:$8 sps:$4 sm:$0xff]  }
 0x323   :  { %v7192_v30 = vpop.f32.mrf.mxu1 }
 0x325   :  { %2656 = vmatpush1.bf16.msra.mxu1 %v6322_v8  ;;  %3291 = vmatpush1.bf16.msra.mxu0 %v6325_v33  ;;  %v6385_v8 = vld [vmem:[#allocation5 + $0x390] ss:$8 sps:$4 sm:$0xff]  }
 0x326   :  { %2657 = vmatprep.subr.bf16.mxu1 %v6330_v46  ;;  %3292 = vmatprep.subr.bf16.mxu0 %v6333_v39  ;;  %v6390_v46 = vld [vmem:[#allocation5 + $0x284] ss:$8 sps:$4 sm:$0xff]  }
 0x327   :  { %v6393_v39 = vld [vmem:[#allocation5 + $0x384] ss:$8 sps:$4 sm:$0xff]  }
 0x329   :  { %2658 = vmatpush1.bf16.msra.mxu1 %v6328_v49  ;;  %3293 = vmatpush1.bf16.msra.mxu0 %v6331_v48  ;;  %v7194_v49 = vpop.f32.mrf.mxu1 }
 0x32a   :  { %2659 = vmatprep.subr.bf16.mxu1 %v6336_v11  ;;  %3294 = vmatprep.subr.bf16.mxu0 %v6339_v12  ;;  %v7176_v35 = vpop.f32.mrf.mxu0  ;;  %v6388_v11 = vld [vmem:[#allocation5 + $0x280] ss:$8 sps:$4 sm:$0xff]  }
 0x32b   :  { %v6391_v12 = vld [vmem:[#allocation5 + $0x380] ss:$8 sps:$4 sm:$0xff]  }
 0x32c   :  { %v1938_v40 = vpop.f32.mrf.mxu0 }
 0x32d   :  { %2660 = vmatpush1.bf16.msra.mxu1 %v6334_v18  ;;  %3295 = vmatpush1.bf16.msra.mxu0 %v6337_v51  ;;  %v7198_v18 = vpop.f32.mrf.mxu1  ;;  %v6396_v51 = vld [vmem:[#allocation5 + $0x474] ss:$8 sps:$4 sm:$0xff]  }
 0x32e   :  { %2661 = vmatprep.subr.bf16.mxu1 %v6342_v50  ;;  %3296 = vmatprep.subr.bf16.mxu0 %v6345_v28  ;;  %v7178_v57 = vpop.f32.mrf.mxu0  ;;  %v6399_v50 = vld [vmem:[#allocation5 + $0x574] ss:$8 sps:$4 sm:$0xff]   ;;  %v1979_v28 = vpack.c.bf16 %v7198_v18, %v7192_v30  ;;  %v6601_v30 = vld [vmem:[#allocation5 + $0x820] ss:$8 sps:$4 sm:$0xff]  }
 0x32f   :  { %v6606_v18 = vld [vmem:[#allocation5 + $0x814] ss:$8 sps:$4 sm:$0xff]  }
 0x330   :  { %v1942_v56 = vpop.f32.mrf.mxu0 }
 0x331   :  { %2662 = vmatpush1.bf16.msra.mxu1 %v6340_v21  ;;  %3297 = vmatpush1.bf16.msra.mxu0 %v6343_v53  ;;  %v1970_v44 = vpack.c.bf16 %v1942_v56, %v1938_v40  ;;  %v6394_v53 = vld [vmem:[#allocation5 + $0x470] ss:$8 sps:$4 sm:$0xff]   ;;  %v1971_v56 = vpack.c.bf16 %v7162_v17, %v7160_v19  ;;  %v6408_v19 = vld [vmem:[#allocation5 + $0x454] ss:$8 sps:$4 sm:$0xff]  }
 0x332   :  { %2663 = vmatprep.subr.bf16.mxu1 %v6348_v55  ;;  %3298 = vmatprep.subr.bf16.mxu0 %v6351_v54  ;;  %v7182_v4 = vpop.f32.mrf.mxu0  ;;  %v6397_v55 = vld [vmem:[#allocation5 + $0x570] ss:$8 sps:$4 sm:$0xff]   ;;  %v6411_v17 = vld [vmem:[#allocation5 + $0x554] ss:$8 sps:$4 sm:$0xff]  }
 0x333   :  { %2679 = vmatprep.mubr.bf16.mxu1 %v1970_v44  ;;  %v6405_v44 = vld [vmem:[#allocation5 + $0x564] ss:$8 sps:$4 sm:$0xff]  }
 0x334   :  { %v7186_v3 = vpop.f32.mrf.mxu0 }
 0x335   :  { %2664 = vmatpush2.bf16.msra.mxu1 %v6346_v59  ;;  %3299 = vmatpush2.bf16.msra.mxu0 %v6349_v15  ;;  %v1969_v59 = vpack.c.bf16 %v7178_v57, %v7176_v35  ;;  %v6402_v15 = vld [vmem:[#allocation5 + $0x464] ss:$8 sps:$4 sm:$0xff]   ;;  %v6406_v35 = vld [vmem:[#allocation5 + $0x450] ss:$8 sps:$4 sm:$0xff]  }
 0x336   :  { %2665 = vmatprep.subr.bf16.mxu1 %v6354_v45  ;;  %3300 = vmatprep.subr.bf16.mxu0 %v6357_v52  ;;  %v7190_v26 = vpop.f32.mrf.mxu0  ;;  %v1974_v45 = vpack.c.bf16 %v1889_v25, %v7184_v10  ;;  %v6409_v57 = vld [vmem:[#allocation5 + $0x550] ss:$8 sps:$4 sm:$0xff]   ;;  %v6424_v10 = vld [vmem:[#allocation5 + $0x420] ss:$8 sps:$4 sm:$0xff]   ;;  %v6444_v25 = vld [vmem:[#allocation5 + $0x4f4] ss:$8 sps:$4 sm:$0xff]  }
 0x338   :  { %v1952_v33 = vpop.f32.mrf.mxu0 }
 0x339   :  { %2666 = vmatpush2.bf16.msra.mxu1 %v6352_v58  ;;  %3301 = vmatpush2.bf16.msra.mxu0 %v6355_v61  ;;  %v1976_v52 = vpack.c.bf16 %v1952_v33, %v7186_v3  ;;  %v6400_v58 = vld [vmem:[#allocation5 + $0x460] ss:$8 sps:$4 sm:$0xff]   ;;  %v6435_v3 = vld [vmem:[#allocation5 + $0x514] ss:$8 sps:$4 sm:$0xff]   ;;  %v6445_v33 = vld [vmem:[#allocation5 + $0x5f0] ss:$8 sps:$4 sm:$0xff]  }
 0x33a   :  { %2667 = vmatprep.subr.bf16.mxu1 %v6360_v42  ;;  %3302 = vmatprep.subr.bf16.mxu0 %v6363_v60  ;;  %v7196_v48 = vpop.f32.mrf.mxu0  ;;  %v6403_v61 = vld [vmem:[#allocation5 + $0x560] ss:$8 sps:$4 sm:$0xff]   ;;  %v6414_v42 = vld [vmem:[#allocation5 + $0x444] ss:$8 sps:$4 sm:$0xff]  }
 0x33b   :  { %v6417_v60 = vld [vmem:[#allocation5 + $0x544] ss:$8 sps:$4 sm:$0xff]  }
 0x33c   :  { %v7202_v40 = vpop.f32.mrf.mxu0 }
 0x33d   :  { %2668 = vmatpush2.bf16.msra.mxu1 %v6358_v62  ;;  %3303 = vmatpush2.bf16.msra.mxu0 %v6361_v6  ;;  %v6412_v62 = vld [vmem:[#allocation5 + $0x440] ss:$8 sps:$4 sm:$0xff]  }
 0x33e   :  { %2669 = vmatprep.subr.bf16.mxu1 %v6366_v0  ;;  %3304 = vmatprep.subr.bf16.mxu0 %v6369_v20  ;;  %v7204_v21 = vpop.f32.mrf.mxu0  ;;  %v6415_v6 = vld [vmem:[#allocation5 + $0x540] ss:$8 sps:$4 sm:$0xff]   ;;  %v6420_v0 = vld [vmem:[#allocation5 + $0x434] ss:$8 sps:$4 sm:$0xff]  }
 0x33f   :  { %v1981_v54 = vpack.c.bf16 %v7204_v21, %v7196_v48  ;;  %v6423_v20 = vld [vmem:[#allocation5 + $0x534] ss:$8 sps:$4 sm:$0xff]  }
 0x341   :  { %2670 = vmatpush2.bf16.msra.mxu1 %v6364_v2  ;;  %3305 = vmatpush2.bf16.msra.mxu0 %v6367_v34  ;;  %v6418_v2 = vld [vmem:[#allocation5 + $0x430] ss:$8 sps:$4 sm:$0xff]  }
 0x342   :  { %2671 = vmatprep.subr.bf16.mxu1 %v6372_v37  ;;  %3306 = vmatprep.subr.bf16.mxu0 %v6375_v7  ;;  %v6421_v34 = vld [vmem:[#allocation5 + $0x530] ss:$8 sps:$4 sm:$0xff]   ;;  %v6426_v37 = vld [vmem:[#allocation5 + $0x424] ss:$8 sps:$4 sm:$0xff]  }
 0x343   :  { %v6429_v7 = vld [vmem:[#allocation5 + $0x524] ss:$8 sps:$4 sm:$0xff]  }
 0x345   :  { %2672 = vmatpush2.bf16.msra.mxu1 %v6370_v1  ;;  %3307 = vmatpush2.bf16.msra.mxu0 %v6373_v16  ;;  %v6427_v1 = vld [vmem:[#allocation5 + $0x520] ss:$8 sps:$4 sm:$0xff]   ;;  %v6432_v16 = vld [vmem:[#allocation5 + $0x414] ss:$8 sps:$4 sm:$0xff]  }
 0x346   :  { %2673 = vmatprep.subr.bf16.mxu1 %v6378_v14  ;;  %3308 = vmatprep.subr.bf16.mxu0 %v6381_v43  ;;  %v6430_v14 = vld [vmem:[#allocation5 + $0x410] ss:$8 sps:$4 sm:$0xff]  }
 0x347   :  { %v6433_v43 = vld [vmem:[#allocation5 + $0x510] ss:$8 sps:$4 sm:$0xff]  }
 0x349   :  { %2674 = vmatpush2.bf16.msra.mxu1 %v6376_v24  ;;  %3309 = vmatpush2.bf16.msra.mxu0 %v6379_v41  ;;  %v6438_v24 = vld [vmem:[#allocation5 + $0x404] ss:$8 sps:$4 sm:$0xff]  }
 0x34a   :  { %2675 = vmatprep.subr.bf16.mxu1 %v6384_v22  ;;  %3310 = vmatprep.subr.bf16.mxu0 %v6387_v23  ;;  %v6441_v41 = vld [vmem:[#allocation5 + $0x504] ss:$8 sps:$4 sm:$0xff]   ;;  %v6436_v22 = vld [vmem:[#allocation5 + $0x400] ss:$8 sps:$4 sm:$0xff]  }
 0x34b   :  { %v6439_v23 = vld [vmem:[#allocation5 + $0x500] ss:$8 sps:$4 sm:$0xff]  }
 0x34d   :  { %2676 = vmatpush2.bf16.msra.mxu1 %v6382_v36  ;;  %3311 = vmatpush2.bf16.msra.mxu0 %v6385_v8  ;;  %v6447_v36 = vld [vmem:[#allocation5 + $0x5f4] ss:$8 sps:$4 sm:$0xff]   ;;  %v6442_v8 = vld [vmem:[#allocation5 + $0x4f0] ss:$8 sps:$4 sm:$0xff]  }
 0x34e   :  { %2677 = vmatprep.subr.bf16.mxu1 %v6390_v46  ;;  %3312 = vmatprep.subr.bf16.mxu0 %v6393_v39  ;;  %v6450_v46 = vld [vmem:[#allocation5 + $0x4e4] ss:$8 sps:$4 sm:$0xff]  }
 0x34f   :  { %v6453_v39 = vld [vmem:[#allocation5 + $0x5e4] ss:$8 sps:$4 sm:$0xff]  }
 0x351   :  { %2678 = vmatpush2.bf16.msra.mxu1 %v6388_v11  ;;  %3313 = vmatpush2.bf16.msra.mxu0 %v6391_v12  ;;  %v6448_v11 = vld [vmem:[#allocation5 + $0x4e0] ss:$8 sps:$4 sm:$0xff]  }
 0x352   :  { %3325 = vmatprep.subr.bf16.mxu1 %v6396_v51  ;;  %3368 = vmatprep.subr.bf16.mxu0 %v6399_v50  ;;  %v6451_v12 = vld [vmem:[#allocation5 + $0x5e0] ss:$8 sps:$4 sm:$0xff]   ;;  %v6456_v51 = vld [vmem:[#allocation5 + $0x4d4] ss:$8 sps:$4 sm:$0xff]  }
 0x353   :  { %v6459_v50 = vld [vmem:[#allocation5 + $0x5d4] ss:$8 sps:$4 sm:$0xff]  }
 0x354   :  { %2680 = vmatmul.mubr.bf16.vlgmr.msra.gmra.mxu1 %v1969_v59  ;;  %3315 = vmatmul.mubr.bf16.vlgmr.msra.gmra.mxu0 %v1971_v56  ;;  %v6462_v56 = vld [vmem:[#allocation5 + $0x4c4] ss:$8 sps:$4 sm:$0xff]  }
 0x355   :  { %3326 = vmatpush1.bf16.msra.mxu1 %v6394_v53  ;;  %3369 = vmatpush1.bf16.msra.mxu0 %v6397_v55  ;;  %v6454_v53 = vld [vmem:[#allocation5 + $0x4d0] ss:$8 sps:$4 sm:$0xff]   ;;  %v6465_v59 = vld [vmem:[#allocation5 + $0x5c4] ss:$8 sps:$4 sm:$0xff]  }
 0x356   :  { %3327 = vmatprep.subr.bf16.mxu1 %v6402_v15  ;;  %3370 = vmatprep.subr.bf16.mxu0 %v6405_v44  ;;  %v6457_v55 = vld [vmem:[#allocation5 + $0x5d0] ss:$8 sps:$4 sm:$0xff]   ;;  %v6460_v15 = vld [vmem:[#allocation5 + $0x4c0] ss:$8 sps:$4 sm:$0xff]  }
 0x357   :  { %3357 = vmatprep.mubr.bf16.mxu1 %v1974_v45  ;;  %3400 = vmatprep.mubr.bf16.mxu0 %v1976_v52  ;;  %v6463_v44 = vld [vmem:[#allocation5 + $0x5c0] ss:$8 sps:$4 sm:$0xff]   ;;  %v6468_v45 = vld [vmem:[#allocation5 + $0x4b4] ss:$8 sps:$4 sm:$0xff]  }
 0x358   :  { %v6471_v52 = vld [vmem:[#allocation5 + $0x5b4] ss:$8 sps:$4 sm:$0xff]  }
 0x359   :  { %3328 = vmatpush1.bf16.msra.mxu1 %v6400_v58  ;;  %3371 = vmatpush1.bf16.msra.mxu0 %v6403_v61  ;;  %v6466_v58 = vld [vmem:[#allocation5 + $0x4b0] ss:$8 sps:$4 sm:$0xff]  }
 0x35a   :  { %3329 = vmatprep.subr.bf16.mxu1 %v6408_v19  ;;  %3372 = vmatprep.subr.bf16.mxu0 %v6411_v17  ;;  %v6469_v61 = vld [vmem:[#allocation5 + $0x5b0] ss:$8 sps:$4 sm:$0xff]   ;;  %v6474_v19 = vld [vmem:[#allocation5 + $0x4a4] ss:$8 sps:$4 sm:$0xff]  }
 0x35b   :  { %v6477_v17 = vld [vmem:[#allocation5 + $0x5a4] ss:$8 sps:$4 sm:$0xff]  }
 0x35d   :  { %3330 = vmatpush1.bf16.msra.mxu1 %v6406_v35  ;;  %3373 = vmatpush1.bf16.msra.mxu0 %v6409_v57  ;;  %v6472_v35 = vld [vmem:[#allocation5 + $0x4a0] ss:$8 sps:$4 sm:$0xff]  }
 0x35e   :  { %3331 = vmatprep.subr.bf16.mxu1 %v6414_v42  ;;  %3374 = vmatprep.subr.bf16.mxu0 %v6417_v60  ;;  %v6475_v57 = vld [vmem:[#allocation5 + $0x5a0] ss:$8 sps:$4 sm:$0xff]   ;;  %v6480_v42 = vld [vmem:[#allocation5 + $0x494] ss:$8 sps:$4 sm:$0xff]  }
 0x35f   :  { %v6483_v60 = vld [vmem:[#allocation5 + $0x594] ss:$8 sps:$4 sm:$0xff]  }
 0x361   :  { %3332 = vmatpush1.bf16.msra.mxu1 %v6412_v62  ;;  %3375 = vmatpush1.bf16.msra.mxu0 %v6415_v6  ;;  %v6478_v62 = vld [vmem:[#allocation5 + $0x490] ss:$8 sps:$4 sm:$0xff]  }
 0x362   :  { %3333 = vmatprep.subr.bf16.mxu1 %v6420_v0  ;;  %3376 = vmatprep.subr.bf16.mxu0 %v6423_v20  ;;  %v6481_v6 = vld [vmem:[#allocation5 + $0x590] ss:$8 sps:$4 sm:$0xff]   ;;  %v6486_v0 = vld [vmem:[#allocation5 + $0x484] ss:$8 sps:$4 sm:$0xff]  }
 0x363   :  { %v6489_v20 = vld [vmem:[#allocation5 + $0x584] ss:$8 sps:$4 sm:$0xff]  }
 0x365   :  { %3334 = vmatpush1.bf16.msra.mxu1 %v6418_v2  ;;  %3377 = vmatpush1.bf16.msra.mxu0 %v6421_v34  ;;  %v6484_v2 = vld [vmem:[#allocation5 + $0x480] ss:$8 sps:$4 sm:$0xff]  }
 0x366   :  { %3335 = vmatprep.subr.bf16.mxu1 %v6426_v37  ;;  %3378 = vmatprep.subr.bf16.mxu0 %v6429_v7  ;;  %v6487_v34 = vld [vmem:[#allocation5 + $0x580] ss:$8 sps:$4 sm:$0xff]   ;;  %v6492_v37 = vld [vmem:[#allocation5 + $0x674] ss:$8 sps:$4 sm:$0xff]  }
 0x367   :  { %v6495_v7 = vld [vmem:[#allocation5 + $0x774] ss:$8 sps:$4 sm:$0xff]  }
 0x369   :  { %3336 = vmatpush1.bf16.msra.mxu1 %v6424_v10  ;;  %3379 = vmatpush1.bf16.msra.mxu0 %v6427_v1  ;;  %v1975_v10 = vpack.c.bf16 %v7190_v26, %v7182_v4  ;;  %v1899_v1 = vpop.f32.mrf.mxu1  ;;  %v6496_v4 = vld [vmem:[#allocation5 + $0x660] ss:$8 sps:$4 sm:$0xff]  }
 0x36a   :  { %3337 = vmatprep.subr.bf16.mxu1 %v6432_v16  ;;  %3380 = vmatprep.subr.bf16.mxu0 %v6435_v3  ;;  %v6490_v16 = vld [vmem:[#allocation5 + $0x670] ss:$8 sps:$4 sm:$0xff]   ;;  %v1973_v3 = vpack.c.bf16 %v7188_v5, %v7180_v13  ;;  %v6499_v26 = vld [vmem:[#allocation5 + $0x760] ss:$8 sps:$4 sm:$0xff]   ;;  %v6507_v13 = vld [vmem:[#allocation5 + $0x754] ss:$8 sps:$4 sm:$0xff]  }
 0x36b   :  { %v6502_v5 = vld [vmem:[#allocation5 + $0x650] ss:$8 sps:$4 sm:$0xff]  }
 0x36d   :  { %3338 = vmatpush1.bf16.msra.mxu1 %v6430_v14  ;;  %3381 = vmatpush1.bf16.msra.mxu0 %v6433_v43  ;;  %v6493_v14 = vld [vmem:[#allocation5 + $0x770] ss:$8 sps:$4 sm:$0xff]   ;;  %v6498_v43 = vld [vmem:[#allocation5 + $0x664] ss:$8 sps:$4 sm:$0xff]  }
 0x36e   :  { %3339 = vmatprep.subr.bf16.mxu1 %v6438_v24  ;;  %3382 = vmatprep.subr.bf16.mxu0 %v6441_v41  ;;  %v6501_v24 = vld [vmem:[#allocation5 + $0x764] ss:$8 sps:$4 sm:$0xff]   ;;  %v1980_v41 = vpack.c.bf16 %v1899_v1, %v7194_v49  ;;  %v6505_v49 = vld [vmem:[#allocation5 + $0x750] ss:$8 sps:$4 sm:$0xff]  }
 0x36f   :  { %v6565_v1 = vld [vmem:[#allocation5 + $0x7b0] ss:$8 sps:$4 sm:$0xff]  }
 0x371   :  { %3340 = vmatpush1.bf16.msra.mxu1 %v6436_v22  ;;  %3383 = vmatpush1.bf16.msra.mxu0 %v6439_v23  ;;  %v6504_v22 = vld [vmem:[#allocation5 + $0x654] ss:$8 sps:$4 sm:$0xff]   ;;  %v6510_v23 = vld [vmem:[#allocation5 + $0x644] ss:$8 sps:$4 sm:$0xff]  }
 0x372   :  { %3341 = vmatprep.subr.bf16.mxu1 %v6444_v25  ;;  %3384 = vmatprep.subr.bf16.mxu0 %v6447_v36  ;;  %v6513_v25 = vld [vmem:[#allocation5 + $0x744] ss:$8 sps:$4 sm:$0xff]   ;;  %v6508_v36 = vld [vmem:[#allocation5 + $0x640] ss:$8 sps:$4 sm:$0xff]  }
 0x375   :  { %3342 = vmatpush2.bf16.msra.mxu1 %v6442_v8  ;;  %3385 = vmatpush2.bf16.msra.mxu0 %v6445_v33  ;;  %v6514_v8 = vld [vmem:[#allocation5 + $0x630] ss:$8 sps:$4 sm:$0xff]  }
 0x376   :  { %3343 = vmatprep.subr.bf16.mxu1 %v6450_v46  ;;  %3386 = vmatprep.subr.bf16.mxu0 %v6453_v39  ;;  %v6517_v33 = vld [vmem:[#allocation5 + $0x730] ss:$8 sps:$4 sm:$0xff]   ;;  %v6522_v46 = vld [vmem:[#allocation5 + $0x624] ss:$8 sps:$4 sm:$0xff]  }
 0x377   :  { %v6525_v39 = vld [vmem:[#allocation5 + $0x724] ss:$8 sps:$4 sm:$0xff]  }
 0x379   :  { %3344 = vmatpush2.bf16.msra.mxu1 %v6448_v11  ;;  %3387 = vmatpush2.bf16.msra.mxu0 %v6451_v12  ;;  %v6520_v11 = vld [vmem:[#allocation5 + $0x620] ss:$8 sps:$4 sm:$0xff]  }
 0x37a   :  { %3345 = vmatprep.subr.bf16.mxu1 %v6456_v51  ;;  %3388 = vmatprep.subr.bf16.mxu0 %v6459_v50  ;;  %v6523_v12 = vld [vmem:[#allocation5 + $0x720] ss:$8 sps:$4 sm:$0xff]   ;;  %v6528_v51 = vld [vmem:[#allocation5 + $0x614] ss:$8 sps:$4 sm:$0xff]  }
 0x37b   :  { %v6531_v50 = vld [vmem:[#allocation5 + $0x714] ss:$8 sps:$4 sm:$0xff]  }
 0x37d   :  { %3346 = vmatpush2.bf16.msra.mxu1 %v6454_v53  ;;  %3389 = vmatpush2.bf16.msra.mxu0 %v6457_v55  ;;  %v6526_v53 = vld [vmem:[#allocation5 + $0x610] ss:$8 sps:$4 sm:$0xff]  }
 0x37e   :  { %3347 = vmatprep.subr.bf16.mxu1 %v6462_v56  ;;  %3390 = vmatprep.subr.bf16.mxu0 %v6465_v59  ;;  %v6529_v55 = vld [vmem:[#allocation5 + $0x710] ss:$8 sps:$4 sm:$0xff]   ;;  %v6534_v56 = vld [vmem:[#allocation5 + $0x604] ss:$8 sps:$4 sm:$0xff]  }
 0x37f   :  { %v6537_v59 = vld [vmem:[#allocation5 + $0x704] ss:$8 sps:$4 sm:$0xff]  }
 0x381   :  { %3348 = vmatpush2.bf16.msra.mxu1 %v6460_v15  ;;  %3391 = vmatpush2.bf16.msra.mxu0 %v6463_v44  ;;  %v6532_v15 = vld [vmem:[#allocation5 + $0x600] ss:$8 sps:$4 sm:$0xff]  }
 0x382   :  { %3349 = vmatprep.subr.bf16.mxu1 %v6468_v45  ;;  %3392 = vmatprep.subr.bf16.mxu0 %v6471_v52  ;;  %v6535_v44 = vld [vmem:[#allocation5 + $0x700] ss:$8 sps:$4 sm:$0xff]   ;;  %v6540_v45 = vld [vmem:[#allocation5 + $0x6f4] ss:$8 sps:$4 sm:$0xff]  }
 0x383   :  { %v6543_v52 = vld [vmem:[#allocation5 + $0x7f4] ss:$8 sps:$4 sm:$0xff]  }
 0x385   :  { %3350 = vmatpush2.bf16.msra.mxu1 %v6466_v58  ;;  %3393 = vmatpush2.bf16.msra.mxu0 %v6469_v61  ;;  %v6538_v58 = vld [vmem:[#allocation5 + $0x6f0] ss:$8 sps:$4 sm:$0xff]  }
 0x386   :  { %3351 = vmatprep.subr.bf16.mxu1 %v6474_v19  ;;  %3394 = vmatprep.subr.bf16.mxu0 %v6477_v17  ;;  %v6541_v61 = vld [vmem:[#allocation5 + $0x7f0] ss:$8 sps:$4 sm:$0xff]   ;;  %v6546_v19 = vld [vmem:[#allocation5 + $0x6e4] ss:$8 sps:$4 sm:$0xff]  }
 0x387   :  { %v6549_v17 = vld [vmem:[#allocation5 + $0x7e4] ss:$8 sps:$4 sm:$0xff]  }
 0x389   :  { %3352 = vmatpush2.bf16.msra.mxu1 %v6472_v35  ;;  %3395 = vmatpush2.bf16.msra.mxu0 %v6475_v57  ;;  %v6544_v35 = vld [vmem:[#allocation5 + $0x6e0] ss:$8 sps:$4 sm:$0xff]  }
 0x38a   :  { %3353 = vmatprep.subr.bf16.mxu1 %v6480_v42  ;;  %3396 = vmatprep.subr.bf16.mxu0 %v6483_v60  ;;  %v6547_v57 = vld [vmem:[#allocation5 + $0x7e0] ss:$8 sps:$4 sm:$0xff]   ;;  %v6552_v42 = vld [vmem:[#allocation5 + $0x6d4] ss:$8 sps:$4 sm:$0xff]  }
 0x38b   :  { %v6555_v60 = vld [vmem:[#allocation5 + $0x7d4] ss:$8 sps:$4 sm:$0xff]  }
 0x38d   :  { %3354 = vmatpush2.bf16.msra.mxu1 %v6478_v62  ;;  %3397 = vmatpush2.bf16.msra.mxu0 %v6481_v6  ;;  %v6550_v62 = vld [vmem:[#allocation5 + $0x6d0] ss:$8 sps:$4 sm:$0xff]  }
 0x38e   :  { %3355 = vmatprep.subr.bf16.mxu1 %v6486_v0  ;;  %3398 = vmatprep.subr.bf16.mxu0 %v6489_v20  ;;  %v6553_v6 = vld [vmem:[#allocation5 + $0x7d0] ss:$8 sps:$4 sm:$0xff]   ;;  %v6558_v0 = vld [vmem:[#allocation5 + $0x6c4] ss:$8 sps:$4 sm:$0xff]  }
 0x38f   :  { %v6561_v20 = vld [vmem:[#allocation5 + $0x7c4] ss:$8 sps:$4 sm:$0xff]  }
 0x391   :  { %3356 = vmatpush2.bf16.msra.mxu1 %v6484_v2  ;;  %3399 = vmatpush2.bf16.msra.mxu0 %v6487_v34  ;;  %v6556_v2 = vld [vmem:[#allocation5 + $0x6c0] ss:$8 sps:$4 sm:$0xff]  }
 0x392   :  { %3992 = vmatprep.subr.bf16.mxu1 %v6492_v37  ;;  %4035 = vmatprep.subr.bf16.mxu0 %v6495_v7  ;;  %v6559_v34 = vld [vmem:[#allocation5 + $0x7c0] ss:$8 sps:$4 sm:$0xff]   ;;  %v6564_v37 = vld [vmem:[#allocation5 + $0x6b4] ss:$8 sps:$4 sm:$0xff]  }
 0x393   :  { %v6567_v7 = vld [vmem:[#allocation5 + $0x7b4] ss:$8 sps:$4 sm:$0xff]  }
 0x394   :  { %3358 = vmatmul.mubr.bf16.vlgmr.msra.gmra.mxu1 %v1973_v3  ;;  %3401 = vmatmul.mubr.bf16.vlgmr.msra.gmra.mxu0 %v1975_v10  ;;  %v6562_v10 = vld [vmem:[#allocation5 + $0x6b0] ss:$8 sps:$4 sm:$0xff]   ;;  %v6573_v3 = vld [vmem:[#allocation5 + $0x7a4] ss:$8 sps:$4 sm:$0xff]  }
 0x395   :  { %3993 = vmatpush1.bf16.msra.mxu1 %v6490_v16  ;;  %4024 = vmatprep.mubr.bf16.mxu1 %v1978_v47  ;;  %v6519_v47 = vld [vmem:[#allocation5 + $0x734] ss:$8 sps:$4 sm:$0xff]   ;;  %v6570_v16 = vld [vmem:[#allocation5 + $0x6a4] ss:$8 sps:$4 sm:$0xff]  }
 0x396   :  { %4036 = vmatpush1.bf16.msra.mxu0 %v6493_v14  ;;  %3994 = vmatprep.subr.bf16.mxu1 %v6498_v43  ;;  %v6568_v14 = vld [vmem:[#allocation5 + $0x6a0] ss:$8 sps:$4 sm:$0xff]  }
 0x397   :  { %4037 = vmatprep.subr.bf16.mxu0 %v6501_v24  ;;  %4067 = vmatprep.mubr.bf16.mxu0 %v1980_v41  ;;  %v6571_v43 = vld [vmem:[#allocation5 + $0x7a0] ss:$8 sps:$4 sm:$0xff]   ;;  %v6576_v24 = vld [vmem:[#allocation5 + $0x694] ss:$8 sps:$4 sm:$0xff]  }
 0x398   :  { %v6579_v41 = vld [vmem:[#allocation5 + $0x794] ss:$8 sps:$4 sm:$0xff]  }
 0x399   :  { %3995 = vmatpush1.bf16.msra.mxu1 %v6496_v4  ;;  %v6574_v4 = vld [vmem:[#allocation5 + $0x690] ss:$8 sps:$4 sm:$0xff]  }
 0x39a   :  { %4038 = vmatpush1.bf16.msra.mxu0 %v6499_v26  ;;  %3996 = vmatprep.subr.bf16.mxu1 %v6504_v22  ;;  %v6577_v26 = vld [vmem:[#allocation5 + $0x790] ss:$8 sps:$4 sm:$0xff]   ;;  %v6582_v22 = vld [vmem:[#allocation5 + $0x684] ss:$8 sps:$4 sm:$0xff]  }
 0x39b   :  { %4039 = vmatprep.subr.bf16.mxu0 %v6507_v13  ;;  %v6585_v13 = vld [vmem:[#allocation5 + $0x784] ss:$8 sps:$4 sm:$0xff]  }
 0x39d   :  { %3997 = vmatpush1.bf16.msra.mxu1 %v6502_v5  ;;  %v6580_v5 = vld [vmem:[#allocation5 + $0x680] ss:$8 sps:$4 sm:$0xff]  }
 0x39e   :  { %4040 = vmatpush1.bf16.msra.mxu0 %v6505_v49  ;;  %3998 = vmatprep.subr.bf16.mxu1 %v6510_v23  ;;  %v6583_v49 = vld [vmem:[#allocation5 + $0x780] ss:$8 sps:$4 sm:$0xff]   ;;  %v6588_v23 = vld [vmem:[#allocation5 + $0x874] ss:$8 sps:$4 sm:$0xff]  }
 0x39f   :  { %4041 = vmatprep.subr.bf16.mxu0 %v6513_v25  ;;  %v1962_v25 = vpop.f32.mrf.mxu0 }
 0x3a1   :  { %3999 = vmatpush1.bf16.msra.mxu1 %v6508_v36  ;;  %v6586_v36 = vld [vmem:[#allocation5 + $0x870] ss:$8 sps:$4 sm:$0xff]  }
 0x3a2   :  { %4042 = vmatpush1.bf16.msra.mxu0 %v6511_v38  ;;  %4000 = vmatprep.subr.bf16.mxu1 %v6516_v32  ;;  %v1982_v38 = vpack.c.bf16 %v1962_v25, %v7202_v40  ;;  %v6591_v32 = vld [vmem:[#allocation5 + $0x864] ss:$8 sps:$4 sm:$0xff]  }
 0x3a3   :  { %4043 = vmatprep.subr.bf16.mxu0 %v6519_v47  ;;  %v6589_v47 = vld [vmem:[#allocation5 + $0x860] ss:$8 sps:$4 sm:$0xff]   ;;  %v6597_v40 = vld [vmem:[#allocation5 + $0x844] ss:$8 sps:$4 sm:$0xff]  }
 0x3a5   :  { %4001 = vmatpush1.bf16.msra.mxu1 %v6514_v8  ;;  %v6594_v8 = vld [vmem:[#allocation5 + $0x854] ss:$8 sps:$4 sm:$0xff]  }
 0x3a6   :  { %4044 = vmatpush1.bf16.msra.mxu0 %v6517_v33  ;;  %4002 = vmatprep.subr.bf16.mxu1 %v6522_v46  ;;  %v6592_v33 = vld [vmem:[#allocation5 + $0x850] ss:$8 sps:$4 sm:$0xff]   ;;  %v6595_v46 = vld [vmem:[#allocation5 + $0x840] ss:$8 sps:$4 sm:$0xff]  }
 0x3a7   :  { %4045 = vmatprep.subr.bf16.mxu0 %v6525_v39  ;;  %v6609_v39 = vld [vmem:[#allocation5 + $0x804] ss:$8 sps:$4 sm:$0xff]  }
 0x3a9   :  { %4003 = vmatpush1.bf16.msra.mxu1 %v6520_v11  ;;  %v6607_v11 = vld [vmem:[#allocation5 + $0x800] ss:$8 sps:$4 sm:$0xff]  }
 0x3aa   :  { %4046 = vmatpush1.bf16.msra.mxu0 %v6523_v12  ;;  %4004 = vmatprep.subr.bf16.mxu1 %v6528_v51  ;;  %v6612_v12 = vld [vmem:[#allocation5 + $0x8f4] ss:$8 sps:$4 sm:$0xff]   ;;  %v6610_v51 = vld [vmem:[#allocation5 + $0x8f0] ss:$8 sps:$4 sm:$0xff]  }
 0x3ab   :  { %4047 = vmatprep.subr.bf16.mxu0 %v6531_v50  ;;  %v6615_v50 = vld [vmem:[#allocation5 + $0x8e4] ss:$8 sps:$4 sm:$0xff]  }
 0x3ad   :  { %4005 = vmatpush1.bf16.msra.mxu1 %v6526_v53  ;;  %v6613_v53 = vld [vmem:[#allocation5 + $0x8e0] ss:$8 sps:$4 sm:$0xff]  }
 0x3ae   :  { %4048 = vmatpush1.bf16.msra.mxu0 %v6529_v55  ;;  %4006 = vmatprep.subr.bf16.mxu1 %v6534_v56  ;;  %v6618_v55 = vld [vmem:[#allocation5 + $0x8d4] ss:$8 sps:$4 sm:$0xff]   ;;  %v6616_v56 = vld [vmem:[#allocation5 + $0x8d0] ss:$8 sps:$4 sm:$0xff]  }
 0x3af   :  { %4049 = vmatprep.subr.bf16.mxu0 %v6537_v59  ;;  %v6621_v59 = vld [vmem:[#allocation5 + $0x8c4] ss:$8 sps:$4 sm:$0xff]  }
 0x3b1   :  { %4007 = vmatpush1.bf16.msra.mxu1 %v6532_v15  ;;  %v6619_v15 = vld [vmem:[#allocation5 + $0x8c0] ss:$8 sps:$4 sm:$0xff]  }
 0x3b2   :  { %4050 = vmatpush1.bf16.msra.mxu0 %v6535_v44  ;;  %4008 = vmatprep.subr.bf16.mxu1 %v6540_v45  ;;  %v6624_v44 = vld [vmem:[#allocation5 + $0x8b4] ss:$8 sps:$4 sm:$0xff]   ;;  %v6622_v45 = vld [vmem:[#allocation5 + $0x8b0] ss:$8 sps:$4 sm:$0xff]  }
 0x3b3   :  { %4051 = vmatprep.subr.bf16.mxu0 %v6543_v52  ;;  %v6627_v52 = vld [vmem:[#allocation5 + $0x8a4] ss:$8 sps:$4 sm:$0xff]  }
 0x3b5   :  { %4009 = vmatpush2.bf16.msra.mxu1 %v6538_v58  ;;  %v6625_v58 = vld [vmem:[#allocation5 + $0x8a0] ss:$8 sps:$4 sm:$0xff]  }
 0x3b6   :  { %4052 = vmatpush2.bf16.msra.mxu0 %v6541_v61  ;;  %4010 = vmatprep.subr.bf16.mxu1 %v6546_v19  ;;  %v6630_v61 = vld [vmem:[#allocation5 + $0x894] ss:$8 sps:$4 sm:$0xff]   ;;  %v6628_v19 = vld [vmem:[#allocation5 + $0x890] ss:$8 sps:$4 sm:$0xff]  }
 0x3b7   :  { %4053 = vmatprep.subr.bf16.mxu0 %v6549_v17  ;;  %v6633_v17 = vld [vmem:[#allocation5 + $0x884] ss:$8 sps:$4 sm:$0xff]  }
 0x3b9   :  { %4011 = vmatpush2.bf16.msra.mxu1 %v6544_v35  ;;  %v6631_v35 = vld [vmem:[#allocation5 + $0x880] ss:$8 sps:$4 sm:$0xff]  }
 0x3ba   :  { %4054 = vmatpush2.bf16.msra.mxu0 %v6547_v57  ;;  %4012 = vmatprep.subr.bf16.mxu1 %v6552_v42 }
 0x3bb   :  { %4055 = vmatprep.subr.bf16.mxu0 %v6555_v60 }
 0x3bd   :  { %4013 = vmatpush2.bf16.msra.mxu1 %v6550_v62 }
 0x3be   :  { %4056 = vmatpush2.bf16.msra.mxu0 %v6553_v6  ;;  %4014 = vmatprep.subr.bf16.mxu1 %v6558_v0 }
 0x3bf   :  { %4057 = vmatprep.subr.bf16.mxu0 %v6561_v20 }
 0x3c1   :  { %4015 = vmatpush2.bf16.msra.mxu1 %v6556_v2 }
 0x3c2   :  { %4058 = vmatpush2.bf16.msra.mxu0 %v6559_v34  ;;  %4016 = vmatprep.subr.bf16.mxu1 %v6564_v37 }
 0x3c3   :  { %4059 = vmatprep.subr.bf16.mxu0 %v6567_v7 }
 0x3c5   :  { %4017 = vmatpush2.bf16.msra.mxu1 %v6562_v10 }
 0x3c6   :  { %4060 = vmatpush2.bf16.msra.mxu0 %v6565_v1  ;;  %4018 = vmatprep.subr.bf16.mxu1 %v6570_v16 }
 0x3c7   :  { %4061 = vmatprep.subr.bf16.mxu0 %v6573_v3 }
 0x3c9   :  { %4019 = vmatpush2.bf16.msra.mxu1 %v6568_v14 }
 0x3ca   :  { %4062 = vmatpush2.bf16.msra.mxu0 %v6571_v43  ;;  %4020 = vmatprep.subr.bf16.mxu1 %v6576_v24 }
 0x3cb   :  { %4063 = vmatprep.subr.bf16.mxu0 %v6579_v41 }
 0x3cd   :  { %4021 = vmatpush2.bf16.msra.mxu1 %v6574_v4 }
 0x3ce   :  { %4064 = vmatpush2.bf16.msra.mxu0 %v6577_v26  ;;  %4022 = vmatprep.subr.bf16.mxu1 %v6582_v22 }
 0x3cf   :  { %4065 = vmatprep.subr.bf16.mxu0 %v6585_v13 }
 0x3d1   :  { %4023 = vmatpush2.bf16.msra.mxu1 %v6580_v5 }
 0x3d2   :  { %4066 = vmatpush2.bf16.msra.mxu0 %v6583_v49  ;;  %4078 = vmatprep.subr.bf16.mxu1 %v6588_v23 }
 0x3d4   :  { %4025 = vmatmul.mubr.bf16.vlgmr.msra.gmra.mxu1 %v1977_v29  ;;  %v6603_v29 = vld [vmem:[#allocation5 + $0x824] ss:$8 sps:$4 sm:$0xff]   ;;  %v2595_v57 = vpop.f32.mrf.mxu1  ;;  %v2638_v42 = vpop.f32.mrf.mxu0 }
 0x3d5   :  { %4068 = vmatmul.mubr.bf16.vlgmr.msra.gmra.mxu0 %v1979_v28  ;;  %4079 = vmatpush1.bf16.msra.mxu1 %v6586_v36  ;;  %v6604_v28 = vld [vmem:[#allocation5 + $0x810] ss:$8 sps:$4 sm:$0xff]   ;;  %v1984_v36 = vld [vmem:[#allocation8 + $0x1] ss:$4 sm:$0x3] }
 0x3d6   :  { %4080 = vmatprep.subr.bf16.mxu1 %v6591_v32  ;;  %4110 = vmatprep.mubr.bf16.mxu1 %v1982_v38  ;;  %v2597_v60 = vpop.f32.mrf.mxu1  ;;  %v2640_v62 = vpop.f32.mrf.mxu0  ;;  %v7411_v32 = vsub.s32 1, %v7024_v9 }
 0x3d7   :  { %4194 = vmatprep.mubr.bf16.mxu0 %v7400_v63  ;;  %v2641_v25 = vadd.f32 %v2640_v62, %v2597_v60 }
 0x3d8   :  { %v2599_v6 = vpop.f32.mrf.mxu1  ;;  %v2642_v0 = vpop.f32.mrf.mxu0 }
 0x3d9   :  { %4081 = vmatpush1.bf16.msra.mxu1 %v6589_v47  ;;  %v2643_v38 = vadd.f32 %v2642_v0, %v2599_v6  ;;  %v2698_v47 = vrot.slane %v1984_v36, %v7411_v32  ;;  %v6646_v32 = vld [vmem:[#allocation7 + $0x18] sm:$0xff]  }
 0x3da   :  { %4082 = vmatprep.subr.bf16.mxu1 %v6594_v8  ;;  %v2601_v20 = vpop.f32.mrf.mxu1  ;;  %v2644_v34 = vpop.f32.mrf.mxu0 }
 0x3dd   :  { %4083 = vmatpush1.bf16.msra.mxu1 %v6592_v33 }
 0x3de   :  { %4084 = vmatprep.subr.bf16.mxu1 %v6597_v40  ;;  %v2639_v40 = vadd.f32 %v2638_v42, %v2595_v57 }
 0x3e1   :  { %4085 = vmatpush1.bf16.msra.mxu1 %v6595_v46  ;;  %v2645_v46 = vadd.f32 %v2644_v34, %v2601_v20 }
 0x3e2   :  { %4086 = vmatprep.subr.bf16.mxu1 %v6600_v27 }
 0x3e5   :  { %4087 = vmatpush1.bf16.msra.mxu1 %v6598_v31 }
 0x3e6   :  { %4088 = vmatprep.subr.bf16.mxu1 %v6603_v29 }
 0x3e9   :  { %4089 = vmatpush1.bf16.msra.mxu1 %v6601_v30 }
 0x3ea   :  { %4090 = vmatprep.subr.bf16.mxu1 %v6606_v18 }
 0x3ed   :  { %4091 = vmatpush1.bf16.msra.mxu1 %v6604_v28 }
 0x3ee   :  { %4092 = vmatprep.subr.bf16.mxu1 %v6609_v39 }
 0x3f1   :  { %4093 = vmatpush1.bf16.msra.mxu1 %v6607_v11  ;;  %v7412_v11 = vsub.s32 0, %v7024_v9 }
 0x3f2   :  { %4094 = vmatprep.subr.bf16.mxu1 %v6612_v12 }
 0x3f3   :  { %v2694_v12 = vrot.slane %v1984_v36, %v7412_v11  ;;  %v6645_v36 = vld [vmem:[#allocation7 + $0x58] sm:$0xff]   ;;  %v6663_v11 = vld [vmem:[#allocation7 + $0x160] sm:$0xff]  }
 0x3f5   :  { %4095 = vmatpush2.bf16.msra.mxu1 %v6610_v51 }
 0x3f6   :  { %4096 = vmatprep.subr.bf16.mxu1 %v6615_v50 }
 0x3f9   :  { %4097 = vmatpush2.bf16.msra.mxu1 %v6613_v53 }
 0x3fa   :  { %4098 = vmatprep.subr.bf16.mxu1 %v6618_v55 }
 0x3fd   :  { %4099 = vmatpush2.bf16.msra.mxu1 %v6616_v56 }
 0x3fe   :  { %4100 = vmatprep.subr.bf16.mxu1 %v6621_v59 }
 0x401   :  { %4101 = vmatpush2.bf16.msra.mxu1 %v6619_v15 }
 0x402   :  { %4102 = vmatprep.subr.bf16.mxu1 %v6624_v44 }
 0x405   :  { %4103 = vmatpush2.bf16.msra.mxu1 %v6622_v45 }
 0x406   :  { %4104 = vmatprep.subr.bf16.mxu1 %v6627_v52 }
 0x409   :  { %4105 = vmatpush2.bf16.msra.mxu1 %v6625_v58 }
 0x40a   :  { %4106 = vmatprep.subr.bf16.mxu1 %v6630_v61 }
 0x40d   :  { %4107 = vmatpush2.bf16.msra.mxu1 %v6628_v19 }
 0x40e   :  { %4108 = vmatprep.subr.bf16.mxu1 %v6633_v17 }
 0x411   :  { %4109 = vmatpush2.bf16.msra.mxu1 %v6631_v35 }
 0x414   :  { %4111 = vmatmul.mubr.bf16.vlgmr.msra.gmra.mxu1 %v1981_v54  ;;  %v2681_v2 = vpop.f32.mrf.mxu1  ;;  %v3316_v37 = vpop.f32.mrf.mxu0 }
 0x415   :  { %v2682_v39 = vadd.f32 %v2681_v2, %v2639_v40  ;;  %v6649_v40 = vld [vmem:[#allocation7 + $0x48] sm:$0xff]  }
 0x416   :  { %v2683_v7 = vpop.f32.mrf.mxu1  ;;  %v3318_v10 = vpop.f32.mrf.mxu0 }
 0x417   :  { %v2684_v27 = vadd.f32 %v2683_v7, %v2641_v25  ;;  %v2701_v35 = vadd.f32 %v2694_v12, %v2682_v39  ;;  %v6644_v25 = vld [vmem:[#allocation7 + $0x20] sm:$0xff]   ;;  %v6657_v39 = vld [vmem:[#allocation7 + $0xf8] sm:$0xff]  }
 0x418   :  { %v2685_v1 = vpop.f32.mrf.mxu1  ;;  %v3320_v16 = vpop.f32.mrf.mxu0 }
 0x419   :  { %v2686_v18 = vadd.f32 %v2685_v1, %v2643_v38  ;;  %v2702_v59 = vadd.f32 %v2698_v47, %v2684_v27  ;;  %v6636_v38 = vld [vmem:[%s7380_s5 + $0x10] sm:$0xff]  }
 0x41a   :  { %v2687_v3 = vpop.f32.mrf.mxu1  ;;  %v3322_v43 = vpop.f32.mrf.mxu0  ;;  %v6655_v27 = vld [vmem:[#allocation7 + $0x170] sm:$0xff]  }
 0x41b   :  { %v2688_v51 = vadd.f32 %v2687_v3, %v2645_v46  ;;  %v2703_v58 = vadd.f32 %v2694_v12, %v2686_v18  ;;  %v6650_v46 = vld [vmem:[#allocation7 + $0x8] sm:$0xff]   ;;  %v6664_v12 = vld [vmem:[#allocation7 + $0x120] sm:$0xff]  }
 0x41c   :  { %v6659_v18 = vld [vmem:[#allocation7 + $0x168] sm:$0xff]  }
 0x41d   :  { %v2704_v57 = vadd.f32 %v2698_v47, %v2688_v51  ;;  %v6647_v47 = vld [vmem:[#allocation7 + $0x50] sm:$0xff]   ;;  %v6667_v51 = vld [vmem:[#allocation7 + $0x158] sm:$0xff]  }
 0x454   :  { %v3359_v14 = vpop.f32.mrf.mxu1  ;;  %v3402_v48 = vpop.f32.mrf.mxu0 }
 0x455   :  { %v3360_v31 = vadd.f32 %v3359_v14, %v3316_v37 }
 0x456   :  { %v3361_v24 = vpop.f32.mrf.mxu1  ;;  %v3404_v54 = vpop.f32.mrf.mxu0 }
 0x457   :  { %v3362_v8 = vadd.f32 %v3361_v24, %v3318_v10  ;;  %v3403_v15 = vadd.f32 %v3402_v48, %v3360_v31  ;;  %v6656_v31 = vld [vmem:[#allocation7 + $0x130] sm:$0xff]  }
 0x458   :  { %v3363_v21 = vpop.f32.mrf.mxu1  ;;  %v3406_v4 = vpop.f32.mrf.mxu0 }
 0x459   :  { %v3364_v33 = vadd.f32 %v3363_v21, %v3320_v16  ;;  %v3405_v53 = vadd.f32 %v3404_v54, %v3362_v8  ;;  %v3411_v20 = vadd.f32 %v3403_v15, %v2701_v35  ;;  %v6637_v21 = vld [vmem:[#allocation7 + $0x78] sm:$0xff]   ;;  %v6648_v8 = vld [vmem:[#allocation7 + $0x10] sm:$0xff]   ;;  %v6679_v15 = vld [vmem:[#allocation7 + $0x140] sm:$0xff]  }
 0x45a   :  { %v3365_v41 = vpop.f32.mrf.mxu1  ;;  %v3408_v22 = vpop.f32.mrf.mxu0 }
 0x45b   :  { %v3366_v28 = vadd.f32 %v3365_v41, %v3322_v43  ;;  %v3407_v55 = vadd.f32 %v3406_v4, %v3364_v33  ;;  %v3412_v9 = vadd.f32 %v3405_v53, %v2702_v59  ;;  %v6634_v41 = vld [vmem:[%s7380_s5] sm:$0xff]   ;;  %v6638_v4 = vld [vmem:[#allocation7 + $0x38] sm:$0xff]   ;;  %v6671_v53 = vld [vmem:[#allocation7 + $0x150] sm:$0xff]  }
 0x45c   :  { %v6651_v33 = vld [vmem:[#allocation7 + $0x178] sm:$0xff]   ;;  %v6676_v59 = vld [vmem:[#allocation7 + $0x108] sm:$0xff]  }
 0x45d   :  { %v3409_v61 = vadd.f32 %v3408_v22, %v3366_v28  ;;  %v3413_v62 = vadd.f32 %v3407_v55, %v2703_v58  ;;  %v6640_v22 = vld [vmem:[#allocation7 + $0x30] sm:$0xff]   ;;  %5815 = vmatprep.subr.bf16.mxu1 %v6651_v33  ;;  %v6660_v28 = vld [vmem:[#allocation7 + $0x128] sm:$0xff]  }
 0x45e   :  { %v6672_v55 = vld [vmem:[#allocation7 + $0x110] sm:$0xff]  }
 0x45f   :  { %v3414_v34 = vadd.f32 %v3409_v61, %v2704_v57  ;;  %v6661_v57 = vld [vmem:[#allocation7 + $0xf0] sm:$0xff]  }
 0x494   :  { %v4026_v26 = vpop.f32.mrf.mxu1 }
 0x495   :  { %v4069_v13 = vpop.f32.mrf.mxu0 }
 0x496   :  { %v4028_v5 = vpop.f32.mrf.mxu1  ;;  %v4070_v44 = vadd.f32 %v4069_v13, %v4026_v26  ;;  %v6639_v26 = vld [vmem:[#allocation7 + $0x70] sm:$0xff]   ;;  %v6641_v13 = vld [vmem:[#allocation7 + $0x68] sm:$0xff]  }
 0x497   :  { %v4071_v49 = vpop.f32.mrf.mxu0 }
 0x498   :  { %v4030_v23 = vpop.f32.mrf.mxu1  ;;  %v4072_v56 = vadd.f32 %v4071_v49, %v4028_v5  ;;  %v6635_v5 = vld [vmem:[%s7380_s5 + $0x8] sm:$0xff]  }
 0x499   :  { %v4073_v29 = vpop.f32.mrf.mxu0  ;;  %v6642_v49 = vld [vmem:[#allocation7 + $0x28] sm:$0xff]  }
 0x49a   :  { %v4032_v30 = vpop.f32.mrf.mxu1  ;;  %v4074_v19 = vadd.f32 %v4073_v29, %v4030_v23  ;;  %v6643_v23 = vld [vmem:[#allocation7 + $0x60] sm:$0xff]  }
 0x49b   :  { %v4075_v45 = vpop.f32.mrf.mxu0  ;;  %v6653_v29 = vld [vmem:[#allocation7 + $0x40] sm:$0xff]  }
 0x49c   :  { %v4076_v6 = vadd.f32 %v4075_v45, %v4032_v30  ;;  %v6654_v30 = vld [vmem:[#allocation7] sm:$0xff]  }
 0x4d4   :  { %v4112_v50 = vpop.f32.mrf.mxu1 }
 0x4d5   :  { %v4113_v42 = vadd.f32 %v4112_v50, %v4070_v44  ;;  %v6668_v50 = vld [vmem:[#allocation7 + $0x118] sm:$0xff]   ;;  %v6680_v44 = vld [vmem:[#allocation7 + $0x100] sm:$0xff]  }
 0x4d6   :  { %v4114_v52 = vpop.f32.mrf.mxu1 }
 0x4d7   :  { %v4115_v17 = vadd.f32 %v4114_v52, %v4072_v56  ;;  %v4121_v1 = vadd.f32 %v4113_v42, %v3411_v20  ;;  %v6675_v56 = vld [vmem:[#allocation7 + $0x148] sm:$0xff]  }
 0x4d8   :  { %v4116_v60 = vpop.f32.mrf.mxu1  ;;  %v6666_v20 = vld [vmem:[#allocation7 + $0xa8] sm:$0xff]  }
 0x4d9   :  { %v4117_v0 = vadd.f32 %v4116_v60, %v4074_v19  ;;  %v4122_v37 = vadd.f32 %v4115_v17, %v3412_v9  ;;  %v4125_v24 = vmax.f32 %v4121_v1, 0.0  ;;  %v6658_v17 = vld [vmem:[#allocation7 + $0xb8] sm:$0xff]   ;;  %v6662_v9 = vld [vmem:[#allocation7 + $0xb0] sm:$0xff]  }
 0x4da   :  { %v4118_v2 = vpop.f32.mrf.mxu1  ;;  %v6673_v1 = vld [vmem:[#allocation7 + $0xd8] sm:$0xff]  }
 0x4db   :  { %v4123_v7 = vadd.f32 %v4117_v0, %v3413_v62  ;;  %v4119_v10 = vadd.f32 %v4118_v2, %v4076_v6  ;;  %v4126_v14 = vmax.f32 %v4122_v37, 0.0  ;;  %v6665_v62 = vld [vmem:[#allocation7 + $0xe8] sm:$0xff]  }
 0x4dd   :  { %v4124_v16 = vadd.f32 %v4119_v10, %v3414_v34  ;;  %v4127_v3 = vmax.f32 %v4123_v7, 0.0  ;;  %v6669_v34 = vld [vmem:[#allocation7 + $0xe0] sm:$0xff]  }
 0x4de   :  { %v6670_v10 = vld [vmem:[#allocation7 + $0xa0] sm:$0xff]  }
 0x4df   :  { %v4128_v43 = vmax.f32 %v4124_v16, 0.0  ;;  %v4129_v54 = vpack.c.bf16 %v4127_v3, %v4125_v24 }
 0x4e1   :  { %v4130_v48 = vpack.c.bf16 %v4128_v43, %v4126_v14  ;;  %v6674_v43 = vld [vmem:[#allocation7 + $0x98] sm:$0xff]  }
 0x4e3   :  { %4176 = vmatprep.subr.bf16.mxu0 %v4130_v48  ;;  %v6677_v48 = vld [vmem:[#allocation7 + $0xd0] sm:$0xff]  }
 0x4e4   :  { %4177 = vmatpush1.bf16.msra.mxu0 %v4129_v54  ;;  %v6681_v54 = vld [vmem:[#allocation7 + $0xc8] sm:$0xff]  }
 0x4e5   :  { %5771 = vmatprep.subr.bf16.mxu0 %v6637_v21  ;;  %v6678_v21 = vld [vmem:[#allocation7 + $0x90] sm:$0xff]  }
 0x4e7   :  { %5647 = vmatmul.mubr.msk.bf16.vlgmr.msra.gmra.mxu0 %vm4152_vm2, %v6634_v41  ;;  %v6682_v41 = vld [vmem:[#allocation7 + $0x88] sm:$0xff]  }
 0x4e8   :  { %4204 = vmatprep.mubr.bf16.mxu0 %v7400_v63  ;;  %5772 = vmatpush3.bf16.msra.mxu0 %v6638_v4  ;;  %v6683_v4 = vld [vmem:[#allocation7 + $0xc0] sm:$0xff]  }
 0x4e9   :  { %5773 = vmatprep.subr.bf16.mxu0 %v6639_v26  ;;  %v6684_v26 = vld [vmem:[#allocation7 + $0x80] sm:$0xff]  }
 0x4ec   :  { %5774 = vmatpush3.bf16.msra.mxu0 %v6640_v22 }
 0x4ed   :  { %5775 = vmatprep.subr.bf16.mxu0 %v6641_v13  ;;  %v6831_v13 = vmov 0.0  }
 0x4ef   :  { %5648 = vmatmul.mubr.msk.bf16.gmra.mxu0 %vm4152_vm2, %v6635_v5  ;;  %v6691_v5 = vld [vmem:[%s7383_s8 + $0x78] sm:$0xff]  }
 0x4f0   :  { %4214 = vmatprep.mubr.bf16.mxu0 %v7400_v63  ;;  %5776 = vmatpush3.bf16.msra.mxu0 %v6642_v49  ;;  %v6652_v63 = vld [vmem:[#allocation7 + $0x138] sm:$0xff]   ;;  %v6693_v49 = vld [vmem:[%s7383_s8 + $0x70] sm:$0xff]  }
 0x4f1   :  { %5777 = vmatprep.subr.bf16.mxu0 %v6643_v23  ;;  %5816 = vmatpush3.bf16.msra.mxu1 %v6652_v63  ;;  %v6695_v23 = vld [vmem:[%s7383_s8 + $0x68] sm:$0xff]  }
 0x4f2   :  { %5817 = vmatprep.subr.bf16.mxu1 %v6655_v27 }
 0x4f4   :  { %5778 = vmatpush3.bf16.msra.mxu0 %v6644_v25  ;;  %v6697_v25 = vld [vmem:[%s7383_s8 + $0x60] sm:$0xff]  }
 0x4f5   :  { %5779 = vmatprep.subr.bf16.mxu0 %v6645_v36  ;;  %5818 = vmatpush3.bf16.msra.mxu1 %v6656_v31 }
 0x4f6   :  { %5819 = vmatprep.subr.bf16.mxu1 %v6659_v18 }
 0x4f7   :  { %5649 = vmatmul.mubr.msk.bf16.gmra.mxu0 %vm4152_vm2, %v6636_v38 }
 0x4f8   :  { %5780 = vmatpush3.bf16.msra.mxu0 %v6646_v32 }
 0x4f9   :  { %5781 = vmatprep.subr.bf16.mxu0 %v6647_v47  ;;  %5820 = vmatpush3.bf16.msra.mxu1 %v6660_v28 }
 0x4fa   :  { %5821 = vmatprep.subr.bf16.mxu1 %v6663_v11 }
 0x4fc   :  { %5782 = vmatpush3.bf16.msra.mxu0 %v6648_v8 }
 0x4fd   :  { %5783 = vmatprep.subr.bf16.mxu0 %v6649_v40  ;;  %5822 = vmatpush3.bf16.msra.mxu1 %v6664_v12  ;;  %v5666_v40 = vld [vmem:[#allocation8 + $0x2] ss:$0 sm:$0xff] }
 0x4fe   :  { %5823 = vmatprep.subr.bf16.mxu1 %v6667_v51 }
 0x500   :  { %5784 = vmatpush3.bf16.msra.mxu0 %v6650_v46 }
 0x501   :  { %5785 = vmatprep.subr.bf16.mxu0 %v6653_v29  ;;  %5824 = vmatpush3.bf16.msra.mxu1 %v6668_v50 }
 0x502   :  { %5825 = vmatprep.subr.bf16.mxu1 %v6671_v53 }
 0x504   :  { %5786 = vmatpush3.bf16.msra.mxu0 %v6654_v30 }
 0x505   :  { %5793 = vmatprep.subr.bf16.mxu0 %v6657_v39  ;;  %5826 = vmatpush3.bf16.msra.mxu1 %v6672_v55 }
 0x506   :  { %5827 = vmatprep.subr.bf16.mxu1 %v6675_v56 }
 0x509   :  { %5828 = vmatpush3.bf16.msra.mxu1 %v6676_v59 }
 0x50a   :  { %5829 = vmatprep.subr.bf16.mxu1 %v6679_v15 }
 0x50d   :  { %5830 = vmatpush3.bf16.msra.mxu1 %v6680_v44 }
 0x50e   :  { %5920 = vmatprep.subr.bf16.mxu1 %v6831_v13 }
 0x5a7   :  { %v4196_v45 = vpop.f32.mrf.mxu0 }
 0x5a9   :  { %v4198_v52 = vpop.f32.mrf.mxu0 }
 0x5ab   :  { %v4200_v58 = vpop.f32.mrf.mxu0 }
 0x5ac   :  { %v4225_v35 = vpack.c.bf16 %v4200_v58, %v4196_v45  ;;  %v6685_v58 = vld [vmem:[%s7382_s7] sm:$0xff]  }
 0x5ad   :  { %v4202_v61 = vpop.f32.mrf.mxu0 }
 0x5ae   :  { %v4226_v19 = vpack.c.bf16 %v4202_v61, %v4198_v52  ;;  %v6688_v61 = vld [vmem:[%s7383_s8 + $0x38] sm:$0xff]  }
 0x5af   :  { %v4206_v42 = vpop.f32.mrf.mxu0 }
 0x5b0   :  { %4392 = vmatprep.mubr.bf16.mxu0 %v4226_v19  ;;  %v6689_v19 = vld [vmem:[%s7383_s8 + $0x30] sm:$0xff]  }
 0x5b1   :  { %4393 = vmatmul.mubr.bf16.vlgmr.msra.gmra.mxu0 %v4225_v35  ;;  %v4208_v60 = vpop.f32.mrf.mxu0  ;;  %v6690_v35 = vld [vmem:[%s7383_s8 + $0x28] sm:$0xff]  }
 0x5b2   :  { %5794 = vmatpush3.bf16.msra.mxu0 %v6658_v17  ;;  %v6686_v17 = vld [vmem:[%s7382_s7 + $0x8] sm:$0xff]  }
 0x5b3   :  { %5795 = vmatprep.subr.bf16.mxu0 %v6661_v57  ;;  %v4210_v6 = vpop.f32.mrf.mxu0  ;;  %v6692_v57 = vld [vmem:[%s7383_s8 + $0x20] sm:$0xff]  }
 0x5b4   :  { %v4227_v22 = vpack.c.bf16 %v4210_v6, %v4206_v42  ;;  %v6687_v42 = vld [vmem:[%s7382_s7 + $0x10] sm:$0xff]   ;;  %v6699_v6 = vld [vmem:[%s7383_s8 + $0x58] sm:$0xff]   ;;  %s5174_s7 = sshll.u32 %s6833_s6, 4  ;;  %s5175_s7 = int_to_ptr.vmem [resolvable:$true] %s5174_s7 }
 0x5b5   :  { %v4212_v0 = vpop.f32.mrf.mxu0  ;;  %p6797_p7 = scmp.lt.s32.totalorder %s5175_s7, %s5175_s7 }
 0x5b6   :  { %5796 = vmatpush3.bf16.msra.mxu0 %v6662_v9  ;;  %v4228_v2 = vpack.c.bf16 %v4212_v0, %v4208_v60  ;;  %v6694_v60 = vld [vmem:[%s7383_s8 + $0x18] sm:$0xff]   ;;  %v6696_v9 = vld [vmem:[%s7383_s8 + $0x10] sm:$0xff]   ;;  %v6700_v0 = vld [vmem:[%s7383_s8] sm:$0xff]  }
 0x5b7   :  { %5797 = vmatprep.subr.bf16.mxu0 %v6665_v62  ;;  %v4216_v37 = vpop.f32.mrf.mxu0  ;;  %v6698_v62 = vld [vmem:[%s7383_s8 + $0x8] sm:$0xff]  }
 0x5b8   :  { %4568 = vmatprep.mubr.bf16.mxu0 %v4228_v2  ;;  %v6703_v2 = vld [vmem:[%s7383_s8 + $0x48] sm:$0xff]  }
 0x5b9   :  { %v4218_v7 = vpop.f32.mrf.mxu0 }
 0x5ba   :  { %5798 = vmatpush3.bf16.msra.mxu0 %v6666_v20  ;;  %v6701_v20 = vld [vmem:[%s7383_s8 + $0x50] sm:$0xff]  }
 0x5bb   :  { %5799 = vmatprep.subr.bf16.mxu0 %v6669_v34  ;;  %v4220_v16 = vpop.f32.mrf.mxu0  ;;  %v6705_v34 = vld [vmem:[%s7383_s8 + $0x40] sm:$0xff]  }
 0x5bc   :  { %v4229_v3 = vpack.c.bf16 %v4220_v16, %v4216_v37 }
 0x5bd   :  { %v4222_v14 = vpop.f32.mrf.mxu0 }
 0x5be   :  { %5800 = vmatpush3.bf16.msra.mxu0 %v6670_v10  ;;  %v4230_v24 = vpack.c.bf16 %v4222_v14, %v4218_v7 }
 0x5bf   :  { %5801 = vmatprep.subr.bf16.mxu0 %v6673_v1  ;;  %v6702_v1 = vld [vmem:[%s7383_s8 + $0xb8] sm:$0xff]  }
 0x5c0   :  { %4740 = vmatprep.mubr.bf16.mxu1 %v4230_v24 }
 0x5c1   :  { %4741 = vmatmul.mubr.bf16.vlgmr.msra.gmra.mxu1 %v4229_v3 }
 0x5c2   :  { %5802 = vmatpush3.bf16.msra.mxu0 %v6674_v43  ;;  %5936 = vmatprep.mubr.msk.bf16.mxu1 %vm6832_vm3, %v6831_v13  ;;  %v6704_v43 = vld [vmem:[%s7383_s8 + $0xb0] sm:$0xff]  }
 0x5c3   :  { %5803 = vmatprep.subr.bf16.mxu0 %v6677_v48  ;;  %5921 = vmatpush3.bf16.msra.mxu1 %v6691_v5  ;;  %v6708_v5 = vld [vmem:[%s7383_s8 + $0x98] sm:$0xff]  }
 0x5c4   :  { %5922 = vmatprep.subr.bf16.mxu1 %v6831_v13 }
 0x5c6   :  { %5804 = vmatpush3.bf16.msra.mxu0 %v6678_v21  ;;  %v6706_v21 = vld [vmem:[%s7383_s8 + $0xa8] sm:$0xff]  }
 0x5c7   :  { %5805 = vmatprep.subr.bf16.mxu0 %v6681_v54  ;;  %5923 = vmatpush3.bf16.msra.mxu1 %v6693_v49 }
 0x5c8   :  { %5924 = vmatprep.subr.bf16.mxu1 %v6831_v13 }
 0x5ca   :  { %5806 = vmatpush3.bf16.msra.mxu0 %v6682_v41 }
 0x5cb   :  { %5807 = vmatprep.subr.bf16.mxu0 %v6683_v4  ;;  %5925 = vmatpush3.bf16.msra.mxu1 %v6695_v23  ;;  %v6707_v4 = vld [vmem:[%s7383_s8 + $0xa0] sm:$0xff]  }
 0x5cc   :  { %5926 = vmatprep.subr.bf16.mxu1 %v6831_v13 }
 0x5ce   :  { %5808 = vmatpush3.bf16.msra.mxu0 %v6684_v26 }
 0x5cf   :  { %5886 = vmatprep.subr.bf16.mxu0 %v6831_v13  ;;  %5927 = vmatpush3.bf16.msra.mxu1 %v6697_v25  ;;  %v6709_v25 = vld [vmem:[%s7383_s8 + $0x90] sm:$0xff]  }
 0x5d0   :  { %5928 = vmatprep.subr.bf16.mxu1 %v6831_v13 }
 0x5d1   :  { %4569 = vmatmul.mubr.bf16.vlgmr.msra.gmra.mxu0 %v4227_v22 }
 0x5d2   :  { %5888 = vmatprep.mubr.msk.bf16.mxu0 %vm6832_vm3, %v6831_v13 }
 0x5d3   :  { %5929 = vmatpush3.bf16.msra.mxu1 %v6699_v6 }
 0x5d4   :  { %5930 = vmatprep.subr.bf16.mxu1 %v6831_v13 }
 0x5d7   :  { %5931 = vmatpush3.bf16.msra.mxu1 %v6701_v20 }
 0x5d8   :  { %5932 = vmatprep.subr.bf16.mxu1 %v6831_v13 }
 0x5db   :  { %5933 = vmatpush3.bf16.msra.mxu1 %v6703_v2 }
 0x5dc   :  { %5934 = vmatprep.subr.bf16.mxu1 %v6831_v13 }
 0x5df   :  { %5935 = vmatpush3.bf16.msra.mxu1 %v6705_v34 }
 0x671   :  { %v5787_v36 = vpop.f32.mrf.mxu0 }
 0x673   :  { %v5788_v38 = vpop.f32.mrf.mxu0 }
 0x674   :  { %v5789_v63 = vadd.f32 %v5788_v38, %v5787_v36  ;;  %v6710_v36 = vld [vmem:[%s7383_s8 + $0x88] sm:$0xff]   ;;  %v6711_v38 = vld [vmem:[%s7383_s8 + $0x80] sm:$0xff]   ;;  %s6792_s8 = scalar_lea.vmem %s5175_s7, 32 }
 0x675   :  { %v5790_v32 = vpop.f32.mrf.mxu0  ;;  %p6793_p6 = scmp.ne.s32.totalorder %s5175_s7, %s6792_s8  ;;  %p6798_p8 = scmp.lt.s32.totalorder %s6792_s8, %s6792_s8 }
 0x676   :  { %v4405_v29 = vadd.f32 %v5789_v63, %v5666_v40 }
 0x677   :  { %v5791_v8 = vpop.f32.mrf.mxu0  ;;  %p6799_p9 = por %p6798_p8, %p6797_p7 }
 0x678   :  { %v5792_v30 = vadd.f32 %v5791_v8, %v5790_v32 }
 0x679   :  { %p6800_p10 = pnand %p6799_p9, %p6793_p6 }
 0x67a   :  { %v4406_v51 = vadd.f32 %v5792_v30, %v5666_v40 }
 0x681   :  { %v5831_v47 = vpop.f32.mrf.mxu1 }
 0x683   :  { %v5832_v33 = vpop.f32.mrf.mxu1 }
 0x684   :  { %v5833_v50 = vadd.f32 %v5832_v33, %v5831_v47 }
 0x685   :  { %v5834_v27 = vpop.f32.mrf.mxu1 }
 0x687   :  { %v5835_v11 = vpop.f32.mrf.mxu1 }
 0x688   :  { %v5836_v55 = vadd.f32 %v5835_v11, %v5834_v27 }
 0x691   :  { %v5809_v46 = vpop.f32.mrf.mxu0 }
 0x693   :  { %v5810_v31 = vpop.f32.mrf.mxu0 }
 0x694   :  { %v5811_v18 = vadd.f32 %v5810_v31, %v5809_v46 }
 0x695   :  { %v5812_v28 = vpop.f32.mrf.mxu0 }
 0x696   :  { %v4577_v39 = vadd.f32 %v5811_v18, %v4405_v29  ;;  %v5713_v29 = vld [vmem:[#allocation8 + $0x3] ss:$0 sm:$0xff] }
 0x697   :  { %v5813_v12 = vpop.f32.mrf.mxu0 }
 0x698   :  { %v5814_v53 = vadd.f32 %v5813_v12, %v5812_v28  ;;  %v4749_v56 = vadd.f32 %v5833_v50, %v4577_v39 }
 0x69a   :  { %v4578_v59 = vadd.f32 %v5814_v53, %v4406_v51  ;;  %v4751_v44 = vmax.f32 %v4749_v56, 0.0 }
 0x69c   :  { %v4750_v15 = vadd.f32 %v5836_v55, %v4578_v59 }
 0x69e   :  { %v4752_v45 = vmax.f32 %v4750_v15, 0.0 }
 0x6a0   :  { %v4753_v52 = vpack.c.bf16 %v4752_v45, %v4751_v44 }
 0x6a2   :  { %5887 = vmatpush3.bf16.msra.mxu0 %v4753_v52 }
 0x6a3   :  { %5900 = vmatprep.subr.bf16.mxu0 %v6831_v13 }
 0x6a5   :  { %5889 = vmatmul.mubr.msk.bf16.vlgmr.msra.gmra.mxu0 %vm4152_vm2, %v6685_v58 }
 0x6a6   :  { %5892 = vmatprep.mubr.msk.bf16.mxu0 %vm6832_vm3, %v6831_v13  ;;  %5901 = vmatpush3.bf16.msra.mxu0 %v6688_v61 }
 0x6a7   :  { %5902 = vmatprep.subr.bf16.mxu0 %v6831_v13 }
 0x6aa   :  { %5903 = vmatpush3.bf16.msra.mxu0 %v6689_v19 }
 0x6ab   :  { %5904 = vmatprep.subr.bf16.mxu0 %v6831_v13 }
 0x6ad   :  { %5893 = vmatmul.mubr.msk.bf16.gmra.mxu0 %vm4152_vm2, %v6686_v17 }
 0x6ae   :  { %5896 = vmatprep.mubr.msk.bf16.mxu0 %vm6832_vm3, %v6831_v13  ;;  %5905 = vmatpush3.bf16.msra.mxu0 %v6690_v35 }
 0x6af   :  { %5906 = vmatprep.subr.bf16.mxu0 %v6831_v13 }
 0x6b2   :  { %5907 = vmatpush3.bf16.msra.mxu0 %v6692_v57 }
 0x6b3   :  { %5908 = vmatprep.subr.bf16.mxu0 %v6831_v13 }
 0x6b5   :  { %5897 = vmatmul.mubr.msk.bf16.gmra.mxu0 %vm4152_vm2, %v6687_v42 }
 0x6b6   :  { %5909 = vmatpush3.bf16.msra.mxu0 %v6694_v60  ;;  %5916 = vmatprep.mubr.msk.bf16.mxu0 %vm6832_vm3, %v6831_v13 }
 0x6b7   :  { %5910 = vmatprep.subr.bf16.mxu0 %v6831_v13 }
 0x6ba   :  { %5911 = vmatpush3.bf16.msra.mxu0 %v6696_v9 }
 0x6bb   :  { %5912 = vmatprep.subr.bf16.mxu0 %v6831_v13 }
 0x6be   :  { %5913 = vmatpush3.bf16.msra.mxu0 %v6698_v62 }
 0x6bf   :  { %5914 = vmatprep.subr.bf16.mxu0 %v6831_v13 }
 0x6c2   :  { %5915 = vmatpush3.bf16.msra.mxu0 %v6700_v0 }
 0x6c3   :  { %5940 = vmatprep.subr.bf16.mxu0 %v6831_v13 }
 0x765   :  { %v4818_v37 = vpop.f32.mrf.mxu0 }
 0x767   :  { %v5890_v7 = vpop.f32.mrf.mxu0 }
 0x769   :  { %v4821_v10 = vpop.f32.mrf.mxu0 }
 0x76a   :  { %v4841_v16 = vpack.c.bf16 %v4821_v10, %v4818_v37 }
 0x76b   :  { %v5891_v3 = vpop.f32.mrf.mxu0 }
 0x76c   :  { %5917 = vmatmul.mubr.bf16.vlgmr.msra.gmra.mxu0 %v4841_v16 }
 0x76d   :  { %5941 = vmatpush3.bf16.msra.mxu0 %v6702_v1  ;;  %v4826_v14 = vpop.f32.mrf.mxu0  ;;  %5956 = vmatprep.mubr.msk.bf16.mxu0 %vm6832_vm3, %v6831_v13 }
 0x76e   :  { %5942 = vmatprep.subr.bf16.mxu0 %v6831_v13 }
 0x76f   :  { %v5894_v24 = vpop.f32.mrf.mxu0 }
 0x771   :  { %5943 = vmatpush3.bf16.msra.mxu0 %v6704_v43  ;;  %v4829_v48 = vpop.f32.mrf.mxu0 }
 0x772   :  { %v4842_v54 = vpack.c.bf16 %v4829_v48, %v4826_v14  ;;  %5944 = vmatprep.subr.bf16.mxu0 %v6831_v13 }
 0x773   :  { %v5895_v41 = vpop.f32.mrf.mxu0 }
 0x774   :  { %5937 = vmatmul.mubr.bf16.vlgmr.msra.gmra.mxu1 %v4842_v54 }
 0x775   :  { %5945 = vmatpush3.bf16.msra.mxu0 %v6706_v21  ;;  %v4834_v26 = vpop.f32.mrf.mxu0 }
 0x776   :  { %5946 = vmatprep.subr.bf16.mxu0 %v6831_v13 }
 0x777   :  { %v5898_v22 = vpop.f32.mrf.mxu0 }
 0x779   :  { %5947 = vmatpush3.bf16.msra.mxu0 %v6707_v4  ;;  %v4837_v49 = vpop.f32.mrf.mxu0 }
 0x77a   :  { %5948 = vmatprep.subr.bf16.mxu0 %v6831_v13  ;;  %v4843_v32 = vpack.c.bf16 %v4837_v49, %v4834_v26 }
 0x77b   :  { %v5899_v23 = vpop.f32.mrf.mxu0 }
 0x77d   :  { %5949 = vmatpush3.bf16.msra.mxu0 %v6708_v5 }
 0x77e   :  { %5950 = vmatprep.subr.bf16.mxu0 %v6831_v13 }
 0x781   :  { %5951 = vmatpush3.bf16.msra.mxu0 %v6709_v25 }
 0x782   :  { %5952 = vmatprep.subr.bf16.mxu0 %v6831_v13 }
 0x785   :  { %5953 = vmatpush3.bf16.msra.mxu0 %v6710_v36 }
 0x786   :  { %5954 = vmatprep.subr.bf16.mxu0 %v6831_v13 }
 0x789   :  { %5955 = vmatpush3.bf16.msra.mxu0 %v6711_v38 }
 0x78c   :  { %5957 = vmatmul.mubr.bf16.vlgmr.msra.gmra.mxu0 %v4843_v32 }
 0x82c   :  { %v4943_v47 = vpop.f32.mrf.mxu0 }
 0x82d   :  { %v4953_v30 = vadd.f32 %v5713_v29, %v4943_v47 }
 0x82e   :  { %v5918_v8 = vpop.f32.mrf.mxu0 }
 0x830   :  { %v4946_v33 = vpop.f32.mrf.mxu0 }
 0x832   :  { %v5919_v63 = vpop.f32.mrf.mxu0 }
 0x834   :  { %v5053_v40 = vpop.f32.mrf.mxu1 }
 0x835   :  { %v5059_v18 = vadd.f32 %v5053_v40, %v4953_v30 }
 0x836   :  { %v5938_v46 = vpop.f32.mrf.mxu1 }
 0x838   :  { %v5056_v27 = vpop.f32.mrf.mxu1 }
 0x83a   :  { %v5939_v31 = vpop.f32.mrf.mxu1 }
 0x84c   :  { %v5159_v28 = vpop.f32.mrf.mxu0 }
 0x84d   :  { %v5165_v39 = vadd.f32 %v5159_v28, %v5059_v18 }
 0x84e   :  { %v5958_v13 = vpop.f32.mrf.mxu0 }
 0x84f   :  { %5167 = vst.msk [vmem:[#allocation10] sm:$0x3] %vm5166_vm4, %v5165_v39 }
 0x850   :  { %v5162_v11 = vpop.f32.mrf.mxu0 }
 0x851   :  { %6803 = shalt.err (!%p6800_p10)
}
 0x852   :  { %5177 = dma.vmem_to_hbm [thread:$0]  %s5175_s7, 32, %s7385_s10, [#allocation4]   ;;  %v5959_v12 = vpop.f32.mrf.mxu0 }
 0x853   :  { %6818 = dma.done.wait [#allocation4], 32  }
 0x854   :  { %6819 = vsyncadd [#allocation4], 4294967264 }
 0x855   :  { %5181 = vsyncpa [#allocation3], 1 }
 0x856   :  { %5182 = vsyncpa [#allocation6], 1 }
 0x857   :  { %5183 = vsyncpa [#allocation9], 1 }
 0x858   :  { %5184 = vsyncpa [#allocation4], 1 }

</bundles_post_ra>
